<compile_context>
chip_gen: v5e
topology: v5e:2x2
jax: 0.10.0
libtpu: 0.0.40
codegen_flags: <defaults>
</compile_context>

<pallas_src>
import functools
from itertools import product

import numpy as np
import jax
import jax.numpy as jnp
from jax import lax
from jax.experimental import pallas as pl
from jax.experimental.pallas import tpu as pltpu

LANE = 128          # TPU lane width: feature dims are padded to multiples of this
EPS = 1e-12         # F.normalize eps


def _round_up(x, m):
    return ((x + m - 1) // m) * m


def _tpu_vmem_capacity_bytes():
    try:
        return int(pltpu.get_tpu_info().vmem_capacity_bytes)
    except Exception:
        return 64 * 1024 * 1024   # v7x per-TensorCore VMEM (smallest of the target gens)


# ------------------------------ Pallas kernel ---------------------------------
def gcn_aggregate_kernel(col_ids_ref, row_nnz_ref, adj_ref, xw_ref, out_ref, *,
                         relu, normalize, tile, max_nnz, xw_resident):
    """One (row-tile i, nonzero-block j) step of out = adj @ xw (+ fused epilogue).

    col_ids_ref : SMEM flat (n_i*max_nnz,) column-block ids of the nonzero adj blocks
                  of row-tile i (last valid id repeated for padded j -> DMA skipped).
    row_nnz_ref : SMEM (n_i,) number of nonzero adjacency blocks in row-tile i.
    adj_ref     : (tile, tile) bf16 adjacency tile (data-dependent column block).
    xw_ref      : bf16 X@W+b — either the full (n_pad, dout) operand resident in VMEM
                  or the (tile, dout) column-block tile selected by col_ids.
    out_ref     : (tile, dout) f32 output block; block index (i, 0) is constant across
                  j, so it doubles as the resident accumulator (no scratch needed).
    """
    i = pl.program_id(0)
    j = pl.program_id(1)

    @pl.when(j == 0)
    def _init():
        out_ref[...] = jnp.zeros_like(out_ref)

    # Only real (nonzero) adjacency blocks do MXU work; padded trailing steps repeat
    # the previous block index so their adj/xw DMAs are skipped and this is gated off.
    @pl.when(j < row_nnz_ref[i])
    def _accumulate():
        if xw_resident:
            col = col_ids_ref[i * max_nnz + j]
            start = pl.multiple_of(col * tile, tile)
            xw_tile = xw_ref[pl.ds(start, tile), :]
        else:
            xw_tile = xw_ref[...]
        out_ref[...] += jnp.dot(adj_ref[...], xw_tile,
                                preferred_element_type=jnp.float32)

    @pl.when(j == max_nnz - 1)
    def _finalize():
        h = out_ref[...]                       # epilogue kept in f32 (v5e: no bf16 VPU/EUP)
        if relu:
            h = jnp.maximum(h, 0.0)
        if normalize:
            # F.normalize(h, p=2, dim=1, eps=1e-12) == h * rsqrt(max(|h|^2, eps^2));
            # rsqrt goes to the otherwise-idle EUP slot.
            ss = jnp.sum(h * h, axis=-1, keepdims=True)
            h = h * lax.rsqrt(jnp.maximum(ss, EPS * EPS))
        out_ref[...] = h


def gcn_aggregate(adj_pad, col_ids, row_nnz, xw_pad, *, relu, normalize,
                  tile, max_nnz, nnz_blocks):
    """Block-sparse, compacted-grid  adj_pad @ xw_pad  with fused ReLU / L2-normalize."""
    n_pad = adj_pad.shape[0]
    dout_pad = xw_pad.shape[1]
    n_i = n_pad // tile

    vmem_cap = _tpu_vmem_capacity_bytes()
    # Per-generation scoped-VMEM budget: ~half of physical VMEM
    # (v5e/v6e: 64 MiB of 128; v7x: 32 MiB of 64) — never rely on the small default.
    vmem_limit = int(min(vmem_cap // 2, 100 * 1024 * 1024))

    # Hold the whole XW+b operand resident in VMEM when it comfortably fits (kills all
    # xw re-streaming — the dominant HBM stream on v5e/v6e); otherwise stream only the
    # column tiles named by the CSR block map (zero blocks never cost an xw DMA either).
    xw_resident = (n_pad * dout_pad * 2) <= (vmem_limit // 4)

    kernel = functools.partial(gcn_aggregate_kernel, relu=relu, normalize=normalize,
                               tile=tile, max_nnz=max_nnz, xw_resident=xw_resident)

    # Adjacency tile: data-dependent column block from the compacted CSR map; a repeated
    # index for padded steps means Pallas skips the HBM->VMEM DMA entirely.
    adj_spec = pl.BlockSpec((tile, tile),
                            lambda i, j, cols, nnz: (i, cols[i * max_nnz + j]))
    if xw_resident:
        xw_spec = pl.BlockSpec((n_pad, dout_pad), lambda i, j, cols, nnz: (0, 0))
    else:
        xw_spec = pl.BlockSpec((tile, dout_pad),
                               lambda i, j, cols, nnz: (cols[i * max_nnz + j], 0))

    grid_spec = pltpu.PrefetchScalarGridSpec(
        num_scalar_prefetch=2,                       # flat col_ids + row_nnz (SMEM)
        grid=(n_i, max_nnz),                         # rows parallel, reduction last
        in_specs=[adj_spec, xw_spec],
        out_specs=pl.BlockSpec((tile, dout_pad), lambda i, j, cols, nnz: (i, 0)),
    )

    xw_bytes = (n_pad * dout_pad * 2) if xw_resident else (nnz_blocks * tile * dout_pad * 2)
    cost = pl.CostEstimate(
        flops=int(2 * nnz_blocks * tile * tile * dout_pad),
        transcendentals=int(n_pad if normalize else 0),
        bytes_accessed=int(nnz_blocks * tile * tile * 2      # bf16 adj tiles (nonzero only)
                           + xw_bytes                        # bf16 xw stream / residence
                           + n_pad * dout_pad * 4),          # f32 output
    )

    return pl.pallas_call(
        kernel,
        out_shape=jax.ShapeDtypeStruct((n_pad, dout_pad), jnp.float32),
        grid_spec=grid_spec,
        compiler_params=pltpu.CompilerParams(
            # row-tile axis shardable across TensorCores (v7x megacore),
            # compacted contraction axis sequential for the resident output block.
            dimension_semantics=("parallel", "arbitrary"),
            vmem_limit_bytes=vmem_limit,
        ),
        cost_estimate=cost,
    )(col_ids, row_nnz, adj_pad, xw_pad)


# ------------------------- adjacency (adj_from_pairs) --------------------------
def build_adj(num_attrs, num_objs, pairs):
    """Close-world adjacency from GraphFull.adj_from_pairs, then normt_spm('in')."""
    elem = num_attrs + num_objs
    n = elem + len(pairs)
    adj = np.zeros((n, n), dtype=np.float64)
    for i in range(elem):
        adj[i, i] = 1.0
    for idx, (a, o) in enumerate(pairs):
        ai, oi = a, num_attrs + o
        p = elem + idx
        adj[ai, oi] = 1.0
        adj[oi, ai] = 1.0
        adj[p, p] = 1.0
        adj[p, ai] = 1.0
        adj[p, oi] = 1.0
        adj[ai, p] = 1.0
        adj[oi, p] = 1.0
    # normt_spm(mx, method='in'): transpose, then row-normalize by row sum.
    adj = adj.T
    rowsum = adj.sum(axis=1, keepdims=True)
    inv = np.where(rowsum > 0, 1.0 / rowsum, 0.0)
    return (adj * inv).astype(np.float32)


def build_csr_block_map(adj_pad_np, tile):
    """Compacted per-row-tile nonzero column-block lists (flat 1D, SMEM-friendly).

    Returns (col_ids[n_i*max_nnz], row_nnz[n_i], max_nnz, nnz_blocks).  For j beyond a
    row's nnz count the last valid column id is repeated so consecutive padded steps
    re-use the already-fetched block (Pallas skips the DMA) while pl.when(j < nnz[i])
    gates the matmul — the guard and the map come from the same source by construction.
    """
    nb = adj_pad_np.shape[0] // tile
    row_cols = []
    for i in range(nb):
        cols = [k for k in range(nb)
                if np.any(adj_pad_np[i * tile:(i + 1) * tile,
                                     k * tile:(k + 1) * tile] != 0.0)]
        row_cols.append(cols)
    max_nnz = max(1, max(len(c) for c in row_cols))
    col_ids = np.zeros((nb, max_nnz), dtype=np.int32)
    row_nnz = np.zeros((nb,), dtype=np.int32)
    for i, cols in enumerate(row_cols):
        row_nnz[i] = len(cols)
        for j in range(max_nnz):
            col_ids[i, j] = cols[min(j, len(cols) - 1)] if cols else 0
    nnz_blocks = int(row_nnz.sum())
    return col_ids.reshape(-1), row_nnz, int(max_nnz), nnz_blocks


# --------------------------------- GraphFull -----------------------------------
class GraphFullPallas:
    """Pallas port of GraphFull (close-world graph, 'gcn' branch)."""

    def __init__(self, key, num_attrs, num_objs, emb_dim, hidden_dims, *, tile=None):
        self.num_attrs = num_attrs
        self.num_objs = num_objs
        self.emb_dim = emb_dim
        self.pairs = list(product(range(num_attrs), range(num_objs)))  # dset.all_pairs
        self.num_pairs = len(self.pairs)

        adj = build_adj(num_attrs, num_objs, self.pairs)               # (N, N) f32
        self.n = adj.shape[0]

        # ---- tiling: lane-aligned square tiles, sized per problem / generation ----
        if tile is None:
            n_lane = _round_up(self.n, LANE)
            # Tiny graphs: one block (grid (1,1)) — no per-step overhead, no block map.
            # Large graphs: 256 fills the 256x256 MXU on v6e/v7x, fits the 32 MiB v7x
            # scoped-VMEM budget and is still fine on v5e's 4x128x128 MXU.
            tile = n_lane if n_lane <= 1024 else 256
        assert tile % LANE == 0
        self.tile = tile
        self.n_pad = _round_up(self.n, tile)

        adj_pad = np.zeros((self.n_pad, self.n_pad), dtype=np.float32)
        adj_pad[:self.n, :self.n] = adj
        col_ids, row_nnz, max_nnz, nnz_blocks = build_csr_block_map(adj_pad, tile)
        # TODO(synk): on v7x (2 TensorCores) reorder row-tiles so each half of the
        # 'parallel' row axis carries a similar nnz_blocks count (load balance).
        self.col_ids = jnp.asarray(col_ids, dtype=jnp.int32)
        self.row_nnz = jnp.asarray(row_nnz, dtype=jnp.int32)
        self.max_nnz = max_nnz
        self.nnz_blocks = nnz_blocks
        # adjacency stored once in bf16: halves the dominant HBM stream + bf16 MXU rate
        self.adj_pad = jnp.asarray(adj_pad, dtype=jnp.bfloat16)

        # ---- GraphConv params, zero-padded to lane-dense (multiple-of-128) dims ----
        dims = [emb_dim] + list(hidden_dims) + [emb_dim]               # args.graph_gr_emb
        self.dims = dims
        self.dims_pad = [_round_up(d, LANE) for d in dims]
        self.params_pad = []
        for i in range(len(dims) - 1):
            key, kw, kb = jax.random.split(key, 3)
            lim = 1.0 / np.sqrt(dims[i])                               # nn.Linear default init
            w = jax.random.uniform(kw, (dims[i], dims[i + 1]), jnp.float32, -lim, lim)
            b = jax.random.uniform(kb, (1, dims[i + 1]), jnp.float32, -lim, lim)
            w_pad = jnp.zeros((self.dims_pad[i], self.dims_pad[i + 1]), jnp.float32)
            w_pad = w_pad.at[:dims[i], :dims[i + 1]].set(w)
            b_pad = jnp.zeros((1, self.dims_pad[i + 1]), jnp.float32)
            b_pad = b_pad.at[:, :dims[i + 1]].set(b)
            self.params_pad.append((w_pad, b_pad))

    def __call__(self, embeddings):
        # forward(embeddings) -> train_forward_normal -> self.gcn(embeddings)
        x = jnp.zeros((self.n_pad, self.dims_pad[0]), jnp.float32)
        x = x.at[:self.n, :self.emb_dim].set(embeddings.astype(jnp.float32))
        nl = len(self.params_pad)
        for i, (w, b) in enumerate(self.params_pad):
            last = i == nl - 1
            # Tiny Linear hoisted to XLA with bf16 operands / f32 accumulation (the old
            # Precision.HIGHEST multi-pass emulation was wasted: the result is fed to
            # the adjacency MXU pass as bf16 anyway).
            xw = jnp.dot(x.astype(jnp.bfloat16), w.astype(jnp.bfloat16),
                         preferred_element_type=jnp.float32) + b
            xw = xw.astype(jnp.bfloat16)
            # NOTE: hidden-layer outputs could be emitted bf16 for extra bandwidth; kept
            # f32 here to keep the reference comparison tight.
            x = gcn_aggregate(self.adj_pad, self.col_ids, self.row_nnz, xw,
                              relu=not last, normalize=last,
                              tile=self.tile, max_nnz=self.max_nnz,
                              nnz_blocks=self.nnz_blocks)
        return x[:self.n, :self.emb_dim]

    # ------------------------------ reference ---------------------------------
    @staticmethod
    def _bf16(a_f64):
        # round-to-nearest-even bf16 quantization, mirroring the kernel inputs
        return np.asarray(
            jnp.asarray(np.asarray(a_f64, dtype=np.float32), jnp.bfloat16).astype(jnp.float32),
            dtype=np.float64)

    def reference(self, embeddings):
        """NumPy float64 reference using the same bf16-quantized MXU operands."""
        adj = np.asarray(self.adj_pad.astype(jnp.float32), dtype=np.float64)
        x = np.zeros((self.n_pad, self.dims_pad[0]), dtype=np.float64)
        x[:self.n, :self.emb_dim] = np.asarray(embeddings, dtype=np.float64)
        nl = len(self.params_pad)
        for i, (w, b) in enumerate(self.params_pad):
            xq = self._bf16(x)                                  # mirrors x.astype(bf16)
            wq = self._bf16(np.asarray(w, dtype=np.float64))    # mirrors w.astype(bf16)
            xw = xq @ wq + np.asarray(b, dtype=np.float64)
            h = adj @ self._bf16(xw)                            # mirrors xw fed bf16 to MXU
            if i != nl - 1:
                h = np.maximum(h, 0.0)
            x = h
        nrm = np.sqrt(np.sum(x * x, axis=1, keepdims=True))
        x = x / np.maximum(nrm, EPS)
        return x[:self.n, :self.emb_dim]


# ----------------------------------- main ---------------------------------------
if __name__ == "__main__":
    key = jax.random.PRNGKey(0)

    num_attrs, num_objs = 8, 40             # -> 320 pairs, N = 368 nodes (pad -> 384)
    emb_dim = 32                             # args.graph_emb_dim
    hidden_dims = (64,)                      # args.graph_gr_emb (small synthetic)

    key, kmodel, kemb = jax.random.split(key, 3)
    n_nodes = num_attrs + num_objs + num_attrs * num_objs
    embeddings = jax.random.normal(kemb, (n_nodes, emb_dim), dtype=jnp.float32)

    # (a) Production-style default for this tiny graph: single-block kernel
    #     (tile = n_pad, grid (1,1)) — no block-sparse machinery, no per-step overhead.
    model_auto = GraphFullPallas(kmodel, num_attrs, num_objs, emb_dim, hidden_dims)
    out_auto = jax.block_until_ready(jax.jit(model_auto.__call__)(embeddings))

    # (b) tile=128 to exercise the compacted CSR block grid (3x3 block structure with
    #     zero pair/pair off-diagonal blocks skipped) that matters for full-size graphs.
    model_tiled = GraphFullPallas(kmodel, num_attrs, num_objs, emb_dim, hidden_dims,
                                  tile=128)
    out_tiled = jax.block_until_ready(jax.jit(model_tiled.__call__)(embeddings))

    ref = model_auto.reference(embeddings)
    # Tolerance covers the intentional bf16 MXU-operand quantization (the reference
    # applies the same quantization; residual differences come from f32 vs f64
    # accumulation order, bf16 re-rounding of intermediates and EUP rsqrt rounding).
    np.testing.assert_allclose(np.asarray(out_auto), ref, rtol=1e-2, atol=2.5e-3)
    np.testing.assert_allclose(np.asarray(out_tiled), ref, rtol=1e-2, atol=2.5e-3)

    assert out_auto.shape == (n_nodes, emb_dim)
    assert out_tiled.shape == (n_nodes, emb_dim)
    print("KERNEL_OK")
</pallas_src>

<mosaic_0001>
module attributes {stable_mosaic.version = 11 : i64} {
  func.func @gcn_aggregate_kernel(%arg0: i32, %arg1: i32, %arg2: memref<1xi32, #tpu.memory_space<smem>>, %arg3: memref<1xi32, #tpu.memory_space<smem>>, %arg4: memref<384x384xbf16, #tpu.memory_space<vmem>>, %arg5: memref<384x128xbf16, #tpu.memory_space<vmem>>, %arg6: memref<384x128xf32, #tpu.memory_space<vmem>>) attributes {dimension_semantics = [#tpu.dimension_semantics<parallel>, #tpu.dimension_semantics<arbitrary>], iteration_bounds = array<i64: 1, 1>, scalar_prefetch = 2 : i64, scratch_operands = 0 : i64, tpu.core_type = #tpu.core_type<tc>, window_params = [{transform_indices = @transform_0, window_bounds = array<i64: 384, 384>}, {pipeline_mode = #tpu.pipeline_mode<synchronous>, transform_indices = @transform_1, window_bounds = array<i64: 384, 128>}, {transform_indices = @transform_2, window_bounds = array<i64: 384, 128>}]} {
    %c0_i32 = arith.constant 0 : i32
    %0 = arith.cmpi eq, %arg1, %c0_i32 : i32
    %1 = arith.extui %0 : i1 to i32
    %c0_i32_0 = arith.constant 0 : i32
    %2 = arith.cmpi ne, %1, %c0_i32_0 : i32
    scf.if %2 {
      %cst = arith.constant 0.000000e+00 : f32
      %11 = vector.broadcast %cst : f32 to vector<384x128xf32>
      %c0 = arith.constant 0 : index
      %c0_4 = arith.constant 0 : index
      %12 = vector.load %arg6[%c0, %c0_4] : memref<384x128xf32, #tpu.memory_space<vmem>>, vector<384x128xf32>
      tpu.vector_store %arg6[%c0, %c0_4], %11 {strides = array<i32>} : memref<384x128xf32, #tpu.memory_space<vmem>>, vector<384x128xf32>,
    } else {
    }
    %3 = arith.index_cast %arg0 : i32 to index
    %4 = memref.load %arg3[%3] : memref<1xi32, #tpu.memory_space<smem>>
    %5 = arith.cmpi slt, %arg1, %4 : i32
    %6 = arith.extui %5 : i1 to i32
    %c0_i32_1 = arith.constant 0 : i32
    %7 = arith.cmpi ne, %6, %c0_i32_1 : i32
    scf.if %7 {
      %c1_i32 = arith.constant 1 : i32
      %11 = arith.muli %arg0, %c1_i32 : i32
      %12 = arith.addi %11, %arg1 : i32
      %13 = arith.index_cast %12 : i32 to index
      %14 = memref.load %arg2[%13] : memref<1xi32, #tpu.memory_space<smem>>
      %c384_i32 = arith.constant 384 : i32
      %15 = arith.muli %14, %c384_i32 : i32
      %16 = tpu.assume_multiple %15, 384 : i32
      %17 = arith.index_cast %16 : i32 to index
      %c0 = arith.constant 0 : index
      %18 = vector.load %arg5[%17, %c0] : memref<384x128xbf16, #tpu.memory_space<vmem>>, vector<384x128xbf16>
      %c0_4 = arith.constant 0 : index
      %c0_5 = arith.constant 0 : index
      %19 = vector.load %arg6[%c0_4, %c0_5] : memref<384x128xf32, #tpu.memory_space<vmem>>, vector<384x128xf32>
      %c0_6 = arith.constant 0 : index
      %c0_7 = arith.constant 0 : index
      %20 = vector.load %arg4[%c0_6, %c0_7] : memref<384x384xbf16, #tpu.memory_space<vmem>>, vector<384x384xbf16>
      %cst = arith.constant dense<0.000000e+00> : vector<384x128xf32>
      %21 = tpu.matmul %20, %18, %cst {dimension_numbers = #tpu.dot_dimension_numbers<[1], [0], [0], [1], [0, 0, 1, 1], [], []>} : vector<384x384xbf16>, vector<384x128xbf16>, vector<384x128xf32> -> vector<384x128xf32>
      %22 = arith.addf %19, %21 : vector<384x128xf32>
      %c0_8 = arith.constant 0 : index
      %c0_9 = arith.constant 0 : index
      %23 = vector.load %arg6[%c0_8, %c0_9] : memref<384x128xf32, #tpu.memory_space<vmem>>, vector<384x128xf32>
      tpu.vector_store %arg6[%c0_8, %c0_9], %22 {strides = array<i32>} : memref<384x128xf32, #tpu.memory_space<vmem>>, vector<384x128xf32>,
    } else {
    }
    %c0_i32_2 = arith.constant 0 : i32
    %8 = arith.cmpi eq, %arg1, %c0_i32_2 : i32
    %9 = arith.extui %8 : i1 to i32
    %c0_i32_3 = arith.constant 0 : i32
    %10 = arith.cmpi ne, %9, %c0_i32_3 : i32
    scf.if %10 {
      %c0 = arith.constant 0 : index
      %c0_4 = arith.constant 0 : index
      %11 = vector.load %arg6[%c0, %c0_4] : memref<384x128xf32, #tpu.memory_space<vmem>>, vector<384x128xf32>
      %cst = arith.constant 0.000000e+00 : f32
      %12 = vector.broadcast %cst : f32 to vector<384x128xf32>
      %13 = arith.maximumf %11, %12 : vector<384x128xf32>
      %c0_5 = arith.constant 0 : index
      %c0_6 = arith.constant 0 : index
      %14 = vector.load %arg6[%c0_5, %c0_6] : memref<384x128xf32, #tpu.memory_space<vmem>>, vector<384x128xf32>
      tpu.vector_store %arg6[%c0_5, %c0_6], %13 {strides = array<i32>} : memref<384x128xf32, #tpu.memory_space<vmem>>, vector<384x128xf32>,
    } else {
    }
    return
  }
  func.func @transform_0(%arg0: i32, %arg1: i32, %arg2: memref<1xi32, #tpu.memory_space<smem>>, %arg3: memref<1xi32, #tpu.memory_space<smem>>) -> (i32, i32) {
    %c1_i32 = arith.constant 1 : i32
    %0 = arith.muli %arg0, %c1_i32 : i32
    %1 = arith.addi %0, %arg1 : i32
    %2 = arith.index_cast %1 : i32 to index
    %3 = memref.load %arg2[%2] : memref<1xi32, #tpu.memory_space<smem>>
    %c0_i32 = arith.constant 0 : i32
    return %arg0, %3 : i32, i32
  }
  func.func @transform_1(%arg0: i32, %arg1: i32, %arg2: memref<1xi32, #tpu.memory_space<smem>>, %arg3: memref<1xi32, #tpu.memory_space<smem>>) -> (i32, i32) {
    %c0_i32 = arith.constant 0 : i32
    %c0_i32_0 = arith.constant 0 : i32
    %c0_i32_1 = arith.constant 0 : i32
    return %c0_i32, %c0_i32_0 : i32, i32
  }
  func.func @transform_2(%arg0: i32, %arg1: i32, %arg2: memref<1xi32, #tpu.memory_space<smem>>, %arg3: memref<1xi32, #tpu.memory_space<smem>>) -> (i32, i32) {
    %c0_i32 = arith.constant 0 : i32
    %c0_i32_0 = arith.constant 0 : i32
    return %arg0, %c0_i32 : i32, i32
  }
}

module attributes {stable_mosaic.version = 11 : i64} {
  func.func @gcn_aggregate_kernel(%arg0: i32, %arg1: i32, %arg2: memref<1xi32, #tpu.memory_space<smem>>, %arg3: memref<1xi32, #tpu.memory_space<smem>>, %arg4: memref<384x384xbf16, #tpu.memory_space<vmem>>, %arg5: memref<384x128xbf16, #tpu.memory_space<vmem>>, %arg6: memref<384x128xf32, #tpu.memory_space<vmem>>) attributes {dimension_semantics = [#tpu.dimension_semantics<parallel>, #tpu.dimension_semantics<arbitrary>], iteration_bounds = array<i64: 1, 1>, scalar_prefetch = 2 : i64, scratch_operands = 0 : i64, tpu.core_type = #tpu.core_type<tc>, window_params = [{transform_indices = @transform_0, window_bounds = array<i64: 384, 384>}, {pipeline_mode = #tpu.pipeline_mode<synchronous>, transform_indices = @transform_1, window_bounds = array<i64: 384, 128>}, {transform_indices = @transform_2, window_bounds = array<i64: 384, 128>}]} {
    %c0_i32 = arith.constant 0 : i32
    %0 = arith.cmpi eq, %arg1, %c0_i32 : i32
    %1 = arith.extui %0 : i1 to i32
    %c0_i32_0 = arith.constant 0 : i32
    %2 = arith.cmpi ne, %1, %c0_i32_0 : i32
    scf.if %2 {
      %cst = arith.constant 0.000000e+00 : f32
      %11 = vector.broadcast %cst : f32 to vector<384x128xf32>
      %c0 = arith.constant 0 : index
      %c0_4 = arith.constant 0 : index
      %12 = vector.load %arg6[%c0, %c0_4] : memref<384x128xf32, #tpu.memory_space<vmem>>, vector<384x128xf32>
      tpu.vector_store %arg6[%c0, %c0_4], %11 {strides = array<i32>} : memref<384x128xf32, #tpu.memory_space<vmem>>, vector<384x128xf32>,
    } else {
    }
    %3 = arith.index_cast %arg0 : i32 to index
    %4 = memref.load %arg3[%3] : memref<1xi32, #tpu.memory_space<smem>>
    %5 = arith.cmpi slt, %arg1, %4 : i32
    %6 = arith.extui %5 : i1 to i32
    %c0_i32_1 = arith.constant 0 : i32
    %7 = arith.cmpi ne, %6, %c0_i32_1 : i32
    scf.if %7 {
      %c1_i32 = arith.constant 1 : i32
      %11 = arith.muli %arg0, %c1_i32 : i32
      %12 = arith.addi %11, %arg1 : i32
      %13 = arith.index_cast %12 : i32 to index
      %14 = memref.load %arg2[%13] : memref<1xi32, #tpu.memory_space<smem>>
      %c384_i32 = arith.constant 384 : i32
      %15 = arith.muli %14, %c384_i32 : i32
      %16 = tpu.assume_multiple %15, 384 : i32
      %17 = arith.index_cast %16 : i32 to index
      %c0 = arith.constant 0 : index
      %18 = vector.load %arg5[%17, %c0] : memref<384x128xbf16, #tpu.memory_space<vmem>>, vector<384x128xbf16>
      %c0_4 = arith.constant 0 : index
      %c0_5 = arith.constant 0 : index
      %19 = vector.load %arg6[%c0_4, %c0_5] : memref<384x128xf32, #tpu.memory_space<vmem>>, vector<384x128xf32>
      %c0_6 = arith.constant 0 : index
      %c0_7 = arith.constant 0 : index
      %20 = vector.load %arg4[%c0_6, %c0_7] : memref<384x384xbf16, #tpu.memory_space<vmem>>, vector<384x384xbf16>
      %cst = arith.constant dense<0.000000e+00> : vector<384x128xf32>
      %21 = tpu.matmul %20, %18, %cst {dimension_numbers = #tpu.dot_dimension_numbers<[1], [0], [0], [1], [0, 0, 1, 1], [], []>} : vector<384x384xbf16>, vector<384x128xbf16>, vector<384x128xf32> -> vector<384x128xf32>
      %22 = arith.addf %19, %21 : vector<384x128xf32>
      %c0_8 = arith.constant 0 : index
      %c0_9 = arith.constant 0 : index
      %23 = vector.load %arg6[%c0_8, %c0_9] : memref<384x128xf32, #tpu.memory_space<vmem>>, vector<384x128xf32>
      tpu.vector_store %arg6[%c0_8, %c0_9], %22 {strides = array<i32>} : memref<384x128xf32, #tpu.memory_space<vmem>>, vector<384x128xf32>,
    } else {
    }
    %c0_i32_2 = arith.constant 0 : i32
    %8 = arith.cmpi eq, %arg1, %c0_i32_2 : i32
    %9 = arith.extui %8 : i1 to i32
    %c0_i32_3 = arith.constant 0 : i32
    %10 = arith.cmpi ne, %9, %c0_i32_3 : i32
    scf.if %10 {
      %c0 = arith.constant 0 : index
      %c0_4 = arith.constant 0 : index
      %11 = vector.load %arg6[%c0, %c0_4] : memref<384x128xf32, #tpu.memory_space<vmem>>, vector<384x128xf32>
      %12 = arith.mulf %11, %11 : vector<384x128xf32>
      %cst = arith.constant dense<0.000000e+00> : vector<384xf32>
      %13 = vector.multi_reduction <add>, %12, %cst [1] : vector<384x128xf32> to vector<384xf32>
      %14 = vector.shape_cast %13 : vector<384xf32> to vector<384x1xf32>
      %cst_5 = arith.constant 1.000000e-24 : f32
      %15 = vector.broadcast %cst_5 : f32 to vector<384x1xf32>
      %16 = arith.maximumf %14, %15 : vector<384x1xf32>
      %17 = math.rsqrt %16 : vector<384x1xf32>
      %18 = vector.broadcast %17 : vector<384x1xf32> to vector<384x128xf32>
      %19 = arith.mulf %11, %18 : vector<384x128xf32>
      %c0_6 = arith.constant 0 : index
      %c0_7 = arith.constant 0 : index
      %20 = vector.load %arg6[%c0_6, %c0_7] : memref<384x128xf32, #tpu.memory_space<vmem>>, vector<384x128xf32>
      tpu.vector_store %arg6[%c0_6, %c0_7], %19 {strides = array<i32>} : memref<384x128xf32, #tpu.memory_space<vmem>>, vector<384x128xf32>,
    } else {
    }
    return
  }
  func.func @transform_0(%arg0: i32, %arg1: i32, %arg2: memref<1xi32, #tpu.memory_space<smem>>, %arg3: memref<1xi32, #tpu.memory_space<smem>>) -> (i32, i32) {
    %c1_i32 = arith.constant 1 : i32
    %0 = arith.muli %arg0, %c1_i32 : i32
    %1 = arith.addi %0, %arg1 : i32
    %2 = arith.index_cast %1 : i32 to index
    %3 = memref.load %arg2[%2] : memref<1xi32, #tpu.memory_space<smem>>
    %c0_i32 = arith.constant 0 : i32
    return %arg0, %3 : i32, i32
  }
  func.func @transform_1(%arg0: i32, %arg1: i32, %arg2: memref<1xi32, #tpu.memory_space<smem>>, %arg3: memref<1xi32, #tpu.memory_space<smem>>) -> (i32, i32) {
    %c0_i32 = arith.constant 0 : i32
    %c0_i32_0 = arith.constant 0 : i32
    %c0_i32_1 = arith.constant 0 : i32
    return %c0_i32, %c0_i32_0 : i32, i32
  }
  func.func @transform_2(%arg0: i32, %arg1: i32, %arg2: memref<1xi32, #tpu.memory_space<smem>>, %arg3: memref<1xi32, #tpu.memory_space<smem>>) -> (i32, i32) {
    %c0_i32 = arith.constant 0 : i32
    %c0_i32_0 = arith.constant 0 : i32
    return %arg0, %c0_i32 : i32, i32
  }
}

</mosaic_0001>

<bundles_post_ra>
// kernel: a_call__.2
= control target key start
LH: loop header
LB: loop body
LE: loop exit
PB: predicated region body
PF: predicated region fallthrough
CT: control target
= control target key end

     0   :  { %s2906_s0 = inlined_call_operand.<no memory space> [shape: s32[1], index: 0, kind: input, shape index: {}]   ;;  %s2907_s1 = inlined_call_operand.<no memory space> [shape: s32[1], index: 1, kind: input, shape index: {}]   ;;  %s2908_s2 = inlined_call_operand.hbm [shape: bf16[384,384], index: 2, kind: input, shape index: {}]   ;;  %s2909_s3 = inlined_call_operand.vmem [shape: bf16[384,128], index: 3, kind: input, shape index: {}]   ;;  %s2910_s4 = inlined_call_operand.vmem [shape: f32[384,128], index: 4, kind: output, shape index: {}]  }
   0x1   :  { %9 = sst [smem:[#allocation3]] %s2906_s0 }
   0x2   :  { %11 = vsyncpa [#allocation6], 0  ;;  %s15_s17 = sld [smem:[#allocation3]]  ;;  %s2001_s18 = smov [#allocation5]  }
   0x3   :  { %s23_s19 = sshll.u32 %s2001_s18, 4  ;;  %s1979_s0 = scalar_lea.hbm %s2908_s2, 576  ;;  %s24_s19 = int_to_ptr.vmem [resolvable:$true] %s23_s19 }
   0x8   :  { %s1850_s20 = smul.u32 12, %s15_s17 }
   0xa   :  { %s20_s23 = scalar_lea.hbm %s2908_s2, %s1850_s20 }
   0xb   :  { %s21_s24 = sshll.u32 %s20_s23, 4  ;;  %s22_s24 = int_to_ptr.hbm [resolvable:$true] %s21_s24 }
   0xc   :  { %s1975_s25 = sshra.s32 %s22_s24, 4  ;;  %s1976_s25 = int_to_ptr.hbm [resolvable:$true] %s1975_s25 }
   0xd   :  { %s1977_s26 = scalar_lea.hbm %s1976_s25, 576  ;;  %p1980_p1 = scmp.lt.s32.totalorder %s1976_s25, %s2908_s2 }
   0xe   :  { %p1978_p0 = scmp.ne.s32.totalorder %s1976_s25, %s1977_s26  ;;  %p1981_p2 = scmp.lt.s32.totalorder %s1979_s0, %s1977_s26 }
  0x10   :  { %p1982_p3 = por %p1981_p2, %p1980_p1 }
  0x12   :  { %p1983_p4 = pnand %p1982_p3, %p1978_p0 }
  0x14   :  { %1986 = shalt.err (!%p1983_p4)
}
  0x15   :  { %s2002_s5 = smov 192   ;;  %s2003_s6 = smov 12  }
  0x16   :  { %29 = dma.hbm_to_vmem [thread:$0]  %s22_s24, 9216, %s24_s19, [#allocation6], %s2002_s5, %s2002_s5, %s2003_s6  }
  0x17   :  { %1999 = dma.done.wait [#allocation6], 9216  }
  0x18   :  { %2000 = vsyncadd [#allocation6], 4294958080  ;;  %v2004_v0 = vmov 0.0   ;;  %p1464_p5 = scmp.le.s32.totalorder %s2907_s1, 0 }
  0x19   :  { %43 = vst [vmem:[%s2910_s4] sm:$0xff] %v2004_v0  ;;  %s97_s20 = sld [smem:[#allocation3]] (!%p1464_p5) }
  0x1a   :  { %44 = vst [vmem:[%s2910_s4 + $0x8] sm:$0xff] %v2004_v0 }
  0x1b   :  { %45 = vst [vmem:[%s2910_s4 + $0x10] sm:$0xff] %v2004_v0 }
  0x1c   :  { %46 = vst [vmem:[%s2910_s4 + $0x18] sm:$0xff] %v2004_v0 }
  0x1d   :  { %47 = vst [vmem:[%s2910_s4 + $0x20] sm:$0xff] %v2004_v0 }
  0x1e   :  { %48 = vst [vmem:[%s2910_s4 + $0x28] sm:$0xff] %v2004_v0 }
  0x1f   :  { %49 = vst [vmem:[%s2910_s4 + $0x30] sm:$0xff] %v2004_v0  ;;  %s98_s21 = smul.u32 (!%p1464_p5), 384, %s97_s20 }
  0x20   :  { %50 = vst [vmem:[%s2910_s4 + $0x38] sm:$0xff] %v2004_v0 }
  0x21   :  { %51 = vst [vmem:[%s2910_s4 + $0x40] sm:$0xff] %v2004_v0  ;;  %s99_s22 = sshra.s32 (!%p1464_p5), %s98_s21, 3 }
  0x22   :  { %52 = vst [vmem:[%s2910_s4 + $0x48] sm:$0xff] %v2004_v0  ;;  %s1465_s23 = sshll.u32 (!%p1464_p5), %s99_s22, 2 }
  0x23   :  { %53 = vst [vmem:[%s2910_s4 + $0x50] sm:$0xff] %v2004_v0  ;;  %s2192_s26 = scalar_lea.vmem (!%p1464_p5), %s2909_s3, %s1465_s23 }
  0x24   :  { %54 = vst [vmem:[%s2910_s4 + $0x58] sm:$0xff] %v2004_v0 }
  0x25   :  { %55 = vst [vmem:[%s2910_s4 + $0x60] sm:$0xff] %v2004_v0 }
  0x26   :  { %56 = vst [vmem:[%s2910_s4 + $0x68] sm:$0xff] %v2004_v0 }
  0x27   :  { %57 = vst [vmem:[%s2910_s4 + $0x70] sm:$0xff] %v2004_v0 }
  0x28   :  { %58 = vst [vmem:[%s2910_s4 + $0x78] sm:$0xff] %v2004_v0 }
  0x29   :  { %59 = vst [vmem:[%s2910_s4 + $0x80] sm:$0xff] %v2004_v0 }
  0x2a   :  { %60 = vst [vmem:[%s2910_s4 + $0x88] sm:$0xff] %v2004_v0 }
  0x2b   :  { %61 = vst [vmem:[%s2910_s4 + $0x90] sm:$0xff] %v2004_v0 }
  0x2c   :  { %62 = vst [vmem:[%s2910_s4 + $0x98] sm:$0xff] %v2004_v0 }
  0x2d   :  { %63 = vst [vmem:[%s2910_s4 + $0xa0] sm:$0xff] %v2004_v0 }
  0x2e   :  { %64 = vst [vmem:[%s2910_s4 + $0xa8] sm:$0xff] %v2004_v0 }
  0x2f   :  { %65 = vst [vmem:[%s2910_s4 + $0xb0] sm:$0xff] %v2004_v0 }
  0x30   :  { %66 = vst [vmem:[%s2910_s4 + $0xb8] sm:$0xff] %v2004_v0 }
  0x31   :  { %67 = vst [vmem:[%s2910_s4 + $0xc0] sm:$0xff] %v2004_v0 }
  0x32   :  { %68 = vst [vmem:[%s2910_s4 + $0xc8] sm:$0xff] %v2004_v0 }
  0x33   :  { %69 = vst [vmem:[%s2910_s4 + $0xd0] sm:$0xff] %v2004_v0 }
  0x34   :  { %70 = vst [vmem:[%s2910_s4 + $0xd8] sm:$0xff] %v2004_v0 }
  0x35   :  { %71 = vst [vmem:[%s2910_s4 + $0xe0] sm:$0xff] %v2004_v0 }
  0x36   :  { %72 = vst [vmem:[%s2910_s4 + $0xe8] sm:$0xff] %v2004_v0 }
  0x37   :  { %73 = vst [vmem:[%s2910_s4 + $0xf0] sm:$0xff] %v2004_v0 }
  0x38   :  { %74 = vst [vmem:[%s2910_s4 + $0xf8] sm:$0xff] %v2004_v0 }
  0x39   :  { %75 = vst [vmem:[%s2910_s4 + $0x100] sm:$0xff] %v2004_v0 }
  0x3a   :  { %76 = vst [vmem:[%s2910_s4 + $0x108] sm:$0xff] %v2004_v0 }
  0x3b   :  { %77 = vst [vmem:[%s2910_s4 + $0x110] sm:$0xff] %v2004_v0 }
  0x3c   :  { %78 = vst [vmem:[%s2910_s4 + $0x118] sm:$0xff] %v2004_v0 }
  0x3d   :  { %79 = vst [vmem:[%s2910_s4 + $0x120] sm:$0xff] %v2004_v0 }
  0x3e   :  { %80 = vst [vmem:[%s2910_s4 + $0x128] sm:$0xff] %v2004_v0 }
  0x3f   :  { %81 = vst [vmem:[%s2910_s4 + $0x130] sm:$0xff] %v2004_v0 }
  0x40   :  { %82 = vst [vmem:[%s2910_s4 + $0x138] sm:$0xff] %v2004_v0 }
  0x41   :  { %83 = vst [vmem:[%s2910_s4 + $0x140] sm:$0xff] %v2004_v0 }
  0x42   :  { %84 = vst [vmem:[%s2910_s4 + $0x148] sm:$0xff] %v2004_v0 }
  0x43   :  { %85 = vst [vmem:[%s2910_s4 + $0x150] sm:$0xff] %v2004_v0 }
  0x44   :  { %86 = vst [vmem:[%s2910_s4 + $0x158] sm:$0xff] %v2004_v0  ;;  %95 = sbr.rel (%p1464_p5) target bundleno = 524 (0x20c), region = 21 }
  0x45   :  { %87 = vst [vmem:[%s2910_s4 + $0x160] sm:$0xff] %v2004_v0 }
  0x46   :  { %88 = vst [vmem:[%s2910_s4 + $0x168] sm:$0xff] %v2004_v0 }
  0x47   :  { %89 = vst [vmem:[%s2910_s4 + $0x170] sm:$0xff] %v2004_v0 }
  0x48   :  { %90 = vst [vmem:[%s2910_s4 + $0x178] sm:$0xff] %v2004_v0 }
  0x49   :  { %v1858_v1 = vld [vmem:[%s2192_s26 + $0x38] sm:$0xff]  ;;  %v1857_v4 = vld [vmem:[%s2192_s26 + $0x30] sm:$0xff]  ;;  %v1856_v7 = vld [vmem:[%s2192_s26 + $0x28] sm:$0xff] }
  0x4a   :  { %v2196_v2 = vld [vmem:[%s2192_s26 + $0x78] sm:$0xff]  ;;  %823 = vmatpush.bf16.msra.mxu0 %v1858_v1  ;;  %1947 = vmatpush.bf16.msra.mxu3 %v1858_v1  ;;  %v2205_v5 = vld [vmem:[%s2192_s26 + $0x70] sm:$0xff]  ;;  %v1864_v8 = vld [vmem:[%s2192_s26 + $0x68] sm:$0xff] }
  0x4b   :  { %v2199_v3 = vld [vmem:[%s2192_s26 + $0xb8] sm:$0xff]  ;;  %952 = vmatpush.bf16.msra.mxu1 %v2196_v2  ;;  %v2208_v6 = vld [vmem:[%s2192_s26 + $0xb0] sm:$0xff]  ;;  %v2215_v9 = vld [vmem:[%s2192_s26 + $0xa8] sm:$0xff] }
  0x4c   :  { %1081 = vmatpush.bf16.msra.mxu2 %v2199_v3  ;;  %v1855_v10 = vld [vmem:[%s2192_s26 + $0x20] sm:$0xff]  ;;  %v1854_v13 = vld [vmem:[%s2192_s26 + $0x18] sm:$0xff]  ;;  %v1853_v16 = vld [vmem:[%s2192_s26 + $0x10] sm:$0xff] }
  0x4d   :  { %v1863_v11 = vld [vmem:[%s2192_s26 + $0x60] sm:$0xff]  ;;  %v1862_v14 = vld [vmem:[%s2192_s26 + $0x58] sm:$0xff]  ;;  %v1861_v17 = vld [vmem:[%s2192_s26 + $0x50] sm:$0xff] }
  0x4e   :  { %824 = vmatpush.bf16.msra.mxu0 %v1857_v4  ;;  %1948 = vmatpush.bf16.msra.mxu3 %v1857_v4  ;;  %v2221_v12 = vld [vmem:[%s2192_s26 + $0xa0] sm:$0xff]  ;;  %v2227_v15 = vld [vmem:[%s2192_s26 + $0x98] sm:$0xff]  ;;  %v2233_v18 = vld [vmem:[%s2192_s26 + $0x90] sm:$0xff] }
  0x4f   :  { %953 = vmatpush.bf16.msra.mxu1 %v2205_v5  ;;  %v1852_v19 = vld [vmem:[%s2192_s26 + $0x8] sm:$0xff]  ;;  %v1468_v22 = vld [vmem:[#allocation5] sm:$0xf]  ;;  %v1684_v26 = vld [vmem:[#allocation5 + $0x1b0] sm:$0xf] }
  0x50   :  { %1082 = vmatpush.bf16.msra.mxu2 %v2208_v6  ;;  %v1860_v20 = vld [vmem:[%s2192_s26 + $0x48] sm:$0xff]  ;;  %v1851_v24 = vld [vmem:[%s2192_s26] sm:$0xff]  ;;  %v1930_v28 = vld [vmem:[#allocation5 + $0x1b8] sm:$0xf0] }
  0x51   :  { %v2239_v21 = vld [vmem:[%s2192_s26 + $0x88] sm:$0xff]  ;;  %v1859_v25 = vld [vmem:[%s2192_s26 + $0x40] sm:$0xff]  ;;  %v1470_v30 = vld [vmem:[#allocation5 + $0xc] sm:$0xf0]  ;;  %v1685_v34 = vor.u32 %v1930_v28, %v1684_v26 }
  0x52   :  { %825 = vmatpush.bf16.msra.mxu0 %v1856_v7  ;;  %1949 = vmatpush.bf16.msra.mxu3 %v1856_v7  ;;  %v1876_v23 = vld [vmem:[#allocation5 + $0x8] sm:$0xf0]  ;;  %v2244_v27 = vld [vmem:[%s2192_s26 + $0x80] sm:$0xff]  ;;  %v1476_v31 = vld [vmem:[#allocation5 + $0x8] sm:$0xf] }
  0x53   :  { %954 = vmatpush.bf16.msra.mxu1 %v1864_v8  ;;  %v1875_v29 = vld [vmem:[#allocation5 + $0x4] sm:$0xf]  ;;  %v1877_v32 = vld [vmem:[#allocation5 + $0x10] sm:$0xf0]  ;;  %v1469_v33 = vor.u32 %v1876_v23, %v1468_v22  ;;  %v1480_v37 = vld [vmem:[#allocation5 + $0x18] sm:$0xf] }
  0x54   :  { %1083 = vmatpush.bf16.msra.mxu2 %v2215_v9  ;;  %v1473_v35 = vor.u32 %v1875_v29, %v1470_v30  ;;  %v1477_v36 = vor.u32 %v1877_v32, %v1476_v31  ;;  %v1879_v38 = vld [vmem:[#allocation5 + $0x20] sm:$0xf0]  ;;  %v1696_v39 = vld [vmem:[#allocation5 + $0x1c8] sm:$0xf]  ;;  %v1933_v40 = vld [vmem:[#allocation5 + $0x1d0] sm:$0xf0] }
  0x55   :  { %v1878_v41 = vld [vmem:[#allocation5 + $0x1c] sm:$0xf]  ;;  %v1482_v42 = vld [vmem:[#allocation5 + $0x24] sm:$0xf0]  ;;  %v1488_v43 = vld [vmem:[#allocation5 + $0x20] sm:$0xf]  ;;  %v1481_v45 = vor.u32 %v1879_v38, %v1480_v37  ;;  %v1697_v46 = vor.u32 %v1933_v40, %v1696_v39 }
  0x56   :  { %826 = vmatpush.bf16.msra.mxu0 %v1855_v10  ;;  %1950 = vmatpush.bf16.msra.mxu3 %v1855_v10  ;;  %v1880_v44 = vld [vmem:[#allocation5 + $0x28] sm:$0xf0]  ;;  %v1485_v47 = vor.u32 %v1878_v41, %v1482_v42  ;;  %v1492_v49 = vld [vmem:[#allocation5 + $0x30] sm:$0xf]  ;;  %v1882_v50 = vld [vmem:[#allocation5 + $0x38] sm:$0xf0] }
  0x57   :  { %955 = vmatpush.bf16.msra.mxu1 %v1863_v11  ;;  %v1489_v48 = vor.u32 %v1880_v44, %v1488_v43  ;;  %v1708_v51 = vld [vmem:[#allocation5 + $0x1e0] sm:$0xf]  ;;  %v1936_v52 = vld [vmem:[#allocation5 + $0x1e8] sm:$0xf0]  ;;  %v1881_v53 = vld [vmem:[#allocation5 + $0x34] sm:$0xf]  ;;  %v1493_v57 = vor.u32 %v1882_v50, %v1492_v49 }
  0x58   :  { %1084 = vmatpush.bf16.msra.mxu2 %v2221_v12  ;;  %v1494_v54 = vld [vmem:[#allocation5 + $0x3c] sm:$0xf0]  ;;  %v1500_v55 = vld [vmem:[#allocation5 + $0x38] sm:$0xf]  ;;  %v1883_v56 = vld [vmem:[#allocation5 + $0x40] sm:$0xf0]  ;;  %v1709_v58 = vor.u32 %v1936_v52, %v1708_v51 }
  0x59   :  { %v1497_v59 = vor.u32 %v1881_v53, %v1494_v54  ;;  %v1501_v60 = vor.u32 %v1883_v56, %v1500_v55  ;;  %v1504_v61 = vld [vmem:[#allocation5 + $0x48] sm:$0xf]  ;;  %v1885_v62 = vld [vmem:[#allocation5 + $0x50] sm:$0xf0]  ;;  %v1720_v63 = vld [vmem:[#allocation5 + $0x1f8] sm:$0xf] }
  0x5a   :  { %827 = vmatpush.bf16.msra.mxu0 %v1854_v13  ;;  %1951 = vmatpush.bf16.msra.mxu3 %v1854_v13  ;;  %v1939_v0 = vld [vmem:[#allocation5 + $0x200] sm:$0xf0]  ;;  %v1884_v1 = vld [vmem:[#allocation5 + $0x4c] sm:$0xf]  ;;  %v1512_v4 = vld [vmem:[#allocation5 + $0x50] sm:$0xf] }
  0x5b   :  { %956 = vmatpush.bf16.msra.mxu1 %v1862_v14  ;;  %v1721_v7 = vor.u32 %v1939_v0, %v1720_v63  ;;  %v1942_v13 = vld [vmem:[#allocation5 + $0x218] sm:$0xf0]  ;;  %v1744_v23 = vld [vmem:[#allocation5 + $0x228] sm:$0xf]  ;;  %v1536_v28 = vld [vmem:[#allocation5 + $0x80] sm:$0xf] }
  0x5c   :  { %1085 = vmatpush.bf16.msra.mxu2 %v2227_v15  ;;  %v1530_v26 = vld [vmem:[#allocation5 + $0x84] sm:$0xf0]  ;;  %v1892_v29 = vld [vmem:[#allocation5 + $0x88] sm:$0xf0]  ;;  %v1686_v37 = vld [vmem:[#allocation5 + $0x1bc] sm:$0xf0] }
  0x5d   :  { %v1542_v38 = vld [vmem:[#allocation5 + $0x9c] sm:$0xf0]  ;;  %v1548_v39 = vld [vmem:[#allocation5 + $0x98] sm:$0xf]  ;;  %v1895_v40 = vld [vmem:[#allocation5 + $0xa0] sm:$0xf0] }
  0x5e   :  { %828 = vmatpush.bf16.msra.mxu0 %v1853_v16  ;;  %1952 = vmatpush.bf16.msra.mxu3 %v1853_v16  ;;  %v1524_v16 = vld [vmem:[#allocation5 + $0x68] sm:$0xf]  ;;  %v1549_v44 = vor.u32 %v1895_v40, %v1548_v39  ;;  %v1698_v49 = vld [vmem:[#allocation5 + $0x1d4] sm:$0xf0]  ;;  %v1560_v51 = vld [vmem:[#allocation5 + $0xb0] sm:$0xf] }
  0x5f   :  { %957 = vmatpush.bf16.msra.mxu1 %v1861_v17  ;;  %v1554_v50 = vld [vmem:[#allocation5 + $0xb4] sm:$0xf0]  ;;  %v1898_v52 = vld [vmem:[#allocation5 + $0xb8] sm:$0xf0]  ;;  %v1572_v63 = vld [vmem:[#allocation5 + $0xc8] sm:$0xf] }
  0x60   :  { %1086 = vmatpush.bf16.msra.mxu2 %v2233_v18  ;;  %v1561_v56 = vor.u32 %v1898_v52, %v1560_v51  ;;  %v1901_v0 = vld [vmem:[#allocation5 + $0xd0] sm:$0xf0] }
  0x62   :  { %829 = vmatpush.bf16.msra.mxu0 %v1852_v19  ;;  %1953 = vmatpush.bf16.msra.mxu3 %v1852_v19 }
  0x63   :  { %958 = vmatpush.bf16.msra.mxu1 %v1860_v20 }
  0x64   :  { %1087 = vmatpush.bf16.msra.mxu2 %v2239_v21 }
  0x66   :  { %830 = vmatpush.bf16.msra.mxu0 %v1851_v24  ;;  %1954 = vmatpush.bf16.msra.mxu3 %v1851_v24  ;;  %v1945_v24 = vld [vmem:[#allocation5 + $0x230] sm:$0xf0] }
  0x67   :  { %959 = vmatpush.bf16.msra.mxu1 %v1859_v25  ;;  %v1745_v31 = vor.u32 %v1945_v24, %v1744_v23 }
  0x68   :  { %1088 = vmatpush.bf16.msra.mxu2 %v2244_v27 }
  0x69   :  { %831 = vmatmul.bf16.vlgmr.msra.gmra.mxu0 %v1469_v33  ;;  %921 = vmatmul.bf16.vlgmr.msra.gmra.mxu3 %v1685_v34  ;;  %v1540_v33 = vld [vmem:[#allocation5 + $0x90] sm:$0xf]  ;;  %v1894_v34 = vld [vmem:[#allocation5 + $0x98] sm:$0xf0] }
  0x6a   :  { %1955 = vmatpush.bf16.msrb.mxu3 %v2196_v2  ;;  %960 = vmatmul.bf16.vlgmr.msra.gmra.mxu1 %v1473_v35  ;;  %v1506_v2 = vld [vmem:[#allocation5 + $0x54] sm:$0xf0]  ;;  %v1893_v35 = vld [vmem:[#allocation5 + $0x94] sm:$0xf]  ;;  %v1541_v41 = vor.u32 %v1894_v34, %v1540_v33 }
  0x6b   :  { %1089 = vmatmul.bf16.vlgmr.msra.gmra.mxu2 %v1477_v36  ;;  %v1929_v36 = vld [vmem:[#allocation5 + $0x1b4] sm:$0xf]  ;;  %v1545_v43 = vor.u32 %v1893_v35, %v1542_v38 }
  0x6c   :  { %v1689_v42 = vor.u32 %v1929_v36, %v1686_v37  ;;  %v153_v37 = vld [vmem:[%s2910_s4 + $0x10] sm:$0xff] }
  0x6e   :  { %1956 = vmatpush.bf16.msrb.mxu3 %v2205_v5  ;;  %v1886_v5 = vld [vmem:[#allocation5 + $0x58] sm:$0xf0] }
  0x6f   :  { %v1513_v10 = vor.u32 %v1886_v5, %v1512_v4 }
  0x72   :  { %1957 = vmatpush.bf16.msrb.mxu3 %v1864_v8  ;;  %v1509_v8 = vor.u32 %v1884_v1, %v1506_v2 }
  0x76   :  { %1958 = vmatpush.bf16.msrb.mxu3 %v1863_v11  ;;  %v1732_v11 = vld [vmem:[#allocation5 + $0x210] sm:$0xf] }
  0x79   :  { %836 = vmatmul.bf16.gmra.mxu0 %v1481_v45  ;;  %926 = vmatmul.bf16.gmra.mxu3 %v1697_v46  ;;  %v1552_v45 = vld [vmem:[#allocation5 + $0xa8] sm:$0xf]  ;;  %v1897_v46 = vld [vmem:[#allocation5 + $0xb0] sm:$0xf0] }
  0x7a   :  { %1959 = vmatpush.bf16.msrb.mxu3 %v1862_v14  ;;  %965 = vmatmul.bf16.gmra.mxu1 %v1485_v47  ;;  %v1887_v14 = vld [vmem:[#allocation5 + $0x64] sm:$0xf]  ;;  %v1896_v47 = vld [vmem:[#allocation5 + $0xac] sm:$0xf]  ;;  %v1553_v53 = vor.u32 %v1897_v46, %v1552_v45  ;;  %v1905_v45 = vld [vmem:[#allocation5 + $0xf4] sm:$0xf] }
  0x7b   :  { %1094 = vmatmul.bf16.gmra.mxu2 %v1489_v48  ;;  %v1932_v48 = vld [vmem:[#allocation5 + $0x1cc] sm:$0xf]  ;;  %v1557_v55 = vor.u32 %v1896_v47, %v1554_v50  ;;  %v1941_v46 = vld [vmem:[#allocation5 + $0x214] sm:$0xf]  ;;  %v1734_v47 = vld [vmem:[#allocation5 + $0x21c] sm:$0xf0] }
  0x7c   :  { %v1701_v54 = vor.u32 %v1932_v48, %v1698_v49  ;;  %v1590_v48 = vld [vmem:[#allocation5 + $0xfc] sm:$0xf0]  ;;  %v1596_v49 = vld [vmem:[#allocation5 + $0xf8] sm:$0xf]  ;;  %v1907_v50 = vld [vmem:[#allocation5 + $0x100] sm:$0xf0] }
  0x7e   :  { %1960 = vmatpush.bf16.msrb.mxu3 %v1861_v17  ;;  %v1889_v17 = vld [vmem:[#allocation5 + $0x70] sm:$0xf0] }
  0x7f   :  { %v1525_v22 = vor.u32 %v1889_v17, %v1524_v16  ;;  %v1576_v16 = vld [vmem:[#allocation5 + $0xd8] sm:$0xf]  ;;  %v1903_v17 = vld [vmem:[#allocation5 + $0xe0] sm:$0xf0] }
  0x82   :  { %1961 = vmatpush.bf16.msrb.mxu3 %v1860_v20 }
  0x86   :  { %1962 = vmatpush.bf16.msrb.mxu3 %v1859_v25  ;;  %v1890_v25 = vld [vmem:[#allocation5 + $0x7c] sm:$0xf] }
  0x87   :  { %v1533_v32 = vor.u32 %v1890_v25, %v1530_v26  ;;  %v152_v25 = vld [vmem:[%s2910_s4 + $0x8] sm:$0xff] }
  0x89   :  { %841 = vmatmul.bf16.gmra.mxu0 %v1493_v57  ;;  %931 = vmatmul.bf16.gmra.mxu3 %v1709_v58  ;;  %v1564_v57 = vld [vmem:[#allocation5 + $0xc0] sm:$0xf]  ;;  %v1900_v58 = vld [vmem:[#allocation5 + $0xc8] sm:$0xf0] }
  0x8a   :  { %1963 = vmatpush.bf16.msra.mxu3 %v2199_v3  ;;  %970 = vmatmul.bf16.gmra.mxu1 %v1497_v59  ;;  %v1505_v3 = vor.u32 %v1885_v62, %v1504_v61  ;;  %v1899_v59 = vld [vmem:[#allocation5 + $0xc4] sm:$0xf]  ;;  %v1710_v61 = vld [vmem:[#allocation5 + $0x1ec] sm:$0xf0]  ;;  %v1565_v1 = vor.u32 %v1900_v58, %v1564_v57 }
  0x8b   :  { %1099 = vmatmul.bf16.gmra.mxu2 %v1501_v60  ;;  %v1935_v60 = vld [vmem:[#allocation5 + $0x1e4] sm:$0xf]  ;;  %v1566_v62 = vld [vmem:[#allocation5 + $0xcc] sm:$0xf0] }
  0x8c   :  { %v1713_v2 = vor.u32 %v1935_v60, %v1710_v61  ;;  %v1569_v5 = vor.u32 %v1899_v59, %v1566_v62  ;;  %v1593_v59 = vor.u32 %v1905_v45, %v1590_v48  ;;  %v1597_v60 = vor.u32 %v1907_v50, %v1596_v49  ;;  %v1913_v45 = vld [vmem:[#allocation5 + $0x130] sm:$0xf0]  ;;  %v158_v48 = vld [vmem:[%s2910_s4 + $0x38] sm:$0xff] }
  0x8e   :  { %1964 = vmatpush.bf16.msra.mxu3 %v2208_v6  ;;  %v1516_v6 = vld [vmem:[#allocation5 + $0x60] sm:$0xf] }
  0x92   :  { %1965 = vmatpush.bf16.msra.mxu3 %v2215_v9  ;;  %v1888_v9 = vld [vmem:[#allocation5 + $0x68] sm:$0xf0] }
  0x93   :  { %v1517_v19 = vor.u32 %v1888_v9, %v1516_v6  ;;  %v151_v6 = vld [vmem:[%s2910_s4] sm:$0xff] }
  0x96   :  { %1966 = vmatpush.bf16.msra.mxu3 %v2221_v12  ;;  %v1518_v12 = vld [vmem:[#allocation5 + $0x6c] sm:$0xf0] }
  0x97   :  { %v1521_v20 = vor.u32 %v1887_v14, %v1518_v12 }
  0x99   :  { %846 = vmatmul.bf16.gmra.mxu0 %v1505_v3  ;;  %936 = vmatmul.bf16.gmra.mxu3 %v1721_v7  ;;  %v1573_v3 = vor.u32 %v1901_v0, %v1572_v63 }
  0x9a   :  { %1967 = vmatpush.bf16.msra.mxu3 %v2227_v15  ;;  %975 = vmatmul.bf16.gmra.mxu1 %v1509_v8  ;;  %v1733_v15 = vor.u32 %v1942_v13, %v1732_v11 }
  0x9b   :  { %1104 = vmatmul.bf16.gmra.mxu2 %v1513_v10 }
  0x9e   :  { %1968 = vmatpush.bf16.msra.mxu3 %v2233_v18  ;;  %v1528_v18 = vld [vmem:[#allocation5 + $0x78] sm:$0xf] }
  0xa2   :  { %1969 = vmatpush.bf16.msra.mxu3 %v2239_v21  ;;  %v1891_v21 = vld [vmem:[#allocation5 + $0x80] sm:$0xf0] }
  0xa3   :  { %v1529_v30 = vor.u32 %v1891_v21, %v1528_v18  ;;  %v1584_v18 = vld [vmem:[#allocation5 + $0xe0] sm:$0xf]  ;;  %v1904_v21 = vld [vmem:[#allocation5 + $0xe8] sm:$0xf0] }
  0xa6   :  { %1970 = vmatpush.bf16.msra.mxu3 %v2244_v27  ;;  %v1537_v27 = vor.u32 %v1892_v29, %v1536_v28  ;;  %v1577_v28 = vor.u32 %v1903_v17, %v1576_v16  ;;  %v1910_v16 = vld [vmem:[#allocation5 + $0x118] sm:$0xf0] }
  0xa9   :  { %851 = vmatmul.bf16.gmra.mxu0 %v1517_v19  ;;  %941 = vmatmul.bf16.gmra.mxu3 %v1733_v15  ;;  %v1902_v19 = vld [vmem:[#allocation5 + $0xdc] sm:$0xf] }
  0xaa   :  { %980 = vmatmul.bf16.gmra.mxu1 %v1521_v20  ;;  %v1938_v15 = vld [vmem:[#allocation5 + $0x1fc] sm:$0xf]  ;;  %v1722_v20 = vld [vmem:[#allocation5 + $0x204] sm:$0xf0] }
  0xab   :  { %1109 = vmatmul.bf16.gmra.mxu2 %v1525_v22  ;;  %v1578_v22 = vld [vmem:[#allocation5 + $0xe4] sm:$0xf0]  ;;  %v1725_v29 = vor.u32 %v1938_v15, %v1722_v20 }
  0xac   :  { %v156_v15 = vld [vmem:[%s2910_s4 + $0x28] sm:$0xff] }
  0xb9   :  { %856 = vmatmul.bf16.gmra.mxu0 %v1529_v30  ;;  %946 = vmatmul.bf16.gmra.mxu3 %v1745_v31 }
  0xba   :  { %985 = vmatmul.bf16.gmra.mxu1 %v1533_v32  ;;  %v1581_v32 = vor.u32 %v1902_v19, %v1578_v22 }
  0xbb   :  { %1114 = vmatmul.bf16.gmra.mxu2 %v1537_v27  ;;  %v1585_v27 = vor.u32 %v1904_v21, %v1584_v18 }
  0xc9   :  { %861 = vmatmul.bf16.gmra.mxu0 %v1541_v41  ;;  %1050 = vmatmul.bf16.vlgmr.msrb.gmra.mxu3 %v1689_v42 }
  0xca   :  { %990 = vmatmul.bf16.gmra.mxu1 %v1545_v43  ;;  %v1588_v43 = vld [vmem:[#allocation5 + $0xf0] sm:$0xf] }
  0xcb   :  { %1119 = vmatmul.bf16.gmra.mxu2 %v1549_v44  ;;  %v1906_v44 = vld [vmem:[#allocation5 + $0xf8] sm:$0xf0] }
  0xd9   :  { %866 = vmatmul.bf16.gmra.mxu0 %v1553_v53  ;;  %1055 = vmatmul.bf16.gmra.mxu3 %v1701_v54  ;;  %v154_v53 = vld [vmem:[%s2910_s4 + $0x18] sm:$0xff] }
  0xda   :  { %995 = vmatmul.bf16.gmra.mxu1 %v1557_v55  ;;  %v1589_v55 = vor.u32 %v1906_v44, %v1588_v43  ;;  %v1614_v43 = vld [vmem:[#allocation5 + $0x12c] sm:$0xf0]  ;;  %v1620_v44 = vld [vmem:[#allocation5 + $0x128] sm:$0xf] }
  0xdb   :  { %1124 = vmatmul.bf16.gmra.mxu2 %v1561_v56  ;;  %v1737_v56 = vor.u32 %v1941_v46, %v1734_v47 }
  0xe6   :  { %v832_v4 = vpop.f32.mrf.mxu0 }
  0xe7   :  { %v961_v7 = vpop.f32.mrf.mxu1 }
  0xe8   :  { %v962_v8 = vadd.f32 %v961_v7, %v832_v4 }
  0xe9   :  { %871 = vmatmul.bf16.gmra.mxu0 %v1565_v1  ;;  %1060 = vmatmul.bf16.gmra.mxu3 %v1713_v2  ;;  %v155_v1 = vld [vmem:[%s2910_s4 + $0x20] sm:$0xff] }
  0xea   :  { %1000 = vmatmul.bf16.gmra.mxu1 %v1569_v5 }
  0xeb   :  { %1129 = vmatmul.bf16.gmra.mxu2 %v1573_v3 }
  0xec   :  { %v2258_v10 = vpop.f32.mrf.mxu3 }
  0xee   :  { %v1090_v9 = vpop.f32.mrf.mxu2  ;;  %v834_v13 = vpop.f32.mrf.mxu0 }
  0xef   :  { %v1091_v11 = vadd.f32 %v1090_v9, %v962_v8  ;;  %v963_v14 = vpop.f32.mrf.mxu1  ;;  %v1600_v8 = vld [vmem:[#allocation5 + $0x108] sm:$0xf]  ;;  %v1908_v9 = vld [vmem:[#allocation5 + $0x10c] sm:$0xf] }
  0xf0   :  { %v964_v23 = vadd.f32 %v963_v14, %v834_v13  ;;  %v1746_v13 = vld [vmem:[#allocation5 + $0x234] sm:$0xf0] }
  0xf1   :  { %v1210_v12 = vadd.f32 %v1091_v11, %v151_v6  ;;  %v1909_v6 = vld [vmem:[#allocation5 + $0x110] sm:$0xf0]  ;;  %v1944_v11 = vld [vmem:[#allocation5 + $0x22c] sm:$0xf]  ;;  %v1602_v14 = vld [vmem:[#allocation5 + $0x114] sm:$0xf0] }
  0xf2   :  { %v1601_v22 = vor.u32 %v1909_v6, %v1600_v8  ;;  %v1749_v18 = vor.u32 %v1944_v11, %v1746_v13  ;;  %v1704_v8 = vld [vmem:[#allocation5 + $0x1d0] sm:$0xf]  ;;  %v1934_v6 = vld [vmem:[#allocation5 + $0x1d8] sm:$0xf0]  ;;  %v1632_v11 = vld [vmem:[#allocation5 + $0x140] sm:$0xf] }
  0xf3   :  { %1258 = vst [vmem:[%s2910_s4] sm:$0xff] %v1210_v12  ;;  %v1608_v12 = vld [vmem:[#allocation5 + $0x110] sm:$0xf]  ;;  %v1916_v13 = vld [vmem:[#allocation5 + $0x148] sm:$0xf0] }
  0xf4   :  { %v2266_v24 = vpop.f32.mrf.mxu3 }
  0xf6   :  { %v1092_v26 = vpop.f32.mrf.mxu2  ;;  %v837_v31 = vpop.f32.mrf.mxu0 }
  0xf7   :  { %v1093_v30 = vadd.f32 %v1092_v26, %v964_v23  ;;  %v966_v33 = vpop.f32.mrf.mxu1  ;;  %v1609_v26 = vor.u32 %v1910_v16, %v1608_v12  ;;  %v160_v16 = vld [vmem:[%s2910_s4 + $0x48] sm:$0xff] }
  0xf8   :  { %v967_v35 = vadd.f32 %v966_v33, %v837_v31 }
  0xf9   :  { %v1211_v34 = vadd.f32 %v1093_v30, %v152_v25  ;;  %876 = vmatmul.bf16.gmra.mxu0 %v1577_v28  ;;  %1065 = vmatmul.bf16.gmra.mxu3 %v1725_v29  ;;  %v1605_v25 = vor.u32 %v1908_v9, %v1602_v14  ;;  %v1626_v9 = vld [vmem:[#allocation5 + $0x144] sm:$0xf0] }
  0xfa   :  { %1005 = vmatmul.bf16.gmra.mxu1 %v1581_v32  ;;  %v157_v32 = vld [vmem:[%s2910_s4 + $0x30] sm:$0xff] }
  0xfb   :  { %1259 = vst [vmem:[%s2910_s4 + $0x8] sm:$0xff] %v1211_v34  ;;  %1134 = vmatmul.bf16.gmra.mxu2 %v1585_v27 }
  0xfc   :  { %v2274_v36 = vpop.f32.mrf.mxu3 }
  0xfe   :  { %v1095_v38 = vpop.f32.mrf.mxu2  ;;  %v839_v40 = vpop.f32.mrf.mxu0 }
  0xff   :  { %v1096_v39 = vadd.f32 %v1095_v38, %v967_v35  ;;  %v968_v41 = vpop.f32.mrf.mxu1  ;;  %v1612_v38 = vld [vmem:[#allocation5 + $0x120] sm:$0xf] }
 0x100   :  { %v969_v51 = vadd.f32 %v968_v41, %v839_v40  ;;  %v1911_v40 = vld [vmem:[#allocation5 + $0x124] sm:$0xf]  ;;  %v1692_v41 = vld [vmem:[#allocation5 + $0x1b8] sm:$0xf] }
 0x101   :  { %v1212_v42 = vadd.f32 %v1096_v39, %v153_v37  ;;  %v1912_v39 = vld [vmem:[#allocation5 + $0x128] sm:$0xf0] }
 0x102   :  { %v1613_v50 = vor.u32 %v1912_v39, %v1612_v38  ;;  %v1918_v38 = vld [vmem:[#allocation5 + $0x158] sm:$0xf0]  ;;  %v1917_v39 = vld [vmem:[#allocation5 + $0x154] sm:$0xf] }
 0x103   :  { %1260 = vst [vmem:[%s2910_s4 + $0x10] sm:$0xff] %v1212_v42  ;;  %v1931_v42 = vld [vmem:[#allocation5 + $0x1c0] sm:$0xf0] }
 0x104   :  { %v2282_v52 = vpop.f32.mrf.mxu3 }
 0x106   :  { %v1097_v54 = vpop.f32.mrf.mxu2  ;;  %v842_v58 = vpop.f32.mrf.mxu0 }
 0x107   :  { %v1098_v57 = vadd.f32 %v1097_v54, %v969_v51  ;;  %v971_v61 = vpop.f32.mrf.mxu1  ;;  %v1693_v51 = vor.u32 %v1931_v42, %v1692_v41  ;;  %v1937_v41 = vld [vmem:[#allocation5 + $0x1f0] sm:$0xf0]  ;;  %v1638_v42 = vld [vmem:[#allocation5 + $0x15c] sm:$0xf0] }
 0x108   :  { %v972_v63 = vadd.f32 %v971_v61, %v842_v58  ;;  %v159_v61 = vld [vmem:[%s2910_s4 + $0x40] sm:$0xff] }
 0x109   :  { %v1213_v62 = vadd.f32 %v1098_v57, %v154_v53  ;;  %881 = vmatmul.bf16.gmra.mxu0 %v1589_v55  ;;  %1070 = vmatmul.bf16.gmra.mxu3 %v1737_v56  ;;  %v1617_v55 = vor.u32 %v1911_v40, %v1614_v43  ;;  %v1621_v56 = vor.u32 %v1913_v45, %v1620_v44  ;;  %v1716_v40 = vld [vmem:[#allocation5 + $0x1e8] sm:$0xf]  ;;  %v1644_v43 = vld [vmem:[#allocation5 + $0x158] sm:$0xf]  ;;  %v1919_v44 = vld [vmem:[#allocation5 + $0x160] sm:$0xf0] }
 0x10a   :  { %1010 = vmatmul.bf16.gmra.mxu1 %v1593_v59 }
 0x10b   :  { %1261 = vst [vmem:[%s2910_s4 + $0x18] sm:$0xff] %v1213_v62  ;;  %1139 = vmatmul.bf16.gmra.mxu2 %v1597_v60 }
 0x10c   :  { %v2290_v0 = vpop.f32.mrf.mxu3 }
 0x10e   :  { %v1100_v2 = vpop.f32.mrf.mxu2  ;;  %v844_v5 = vpop.f32.mrf.mxu0 }
 0x10f   :  { %v1101_v4 = vadd.f32 %v1100_v2, %v972_v63  ;;  %v973_v3 = vpop.f32.mrf.mxu1 }
 0x110   :  { %v974_v17 = vadd.f32 %v973_v3, %v844_v5  ;;  %v1624_v5 = vld [vmem:[#allocation5 + $0x138] sm:$0xf]  ;;  %v1915_v3 = vld [vmem:[#allocation5 + $0x140] sm:$0xf0] }
 0x111   :  { %v1214_v7 = vadd.f32 %v1101_v4, %v155_v1 }
 0x113   :  { %1262 = vst [vmem:[%s2910_s4 + $0x20] sm:$0xff] %v1214_v7  ;;  %v1914_v7 = vld [vmem:[#allocation5 + $0x13c] sm:$0xf] }
 0x114   :  { %v2298_v19 = vpop.f32.mrf.mxu3 }
 0x116   :  { %v1102_v20 = vpop.f32.mrf.mxu2  ;;  %v847_v23 = vpop.f32.mrf.mxu0 }
 0x117   :  { %v1103_v21 = vadd.f32 %v1102_v20, %v974_v17  ;;  %v976_v28 = vpop.f32.mrf.mxu1  ;;  %v1705_v20 = vor.u32 %v1934_v6, %v1704_v8  ;;  %v1920_v8 = vld [vmem:[#allocation5 + $0x16c] sm:$0xf]  ;;  %v1728_v6 = vld [vmem:[#allocation5 + $0x200] sm:$0xf] }
 0x118   :  { %v977_v30 = vadd.f32 %v976_v28, %v847_v23  ;;  %v1633_v23 = vor.u32 %v1916_v13, %v1632_v11  ;;  %v1650_v11 = vld [vmem:[#allocation5 + $0x174] sm:$0xf0]  ;;  %v1656_v13 = vld [vmem:[#allocation5 + $0x170] sm:$0xf] }
 0x119   :  { %v1215_v29 = vadd.f32 %v1103_v21, %v156_v15  ;;  %886 = vmatmul.bf16.gmra.mxu0 %v1601_v22  ;;  %1075 = vmatmul.bf16.gmra.mxu3 %v1749_v18  ;;  %v1625_v15 = vor.u32 %v1915_v3, %v1624_v5  ;;  %v1629_v21 = vor.u32 %v1914_v7, %v1626_v9  ;;  %v1648_v3 = vld [vmem:[#allocation5 + $0x168] sm:$0xf]  ;;  %v1921_v7 = vld [vmem:[#allocation5 + $0x170] sm:$0xf0]  ;;  %v1940_v9 = vld [vmem:[#allocation5 + $0x208] sm:$0xf0] }
 0x11a   :  { %1015 = vmatmul.bf16.gmra.mxu1 %v1605_v25 }
 0x11b   :  { %1263 = vst [vmem:[%s2910_s4 + $0x28] sm:$0xff] %v1215_v29  ;;  %1144 = vmatmul.bf16.gmra.mxu2 %v1609_v26 }
 0x11c   :  { %v2306_v31 = vpop.f32.mrf.mxu3 }
 0x11e   :  { %v1105_v27 = vpop.f32.mrf.mxu2  ;;  %v849_v34 = vpop.f32.mrf.mxu0 }
 0x11f   :  { %v1106_v33 = vadd.f32 %v1105_v27, %v977_v30  ;;  %v978_v35 = vpop.f32.mrf.mxu1  ;;  %v161_v30 = vld [vmem:[%s2910_s4 + $0x50] sm:$0xff] }
 0x120   :  { %v979_v46 = vadd.f32 %v978_v35, %v849_v34 }
 0x121   :  { %v1216_v37 = vadd.f32 %v1106_v33, %v157_v32 }
 0x123   :  { %1264 = vst [vmem:[%s2910_s4 + $0x30] sm:$0xff] %v1216_v37  ;;  %v1636_v37 = vld [vmem:[#allocation5 + $0x150] sm:$0xf] }
 0x124   :  { %v2314_v47 = vpop.f32.mrf.mxu3 }
 0x126   :  { %v1107_v49 = vpop.f32.mrf.mxu2  ;;  %v852_v54 = vpop.f32.mrf.mxu0 }
 0x127   :  { %v1108_v53 = vadd.f32 %v1107_v49, %v979_v46  ;;  %v981_v57 = vpop.f32.mrf.mxu1 }
 0x128   :  { %v982_v59 = vadd.f32 %v981_v57, %v852_v54 }
 0x129   :  { %v1217_v58 = vadd.f32 %v1108_v53, %v158_v48  ;;  %891 = vmatmul.bf16.gmra.mxu0 %v1613_v50  ;;  %1179 = vmatmul.bf16.vlgmr.msra.gmra.mxu3 %v1693_v51  ;;  %v162_v48 = vld [vmem:[%s2910_s4 + $0x58] sm:$0xff]  ;;  %v1637_v50 = vor.u32 %v1918_v38, %v1636_v37  ;;  %v1717_v51 = vor.u32 %v1937_v41, %v1716_v40  ;;  %v1660_v40 = vld [vmem:[#allocation5 + $0x180] sm:$0xf]  ;;  %v1924_v41 = vld [vmem:[#allocation5 + $0x188] sm:$0xf0] }
 0x12a   :  { %1020 = vmatmul.bf16.gmra.mxu1 %v1617_v55  ;;  %v1641_v55 = vor.u32 %v1917_v39, %v1638_v42  ;;  %v1923_v42 = vld [vmem:[#allocation5 + $0x184] sm:$0xf] }
 0x12b   :  { %1265 = vst [vmem:[%s2910_s4 + $0x38] sm:$0xff] %v1217_v58  ;;  %1149 = vmatmul.bf16.gmra.mxu2 %v1621_v56  ;;  %v1645_v56 = vor.u32 %v1919_v44, %v1644_v43  ;;  %v1740_v43 = vld [vmem:[#allocation5 + $0x218] sm:$0xf]  ;;  %v1943_v44 = vld [vmem:[#allocation5 + $0x220] sm:$0xf0] }
 0x12c   :  { %v2322_v60 = vpop.f32.mrf.mxu3 }
 0x12e   :  { %v1110_v62 = vpop.f32.mrf.mxu2  ;;  %v854_v1 = vpop.f32.mrf.mxu0 }
 0x12f   :  { %v1111_v63 = vadd.f32 %v1110_v62, %v982_v59  ;;  %v983_v2 = vpop.f32.mrf.mxu1  ;;  %v163_v62 = vld [vmem:[%s2910_s4 + $0x60] sm:$0xff] }
 0x130   :  { %v984_v14 = vadd.f32 %v983_v2, %v854_v1 }
 0x131   :  { %v1218_v4 = vadd.f32 %v1111_v63, %v159_v61 }
 0x133   :  { %1266 = vst [vmem:[%s2910_s4 + $0x40] sm:$0xff] %v1218_v4 }
 0x134   :  { %v2330_v12 = vpop.f32.mrf.mxu3 }
 0x136   :  { %v1112_v17 = vpop.f32.mrf.mxu2  ;;  %v857_v18 = vpop.f32.mrf.mxu0 }
 0x137   :  { %v1113_v22 = vadd.f32 %v1112_v17, %v984_v14  ;;  %v986_v25 = vpop.f32.mrf.mxu1  ;;  %v1922_v14 = vld [vmem:[#allocation5 + $0x178] sm:$0xf0] }
 0x138   :  { %v987_v28 = vadd.f32 %v986_v25, %v857_v18  ;;  %v1729_v18 = vor.u32 %v1940_v9, %v1728_v6  ;;  %v1653_v25 = vor.u32 %v1920_v8, %v1650_v11  ;;  %v1672_v11 = vld [vmem:[#allocation5 + $0x198] sm:$0xf] }
 0x139   :  { %v1219_v26 = vadd.f32 %v1113_v22, %v160_v16  ;;  %896 = vmatmul.bf16.gmra.mxu0 %v1625_v15  ;;  %1184 = vmatmul.bf16.gmra.mxu3 %v1705_v20  ;;  %v164_v15 = vld [vmem:[%s2910_s4 + $0x68] sm:$0xff]  ;;  %v1649_v22 = vor.u32 %v1921_v7, %v1648_v3 }
 0x13a   :  { %1025 = vmatmul.bf16.gmra.mxu1 %v1629_v21 }
 0x13b   :  { %1267 = vst [vmem:[%s2910_s4 + $0x48] sm:$0xff] %v1219_v26  ;;  %1154 = vmatmul.bf16.gmra.mxu2 %v1633_v23  ;;  %v1657_v26 = vor.u32 %v1922_v14, %v1656_v13  ;;  %v1927_v13 = vld [vmem:[#allocation5 + $0x1a0] sm:$0xf0]  ;;  %v1926_v14 = vld [vmem:[#allocation5 + $0x19c] sm:$0xf] }
 0x13c   :  { %v2338_v29 = vpop.f32.mrf.mxu3 }
 0x13e   :  { %v1115_v32 = vpop.f32.mrf.mxu2  ;;  %v859_v33 = vpop.f32.mrf.mxu0 }
 0x13f   :  { %v1116_v27 = vadd.f32 %v1115_v32, %v987_v28  ;;  %v988_v34 = vpop.f32.mrf.mxu1 }
 0x140   :  { %v989_v45 = vadd.f32 %v988_v34, %v859_v33  ;;  %v165_v33 = vld [vmem:[%s2910_s4 + $0x70] sm:$0xff] }
 0x141   :  { %v1220_v35 = vadd.f32 %v1116_v27, %v161_v30 }
 0x143   :  { %1268 = vst [vmem:[%s2910_s4 + $0x50] sm:$0xff] %v1220_v35 }
 0x144   :  { %v2346_v46 = vpop.f32.mrf.mxu3 }
 0x146   :  { %v1117_v49 = vpop.f32.mrf.mxu2  ;;  %v862_v54 = vpop.f32.mrf.mxu0 }
 0x147   :  { %v1118_v53 = vadd.f32 %v1117_v49, %v989_v45  ;;  %v991_v57 = vpop.f32.mrf.mxu1  ;;  %v1662_v45 = vld [vmem:[#allocation5 + $0x18c] sm:$0xf0]  ;;  %v1925_v49 = vld [vmem:[#allocation5 + $0x190] sm:$0xf0] }
 0x148   :  { %v992_v59 = vadd.f32 %v991_v57, %v862_v54 }
 0x149   :  { %v1221_v58 = vadd.f32 %v1118_v53, %v162_v48  ;;  %901 = vmatmul.bf16.gmra.mxu0 %v1637_v50  ;;  %1189 = vmatmul.bf16.gmra.mxu3 %v1717_v51  ;;  %v1668_v48 = vld [vmem:[#allocation5 + $0x188] sm:$0xf]  ;;  %v166_v53 = vld [vmem:[%s2910_s4 + $0x78] sm:$0xff] }
 0x14a   :  { %1030 = vmatmul.bf16.gmra.mxu1 %v1641_v55  ;;  %v1661_v55 = vor.u32 %v1924_v41, %v1660_v40  ;;  %v169_v41 = vld [vmem:[%s2910_s4 + $0x90] sm:$0xff] }
 0x14b   :  { %1269 = vst [vmem:[%s2910_s4 + $0x58] sm:$0xff] %v1221_v58  ;;  %1159 = vmatmul.bf16.gmra.mxu2 %v1645_v56  ;;  %v1741_v56 = vor.u32 %v1943_v44, %v1740_v43 }
 0x14c   :  { %v2354_v61 = vpop.f32.mrf.mxu3 }
 0x14e   :  { %v1120_v63 = vpop.f32.mrf.mxu2  ;;  %v864_v2 = vpop.f32.mrf.mxu0 }
 0x14f   :  { %v1121_v1 = vadd.f32 %v1120_v63, %v992_v59  ;;  %v993_v4 = vpop.f32.mrf.mxu1  ;;  %v1665_v59 = vor.u32 %v1923_v42, %v1662_v45 }
 0x150   :  { %v994_v16 = vadd.f32 %v993_v4, %v864_v2 }
 0x151   :  { %v1222_v5 = vadd.f32 %v1121_v1, %v163_v62  ;;  %v1669_v62 = vor.u32 %v1925_v49, %v1668_v48 }
 0x153   :  { %1270 = vst [vmem:[%s2910_s4 + $0x60] sm:$0xff] %v1222_v5  ;;  %v167_v5 = vld [vmem:[%s2910_s4 + $0x80] sm:$0xff] }
 0x154   :  { %v2362_v17 = vpop.f32.mrf.mxu3 }
 0x156   :  { %v1122_v20 = vpop.f32.mrf.mxu2  ;;  %v867_v23 = vpop.f32.mrf.mxu0 }
 0x157   :  { %v1123_v21 = vadd.f32 %v1122_v20, %v994_v16  ;;  %v996_v28 = vpop.f32.mrf.mxu1  ;;  %v1752_v16 = vld [vmem:[#allocation5 + $0x230] sm:$0xf]  ;;  %v1674_v20 = vld [vmem:[#allocation5 + $0x1a4] sm:$0xf0] }
 0x158   :  { %v997_v32 = vadd.f32 %v996_v28, %v867_v23  ;;  %v1673_v28 = vor.u32 %v1927_v13, %v1672_v11 }
 0x159   :  { %v1223_v30 = vadd.f32 %v1123_v21, %v164_v15  ;;  %906 = vmatmul.bf16.gmra.mxu0 %v1649_v22  ;;  %1194 = vmatmul.bf16.gmra.mxu3 %v1729_v18  ;;  %v1946_v15 = vld [vmem:[#allocation5 + $0x238] sm:$0xf0]  ;;  %v1680_v22 = vld [vmem:[#allocation5 + $0x1a0] sm:$0xf]  ;;  %v1928_v18 = vld [vmem:[#allocation5 + $0x1a8] sm:$0xf0] }
 0x15a   :  { %1035 = vmatmul.bf16.gmra.mxu1 %v1653_v25  ;;  %v168_v25 = vld [vmem:[%s2910_s4 + $0x88] sm:$0xff] }
 0x15b   :  { %1271 = vst [vmem:[%s2910_s4 + $0x68] sm:$0xff] %v1223_v30  ;;  %1164 = vmatmul.bf16.gmra.mxu2 %v1657_v26  ;;  %v1753_v30 = vor.u32 %v1946_v15, %v1752_v16 }
 0x15c   :  { %v2370_v27 = vpop.f32.mrf.mxu3 }
 0x15e   :  { %v1125_v34 = vpop.f32.mrf.mxu2  ;;  %v869_v37 = vpop.f32.mrf.mxu0 }
 0x15f   :  { %v1126_v35 = vadd.f32 %v1125_v34, %v997_v32  ;;  %v998_v38 = vpop.f32.mrf.mxu1  ;;  %v1677_v34 = vor.u32 %v1926_v14, %v1674_v20 }
 0x160   :  { %v999_v50 = vadd.f32 %v998_v38, %v869_v37 }
 0x161   :  { %v1224_v39 = vadd.f32 %v1126_v35, %v165_v33  ;;  %v1681_v35 = vor.u32 %v1928_v18, %v1680_v22  ;;  %v173_v18 = vld [vmem:[%s2910_s4 + $0xb0] sm:$0xff] }
 0x163   :  { %1272 = vst [vmem:[%s2910_s4 + $0x70] sm:$0xff] %v1224_v39 }
 0x164   :  { %v2378_v51 = vpop.f32.mrf.mxu3 }
 0x166   :  { %v1127_v54 = vpop.f32.mrf.mxu2  ;;  %v872_v58 = vpop.f32.mrf.mxu0 }
 0x167   :  { %v1128_v57 = vadd.f32 %v1127_v54, %v999_v50  ;;  %v1001_v63 = vpop.f32.mrf.mxu1 }
 0x168   :  { %v1002_v2 = vadd.f32 %v1001_v63, %v872_v58  ;;  %v171_v63 = vld [vmem:[%s2910_s4 + $0xa0] sm:$0xff] }
 0x169   :  { %v1225_v1 = vadd.f32 %v1128_v57, %v166_v53  ;;  %911 = vmatmul.bf16.gmra.mxu0 %v1661_v55  ;;  %1199 = vmatmul.bf16.gmra.mxu3 %v1741_v56  ;;  %v170_v53 = vld [vmem:[%s2910_s4 + $0x98] sm:$0xff] }
 0x16a   :  { %1040 = vmatmul.bf16.gmra.mxu1 %v1665_v59 }
 0x16b   :  { %1273 = vst [vmem:[%s2910_s4 + $0x78] sm:$0xff] %v1225_v1  ;;  %1169 = vmatmul.bf16.gmra.mxu2 %v1669_v62 }
 0x16c   :  { %v2386_v4 = vpop.f32.mrf.mxu3 }
 0x16e   :  { %v1130_v3 = vpop.f32.mrf.mxu2  ;;  %v874_v8 = vpop.f32.mrf.mxu0 }
 0x16f   :  { %v1131_v7 = vadd.f32 %v1130_v3, %v1002_v2  ;;  %v1003_v6 = vpop.f32.mrf.mxu1 }
 0x170   :  { %v1004_v21 = vadd.f32 %v1003_v6, %v874_v8 }
 0x171   :  { %v1226_v9 = vadd.f32 %v1131_v7, %v167_v5 }
 0x173   :  { %1274 = vst [vmem:[%s2910_s4 + $0x80] sm:$0xff] %v1226_v9  ;;  %v172_v9 = vld [vmem:[%s2910_s4 + $0xa8] sm:$0xff] }
 0x174   :  { %v2394_v23 = vpop.f32.mrf.mxu3 }
 0x176   :  { %v1132_v26 = vpop.f32.mrf.mxu2  ;;  %v877_v33 = vpop.f32.mrf.mxu0 }
 0x177   :  { %v1133_v32 = vadd.f32 %v1132_v26, %v1004_v21  ;;  %v1006_v37 = vpop.f32.mrf.mxu1 }
 0x178   :  { %v1007_v39 = vadd.f32 %v1006_v37, %v877_v33 }
 0x179   :  { %v1227_v38 = vadd.f32 %v1133_v32, %v168_v25  ;;  %916 = vmatmul.bf16.gmra.mxu0 %v1673_v28  ;;  %1204 = vmatmul.bf16.gmra.mxu3 %v1753_v30 }
 0x17a   :  { %1045 = vmatmul.bf16.gmra.mxu1 %v1677_v34  ;;  %v174_v34 = vld [vmem:[%s2910_s4 + $0xb8] sm:$0xff] }
 0x17b   :  { %1275 = vst [vmem:[%s2910_s4 + $0x88] sm:$0xff] %v1227_v38  ;;  %1174 = vmatmul.bf16.gmra.mxu2 %v1681_v35 }
 0x17c   :  { %v2402_v40 = vpop.f32.mrf.mxu3 }
 0x17e   :  { %v1135_v42 = vpop.f32.mrf.mxu2  ;;  %v879_v44 = vpop.f32.mrf.mxu0 }
 0x17f   :  { %v1136_v43 = vadd.f32 %v1135_v42, %v1007_v39  ;;  %v1008_v45 = vpop.f32.mrf.mxu1 }
 0x180   :  { %v1009_v49 = vadd.f32 %v1008_v45, %v879_v44  ;;  %v187_v44 = vld [vmem:[%s2910_s4 + $0x120] sm:$0xff] }
 0x181   :  { %v1228_v48 = vadd.f32 %v1136_v43, %v169_v41  ;;  %v1052_v43 = vadd.f32 %v2354_v61, %v2258_v10  ;;  %v1054_v10 = vadd.f32 %v2362_v17, %v2266_v24  ;;  %v1057_v17 = vadd.f32 %v2370_v27, %v2274_v36 }
 0x182   :  { %v1059_v36 = vadd.f32 %v2378_v51, %v2282_v52  ;;  %v1062_v51 = vadd.f32 %v2386_v4, %v2290_v0  ;;  %v1064_v0 = vadd.f32 %v2394_v23, %v2298_v19  ;;  %v1067_v23 = vadd.f32 %v2402_v40, %v2306_v31 }
 0x183   :  { %1276 = vst [vmem:[%s2910_s4 + $0x90] sm:$0xff] %v1228_v48  ;;  %v175_v48 = vld [vmem:[%s2910_s4 + $0xc0] sm:$0xff] }
 0x184   :  { %v2410_v50 = vpop.f32.mrf.mxu3 }
 0x185   :  { %v1069_v31 = vadd.f32 %v2410_v50, %v2314_v47 }
 0x186   :  { %v1137_v54 = vpop.f32.mrf.mxu2  ;;  %v882_v56 = vpop.f32.mrf.mxu0 }
 0x187   :  { %v1138_v55 = vadd.f32 %v1137_v54, %v1009_v49  ;;  %v1011_v57 = vpop.f32.mrf.mxu1 }
 0x188   :  { %v1012_v59 = vadd.f32 %v1011_v57, %v882_v56 }
 0x189   :  { %v1229_v58 = vadd.f32 %v1138_v55, %v170_v53 }
 0x18b   :  { %1277 = vst [vmem:[%s2910_s4 + $0x98] sm:$0xff] %v1229_v58 }
 0x18c   :  { %v2418_v62 = vpop.f32.mrf.mxu3 }
 0x18d   :  { %v1072_v50 = vadd.f32 %v2418_v62, %v2322_v60 }
 0x18e   :  { %v1140_v1 = vpop.f32.mrf.mxu2  ;;  %v884_v5 = vpop.f32.mrf.mxu0 }
 0x18f   :  { %v1141_v2 = vadd.f32 %v1140_v1, %v1012_v59  ;;  %v1013_v3 = vpop.f32.mrf.mxu1  ;;  %v188_v59 = vld [vmem:[%s2910_s4 + $0x128] sm:$0xff] }
 0x190   :  { %v1014_v8 = vadd.f32 %v1013_v3, %v884_v5  ;;  %v176_v1 = vld [vmem:[%s2910_s4 + $0xc8] sm:$0xff] }
 0x191   :  { %v1230_v7 = vadd.f32 %v1141_v2, %v171_v63 }
 0x193   :  { %1278 = vst [vmem:[%s2910_s4 + $0xa0] sm:$0xff] %v1230_v7 }
 0x194   :  { %v2426_v6 = vpop.f32.mrf.mxu3 }
 0x195   :  { %v1074_v60 = vadd.f32 %v2426_v6, %v2330_v12 }
 0x196   :  { %v1142_v11 = vpop.f32.mrf.mxu2  ;;  %v887_v14 = vpop.f32.mrf.mxu0 }
 0x197   :  { %v1143_v13 = vadd.f32 %v1142_v11, %v1014_v8  ;;  %v1016_v16 = vpop.f32.mrf.mxu1 }
 0x198   :  { %v1017_v20 = vadd.f32 %v1016_v16, %v887_v14  ;;  %v177_v16 = vld [vmem:[%s2910_s4 + $0xd0] sm:$0xff] }
 0x199   :  { %v1231_v15 = vadd.f32 %v1143_v13, %v172_v9  ;;  %v189_v13 = vld [vmem:[%s2910_s4 + $0x130] sm:$0xff] }
 0x19b   :  { %1279 = vst [vmem:[%s2910_s4 + $0xa8] sm:$0xff] %v1231_v15 }
 0x19c   :  { %v2434_v22 = vpop.f32.mrf.mxu3 }
 0x19d   :  { %v1077_v6 = vadd.f32 %v2434_v22, %v2338_v29 }
 0x19e   :  { %v1145_v21 = vpop.f32.mrf.mxu2  ;;  %v889_v26 = vpop.f32.mrf.mxu0 }
 0x19f   :  { %v1146_v25 = vadd.f32 %v1145_v21, %v1017_v20  ;;  %v1018_v28 = vpop.f32.mrf.mxu1 }
 0x1a0   :  { %v1019_v32 = vadd.f32 %v1018_v28, %v889_v26 }
 0x1a1   :  { %v1232_v30 = vadd.f32 %v1146_v25, %v173_v18 }
 0x1a3   :  { %1280 = vst [vmem:[%s2910_s4 + $0xb0] sm:$0xff] %v1232_v30  ;;  %v190_v30 = vld [vmem:[%s2910_s4 + $0x138] sm:$0xff] }
 0x1a4   :  { %v2442_v33 = vpop.f32.mrf.mxu3 }
 0x1a5   :  { %v1079_v22 = vadd.f32 %v2442_v33, %v2346_v46 }
 0x1a6   :  { %v1147_v35 = vpop.f32.mrf.mxu2  ;;  %v892_v38 = vpop.f32.mrf.mxu0 }
 0x1a7   :  { %v1148_v37 = vadd.f32 %v1147_v35, %v1019_v32  ;;  %v1021_v39 = vpop.f32.mrf.mxu1 }
 0x1a8   :  { %v1022_v42 = vadd.f32 %v1021_v39, %v892_v38 }
 0x1a9   :  { %v1233_v41 = vadd.f32 %v1148_v37, %v174_v34  ;;  %v178_v34 = vld [vmem:[%s2910_s4 + $0xd8] sm:$0xff] }
 0x1ab   :  { %1281 = vst [vmem:[%s2910_s4 + $0xb8] sm:$0xff] %v1233_v41 }
 0x1ac   :  { %v1180_v45 = vpop.f32.mrf.mxu3 }
 0x1ad   :  { %v1181_v53 = vadd.f32 %v1180_v45, %v1052_v43 }
 0x1ae   :  { %v1150_v49 = vpop.f32.mrf.mxu2  ;;  %v894_v55 = vpop.f32.mrf.mxu0 }
 0x1af   :  { %v1151_v54 = vadd.f32 %v1150_v49, %v1022_v42  ;;  %v1246_v56 = vadd.f32 %v1181_v53, %v187_v44  ;;  %v1023_v57 = vpop.f32.mrf.mxu1  ;;  %v191_v44 = vld [vmem:[%s2910_s4 + $0x140] sm:$0xff] }
 0x1b0   :  { %v1024_v61 = vadd.f32 %v1023_v57, %v894_v55 }
 0x1b1   :  { %v1234_v58 = vadd.f32 %v1151_v54, %v175_v48  ;;  %1294 = vst [vmem:[%s2910_s4 + $0x120] sm:$0xff] %v1246_v56  ;;  %v179_v48 = vld [vmem:[%s2910_s4 + $0xe0] sm:$0xff] }
 0x1b3   :  { %1282 = vst [vmem:[%s2910_s4 + $0xc0] sm:$0xff] %v1234_v58 }
 0x1b4   :  { %v1182_v63 = vpop.f32.mrf.mxu3 }
 0x1b5   :  { %v1183_v5 = vadd.f32 %v1182_v63, %v1054_v10  ;;  %v192_v10 = vld [vmem:[%s2910_s4 + $0x148] sm:$0xff] }
 0x1b6   :  { %v1152_v2 = vpop.f32.mrf.mxu2  ;;  %v897_v7 = vpop.f32.mrf.mxu0 }
 0x1b7   :  { %v1153_v3 = vadd.f32 %v1152_v2, %v1024_v61  ;;  %v1247_v8 = vadd.f32 %v1183_v5, %v188_v59  ;;  %v1026_v9 = vpop.f32.mrf.mxu1  ;;  %v180_v59 = vld [vmem:[%s2910_s4 + $0xe8] sm:$0xff] }
 0x1b8   :  { %v1027_v24 = vadd.f32 %v1026_v9, %v897_v7  ;;  %v193_v9 = vld [vmem:[%s2910_s4 + $0x150] sm:$0xff] }
 0x1b9   :  { %v1235_v11 = vadd.f32 %v1153_v3, %v176_v1  ;;  %1295 = vst [vmem:[%s2910_s4 + $0x128] sm:$0xff] %v1247_v8 }
 0x1bb   :  { %1283 = vst [vmem:[%s2910_s4 + $0xc8] sm:$0xff] %v1235_v11 }
 0x1bc   :  { %v1185_v14 = vpop.f32.mrf.mxu3 }
 0x1bd   :  { %v1186_v20 = vadd.f32 %v1185_v14, %v1057_v17 }
 0x1be   :  { %v1155_v15 = vpop.f32.mrf.mxu2  ;;  %v899_v21 = vpop.f32.mrf.mxu0 }
 0x1bf   :  { %v1156_v18 = vadd.f32 %v1155_v15, %v1027_v24  ;;  %v1248_v25 = vadd.f32 %v1186_v20, %v189_v13  ;;  %v1028_v26 = vpop.f32.mrf.mxu1  ;;  %v181_v24 = vld [vmem:[%s2910_s4 + $0xf0] sm:$0xff] }
 0x1c0   :  { %v1029_v27 = vadd.f32 %v1028_v26, %v899_v21  ;;  %v194_v21 = vld [vmem:[%s2910_s4 + $0x158] sm:$0xff] }
 0x1c1   :  { %v1236_v28 = vadd.f32 %v1156_v18, %v177_v16  ;;  %1296 = vst [vmem:[%s2910_s4 + $0x130] sm:$0xff] %v1248_v25  ;;  %v182_v26 = vld [vmem:[%s2910_s4 + $0xf8] sm:$0xff] }
 0x1c3   :  { %1284 = vst [vmem:[%s2910_s4 + $0xd0] sm:$0xff] %v1236_v28 }
 0x1c4   :  { %v1187_v32 = vpop.f32.mrf.mxu3 }
 0x1c5   :  { %v1188_v37 = vadd.f32 %v1187_v32, %v1059_v36 }
 0x1c6   :  { %v1157_v35 = vpop.f32.mrf.mxu2  ;;  %v902_v39 = vpop.f32.mrf.mxu0 }
 0x1c7   :  { %v1158_v38 = vadd.f32 %v1157_v35, %v1029_v27  ;;  %v1249_v41 = vadd.f32 %v1188_v37, %v190_v30  ;;  %v1031_v42 = vpop.f32.mrf.mxu1  ;;  %v195_v37 = vld [vmem:[%s2910_s4 + $0x160] sm:$0xff] }
 0x1c8   :  { %v1032_v52 = vadd.f32 %v1031_v42, %v902_v39  ;;  %v183_v39 = vld [vmem:[%s2910_s4 + $0x100] sm:$0xff] }
 0x1c9   :  { %v1237_v43 = vadd.f32 %v1158_v38, %v178_v34  ;;  %1297 = vst [vmem:[%s2910_s4 + $0x138] sm:$0xff] %v1249_v41 }
 0x1cb   :  { %1285 = vst [vmem:[%s2910_s4 + $0xd8] sm:$0xff] %v1237_v43 }
 0x1cc   :  { %v1190_v45 = vpop.f32.mrf.mxu3 }
 0x1cd   :  { %v1191_v53 = vadd.f32 %v1190_v45, %v1062_v51 }
 0x1ce   :  { %v1160_v49 = vpop.f32.mrf.mxu2  ;;  %v904_v55 = vpop.f32.mrf.mxu0 }
 0x1cf   :  { %v1161_v54 = vadd.f32 %v1160_v49, %v1032_v52  ;;  %v1250_v56 = vadd.f32 %v1191_v53, %v191_v44  ;;  %v1033_v57 = vpop.f32.mrf.mxu1  ;;  %v184_v53 = vld [vmem:[%s2910_s4 + $0x108] sm:$0xff] }
 0x1d0   :  { %v1034_v4 = vadd.f32 %v1033_v57, %v904_v55 }
 0x1d1   :  { %v1238_v58 = vadd.f32 %v1161_v54, %v179_v48  ;;  %1298 = vst [vmem:[%s2910_s4 + $0x140] sm:$0xff] %v1250_v56  ;;  %v196_v48 = vld [vmem:[%s2910_s4 + $0x168] sm:$0xff] }
 0x1d3   :  { %1286 = vst [vmem:[%s2910_s4 + $0xe0] sm:$0xff] %v1238_v58 }
 0x1d4   :  { %v1192_v61 = vpop.f32.mrf.mxu3 }
 0x1d5   :  { %v1193_v1 = vadd.f32 %v1192_v61, %v1064_v0 }
 0x1d6   :  { %v1162_v63 = vpop.f32.mrf.mxu2  ;;  %v907_v5 = vpop.f32.mrf.mxu0 }
 0x1d7   :  { %v1163_v2 = vadd.f32 %v1162_v63, %v1034_v4  ;;  %v1251_v3 = vadd.f32 %v1193_v1, %v192_v10  ;;  %v1036_v7 = vpop.f32.mrf.mxu1  ;;  %v197_v10 = vld [vmem:[%s2910_s4 + $0x170] sm:$0xff] }
 0x1d8   :  { %v1037_v19 = vadd.f32 %v1036_v7, %v907_v5 }
 0x1d9   :  { %v1239_v8 = vadd.f32 %v1163_v2, %v180_v59  ;;  %1299 = vst [vmem:[%s2910_s4 + $0x148] sm:$0xff] %v1251_v3  ;;  %v185_v59 = vld [vmem:[%s2910_s4 + $0x110] sm:$0xff] }
 0x1db   :  { %1287 = vst [vmem:[%s2910_s4 + $0xe8] sm:$0xff] %v1239_v8 }
 0x1dc   :  { %v1195_v11 = vpop.f32.mrf.mxu3 }
 0x1dd   :  { %v1196_v13 = vadd.f32 %v1195_v11, %v1067_v23 }
 0x1de   :  { %v1165_v17 = vpop.f32.mrf.mxu2  ;;  %v909_v16 = vpop.f32.mrf.mxu0 }
 0x1df   :  { %v1166_v14 = vadd.f32 %v1165_v17, %v1037_v19  ;;  %v1252_v15 = vadd.f32 %v1196_v13, %v193_v9  ;;  %v1038_v20 = vpop.f32.mrf.mxu1  ;;  %v198_v19 = vld [vmem:[%s2910_s4 + $0x178] sm:$0xff] }
 0x1e0   :  { %v1039_v40 = vadd.f32 %v1038_v20, %v909_v16  ;;  %v186_v9 = vld [vmem:[%s2910_s4 + $0x118] sm:$0xff] }
 0x1e1   :  { %v1240_v18 = vadd.f32 %v1166_v14, %v181_v24  ;;  %1300 = vst [vmem:[%s2910_s4 + $0x150] sm:$0xff] %v1252_v15 }
 0x1e3   :  { %1288 = vst [vmem:[%s2910_s4 + $0xf0] sm:$0xff] %v1240_v18 }
 0x1e4   :  { %v1197_v25 = vpop.f32.mrf.mxu3 }
 0x1e5   :  { %v1198_v36 = vadd.f32 %v1197_v25, %v1069_v31 }
 0x1e6   :  { %v1167_v28 = vpop.f32.mrf.mxu2  ;;  %v912_v30 = vpop.f32.mrf.mxu0 }
 0x1e7   :  { %v1168_v27 = vadd.f32 %v1167_v28, %v1039_v40  ;;  %v1253_v32 = vadd.f32 %v1198_v36, %v194_v21  ;;  %v1041_v34 = vpop.f32.mrf.mxu1 }
 0x1e8   :  { %v1042_v47 = vadd.f32 %v1041_v34, %v912_v30 }
 0x1e9   :  { %v1241_v35 = vadd.f32 %v1168_v27, %v182_v26  ;;  %1301 = vst [vmem:[%s2910_s4 + $0x158] sm:$0xff] %v1253_v32 }
 0x1eb   :  { %1289 = vst [vmem:[%s2910_s4 + $0xf8] sm:$0xff] %v1241_v35 }
 0x1ec   :  { %v1200_v38 = vpop.f32.mrf.mxu3 }
 0x1ed   :  { %v1201_v42 = vadd.f32 %v1200_v38, %v1072_v50 }
 0x1ee   :  { %v1170_v41 = vpop.f32.mrf.mxu2  ;;  %v914_v52 = vpop.f32.mrf.mxu0 }
 0x1ef   :  { %v1171_v43 = vadd.f32 %v1170_v41, %v1042_v47  ;;  %v1254_v51 = vadd.f32 %v1201_v42, %v195_v37  ;;  %v1043_v44 = vpop.f32.mrf.mxu1 }
 0x1f0   :  { %v1044_v62 = vadd.f32 %v1043_v44, %v914_v52 }
 0x1f1   :  { %v1242_v45 = vadd.f32 %v1171_v43, %v183_v39  ;;  %1302 = vst [vmem:[%s2910_s4 + $0x160] sm:$0xff] %v1254_v51 }
 0x1f3   :  { %1290 = vst [vmem:[%s2910_s4 + $0x100] sm:$0xff] %v1242_v45 }
 0x1f4   :  { %v1202_v49 = vpop.f32.mrf.mxu3 }
 0x1f5   :  { %v1203_v55 = vadd.f32 %v1202_v49, %v1074_v60 }
 0x1f6   :  { %v1172_v54 = vpop.f32.mrf.mxu2  ;;  %v917_v58 = vpop.f32.mrf.mxu0 }
 0x1f7   :  { %v1173_v56 = vadd.f32 %v1172_v54, %v1044_v62  ;;  %v1255_v57 = vadd.f32 %v1203_v55, %v196_v48  ;;  %v1046_v0 = vpop.f32.mrf.mxu1 }
 0x1f8   :  { %v1047_v12 = vadd.f32 %v1046_v0, %v917_v58 }
 0x1f9   :  { %v1243_v4 = vadd.f32 %v1173_v56, %v184_v53  ;;  %1303 = vst [vmem:[%s2910_s4 + $0x168] sm:$0xff] %v1255_v57 }
 0x1fb   :  { %1291 = vst [vmem:[%s2910_s4 + $0x108] sm:$0xff] %v1243_v4 }
 0x1fc   :  { %v1205_v61 = vpop.f32.mrf.mxu3 }
 0x1fd   :  { %v1206_v1 = vadd.f32 %v1205_v61, %v1077_v6 }
 0x1fe   :  { %v1175_v63 = vpop.f32.mrf.mxu2  ;;  %v919_v7 = vpop.f32.mrf.mxu0 }
 0x1ff   :  { %v1176_v2 = vadd.f32 %v1175_v63, %v1047_v12  ;;  %v1256_v5 = vadd.f32 %v1206_v1, %v197_v10  ;;  %v1048_v29 = vpop.f32.mrf.mxu1 }
 0x200   :  { %v1049_v8 = vadd.f32 %v1048_v29, %v919_v7 }
 0x201   :  { %v1244_v3 = vadd.f32 %v1176_v2, %v185_v59  ;;  %1304 = vst [vmem:[%s2910_s4 + $0x170] sm:$0xff] %v1256_v5 }
 0x203   :  { %1292 = vst [vmem:[%s2910_s4 + $0x110] sm:$0xff] %v1244_v3 }
 0x204   :  { %v1207_v23 = vpop.f32.mrf.mxu3 }
 0x205   :  { %v1208_v24 = vadd.f32 %v1207_v23, %v1079_v22 }
 0x206   :  { %v1177_v11 = vpop.f32.mrf.mxu2 }
 0x207   :  { %v1178_v17 = vadd.f32 %v1177_v11, %v1049_v8  ;;  %v1257_v13 = vadd.f32 %v1208_v24, %v198_v19 }
 0x209   :  { %v1245_v14 = vadd.f32 %v1178_v17, %v186_v9  ;;  %1305 = vst [vmem:[%s2910_s4 + $0x178] sm:$0xff] %v1257_v13 }
 0x20b   :  { %1293 = vst [vmem:[%s2910_s4 + $0x118] sm:$0xff] %v1245_v14 }
 0x20c PF:  { %v1309_v46 = vld [vmem:[%s2910_s4] sm:$0xff]  ;;  %v1310_v33 = vld [vmem:[%s2910_s4 + $0x8] sm:$0xff]  ;;  %v1311_v16 = vld [vmem:[%s2910_s4 + $0x10] sm:$0xff] }
 0x20d   :  { %v1357_v15 = vmax.f32 %v1309_v46, 0.0  ;;  %v1358_v20 = vmax.f32 %v1310_v33, 0.0  ;;  %v1359_v18 = vmax.f32 %v1311_v16, 0.0  ;;  %v1312_v31 = vld [vmem:[%s2910_s4 + $0x18] sm:$0xff]  ;;  %v1313_v40 = vld [vmem:[%s2910_s4 + $0x20] sm:$0xff]  ;;  %v1314_v21 = vld [vmem:[%s2910_s4 + $0x28] sm:$0xff] }
 0x20e   :  { %v1360_v25 = vmax.f32 %v1312_v31, 0.0  ;;  %v1315_v26 = vld [vmem:[%s2910_s4 + $0x30] sm:$0xff]  ;;  %v1361_v28 = vmax.f32 %v1313_v40, 0.0  ;;  %v1316_v36 = vld [vmem:[%s2910_s4 + $0x38] sm:$0xff]  ;;  %v1362_v27 = vmax.f32 %v1314_v21, 0.0  ;;  %v1317_v30 = vld [vmem:[%s2910_s4 + $0x40] sm:$0xff] }
 0x20f   :  { %1405 = vst [vmem:[%s2910_s4] sm:$0xff] %v1357_v15  ;;  %v1363_v32 = vmax.f32 %v1315_v26, 0.0  ;;  %v1318_v34 = vld [vmem:[%s2910_s4 + $0x48] sm:$0xff]  ;;  %v1364_v35 = vmax.f32 %v1316_v36, 0.0  ;;  %v1319_v47 = vld [vmem:[%s2910_s4 + $0x50] sm:$0xff]  ;;  %v1365_v50 = vmax.f32 %v1317_v30, 0.0  ;;  %v1320_v37 = vld [vmem:[%s2910_s4 + $0x58] sm:$0xff] }
 0x210   :  { %1406 = vst [vmem:[%s2910_s4 + $0x8] sm:$0xff] %v1358_v20  ;;  %v1366_v38 = vmax.f32 %v1318_v34, 0.0  ;;  %v1321_v39 = vld [vmem:[%s2910_s4 + $0x60] sm:$0xff]  ;;  %v1367_v41 = vmax.f32 %v1319_v47, 0.0  ;;  %v1322_v42 = vld [vmem:[%s2910_s4 + $0x68] sm:$0xff]  ;;  %v1368_v43 = vmax.f32 %v1320_v37, 0.0 }
 0x211   :  { %1407 = vst [vmem:[%s2910_s4 + $0x10] sm:$0xff] %v1359_v18  ;;  %v1323_v52 = vld [vmem:[%s2910_s4 + $0x70] sm:$0xff]  ;;  %v1369_v51 = vmax.f32 %v1321_v39, 0.0  ;;  %v1324_v44 = vld [vmem:[%s2910_s4 + $0x78] sm:$0xff]  ;;  %v1370_v45 = vmax.f32 %v1322_v42, 0.0  ;;  %v1325_v60 = vld [vmem:[%s2910_s4 + $0x80] sm:$0xff] }
 0x212   :  { %1408 = vst [vmem:[%s2910_s4 + $0x18] sm:$0xff] %v1360_v25  ;;  %v1371_v62 = vmax.f32 %v1323_v52, 0.0  ;;  %v1326_v48 = vld [vmem:[%s2910_s4 + $0x88] sm:$0xff]  ;;  %v1372_v49 = vmax.f32 %v1324_v44, 0.0  ;;  %v1327_v53 = vld [vmem:[%s2910_s4 + $0x90] sm:$0xff]  ;;  %v1373_v54 = vmax.f32 %v1325_v60, 0.0 }
 0x213   :  { %1409 = vst [vmem:[%s2910_s4 + $0x20] sm:$0xff] %v1361_v28  ;;  %v1328_v55 = vld [vmem:[%s2910_s4 + $0x98] sm:$0xff]  ;;  %v1374_v56 = vmax.f32 %v1326_v48, 0.0  ;;  %v1329_v57 = vld [vmem:[%s2910_s4 + $0xa0] sm:$0xff]  ;;  %v1375_v58 = vmax.f32 %v1327_v53, 0.0  ;;  %v1330_v0 = vld [vmem:[%s2910_s4 + $0xa8] sm:$0xff] }
 0x214   :  { %1410 = vst [vmem:[%s2910_s4 + $0x28] sm:$0xff] %v1362_v27  ;;  %v1376_v4 = vmax.f32 %v1328_v55, 0.0  ;;  %v1331_v12 = vld [vmem:[%s2910_s4 + $0xb0] sm:$0xff]  ;;  %v1377_v6 = vmax.f32 %v1329_v57, 0.0  ;;  %v1332_v10 = vld [vmem:[%s2910_s4 + $0xb8] sm:$0xff]  ;;  %v1378_v61 = vmax.f32 %v1330_v0, 0.0 }
 0x215   :  { %1411 = vst [vmem:[%s2910_s4 + $0x30] sm:$0xff] %v1363_v32  ;;  %v1333_v59 = vld [vmem:[%s2910_s4 + $0xc0] sm:$0xff]  ;;  %v1379_v63 = vmax.f32 %v1331_v12, 0.0  ;;  %v1334_v1 = vld [vmem:[%s2910_s4 + $0xc8] sm:$0xff]  ;;  %v1380_v2 = vmax.f32 %v1332_v10, 0.0  ;;  %v1335_v5 = vld [vmem:[%s2910_s4 + $0xd0] sm:$0xff] }
 0x216   :  { %1412 = vst [vmem:[%s2910_s4 + $0x38] sm:$0xff] %v1364_v35  ;;  %v1381_v3 = vmax.f32 %v1333_v59, 0.0  ;;  %v1336_v7 = vld [vmem:[%s2910_s4 + $0xd8] sm:$0xff]  ;;  %v1382_v29 = vmax.f32 %v1334_v1, 0.0  ;;  %v1337_v22 = vld [vmem:[%s2910_s4 + $0xe0] sm:$0xff]  ;;  %v1383_v8 = vmax.f32 %v1335_v5, 0.0 }
 0x217   :  { %1413 = vst [vmem:[%s2910_s4 + $0x40] sm:$0xff] %v1365_v50  ;;  %v1338_v19 = vld [vmem:[%s2910_s4 + $0xe8] sm:$0xff]  ;;  %v1384_v23 = vmax.f32 %v1336_v7, 0.0  ;;  %v1339_v9 = vld [vmem:[%s2910_s4 + $0xf0] sm:$0xff]  ;;  %v1385_v11 = vmax.f32 %v1337_v22, 0.0  ;;  %v1340_v24 = vld [vmem:[%s2910_s4 + $0xf8] sm:$0xff] }
 0x218   :  { %1414 = vst [vmem:[%s2910_s4 + $0x48] sm:$0xff] %v1366_v38  ;;  %v1386_v17 = vmax.f32 %v1338_v19, 0.0  ;;  %v1341_v13 = vld [vmem:[%s2910_s4 + $0x100] sm:$0xff]  ;;  %v1387_v14 = vmax.f32 %v1339_v9, 0.0  ;;  %v1342_v46 = vld [vmem:[%s2910_s4 + $0x108] sm:$0xff]  ;;  %v1388_v33 = vmax.f32 %v1340_v24, 0.0 }
 0x219   :  { %1415 = vst [vmem:[%s2910_s4 + $0x50] sm:$0xff] %v1367_v41  ;;  %v1343_v16 = vld [vmem:[%s2910_s4 + $0x110] sm:$0xff]  ;;  %v1389_v15 = vmax.f32 %v1341_v13, 0.0  ;;  %v1344_v20 = vld [vmem:[%s2910_s4 + $0x118] sm:$0xff]  ;;  %v1390_v18 = vmax.f32 %v1342_v46, 0.0  ;;  %v1345_v31 = vld [vmem:[%s2910_s4 + $0x120] sm:$0xff] }
 0x21a   :  { %1416 = vst [vmem:[%s2910_s4 + $0x58] sm:$0xff] %v1368_v43  ;;  %v1391_v40 = vmax.f32 %v1343_v16, 0.0  ;;  %v1346_v21 = vld [vmem:[%s2910_s4 + $0x128] sm:$0xff]  ;;  %v1392_v25 = vmax.f32 %v1344_v20, 0.0  ;;  %v1347_v26 = vld [vmem:[%s2910_s4 + $0x130] sm:$0xff]  ;;  %v1393_v28 = vmax.f32 %v1345_v31, 0.0 }
 0x21b   :  { %1417 = vst [vmem:[%s2910_s4 + $0x60] sm:$0xff] %v1369_v51  ;;  %v1348_v36 = vld [vmem:[%s2910_s4 + $0x138] sm:$0xff]  ;;  %v1394_v27 = vmax.f32 %v1346_v21, 0.0  ;;  %v1349_v30 = vld [vmem:[%s2910_s4 + $0x140] sm:$0xff]  ;;  %v1395_v32 = vmax.f32 %v1347_v26, 0.0  ;;  %v1350_v34 = vld [vmem:[%s2910_s4 + $0x148] sm:$0xff] }
 0x21c   :  { %1418 = vst [vmem:[%s2910_s4 + $0x68] sm:$0xff] %v1370_v45  ;;  %v1396_v35 = vmax.f32 %v1348_v36, 0.0  ;;  %v1351_v47 = vld [vmem:[%s2910_s4 + $0x150] sm:$0xff]  ;;  %v1397_v50 = vmax.f32 %v1349_v30, 0.0  ;;  %v1352_v37 = vld [vmem:[%s2910_s4 + $0x158] sm:$0xff]  ;;  %v1398_v38 = vmax.f32 %v1350_v34, 0.0 }
 0x21d   :  { %1419 = vst [vmem:[%s2910_s4 + $0x70] sm:$0xff] %v1371_v62  ;;  %v1353_v39 = vld [vmem:[%s2910_s4 + $0x160] sm:$0xff]  ;;  %v1399_v41 = vmax.f32 %v1351_v47, 0.0  ;;  %v1354_v42 = vld [vmem:[%s2910_s4 + $0x168] sm:$0xff]  ;;  %v1400_v43 = vmax.f32 %v1352_v37, 0.0  ;;  %v1355_v52 = vld [vmem:[%s2910_s4 + $0x170] sm:$0xff] }
 0x21e   :  { %1420 = vst [vmem:[%s2910_s4 + $0x78] sm:$0xff] %v1372_v49  ;;  %v1401_v51 = vmax.f32 %v1353_v39, 0.0  ;;  %v1356_v44 = vld [vmem:[%s2910_s4 + $0x178] sm:$0xff]  ;;  %v1402_v45 = vmax.f32 %v1354_v42, 0.0  ;;  %v1403_v60 = vmax.f32 %v1355_v52, 0.0 }
 0x21f   :  { %1421 = vst [vmem:[%s2910_s4 + $0x80] sm:$0xff] %v1373_v54  ;;  %v1404_v62 = vmax.f32 %v1356_v44, 0.0 }
 0x220   :  { %1422 = vst [vmem:[%s2910_s4 + $0x88] sm:$0xff] %v1374_v56 }
 0x221   :  { %1423 = vst [vmem:[%s2910_s4 + $0x90] sm:$0xff] %v1375_v58 }
 0x222   :  { %1424 = vst [vmem:[%s2910_s4 + $0x98] sm:$0xff] %v1376_v4 }
 0x223   :  { %1425 = vst [vmem:[%s2910_s4 + $0xa0] sm:$0xff] %v1377_v6 }
 0x224   :  { %1426 = vst [vmem:[%s2910_s4 + $0xa8] sm:$0xff] %v1378_v61 }
 0x225   :  { %1427 = vst [vmem:[%s2910_s4 + $0xb0] sm:$0xff] %v1379_v63 }
 0x226   :  { %1428 = vst [vmem:[%s2910_s4 + $0xb8] sm:$0xff] %v1380_v2 }
 0x227   :  { %1429 = vst [vmem:[%s2910_s4 + $0xc0] sm:$0xff] %v1381_v3 }
 0x228   :  { %1430 = vst [vmem:[%s2910_s4 + $0xc8] sm:$0xff] %v1382_v29 }
 0x229   :  { %1431 = vst [vmem:[%s2910_s4 + $0xd0] sm:$0xff] %v1383_v8 }
 0x22a   :  { %1432 = vst [vmem:[%s2910_s4 + $0xd8] sm:$0xff] %v1384_v23 }
 0x22b   :  { %1433 = vst [vmem:[%s2910_s4 + $0xe0] sm:$0xff] %v1385_v11 }
 0x22c   :  { %1434 = vst [vmem:[%s2910_s4 + $0xe8] sm:$0xff] %v1386_v17 }
 0x22d   :  { %1435 = vst [vmem:[%s2910_s4 + $0xf0] sm:$0xff] %v1387_v14 }
 0x22e   :  { %1436 = vst [vmem:[%s2910_s4 + $0xf8] sm:$0xff] %v1388_v33 }
 0x22f   :  { %1437 = vst [vmem:[%s2910_s4 + $0x100] sm:$0xff] %v1389_v15 }
 0x230   :  { %1438 = vst [vmem:[%s2910_s4 + $0x108] sm:$0xff] %v1390_v18 }
 0x231   :  { %1439 = vst [vmem:[%s2910_s4 + $0x110] sm:$0xff] %v1391_v40 }
 0x232   :  { %1440 = vst [vmem:[%s2910_s4 + $0x118] sm:$0xff] %v1392_v25 }
 0x233   :  { %1441 = vst [vmem:[%s2910_s4 + $0x120] sm:$0xff] %v1393_v28 }
 0x234   :  { %1442 = vst [vmem:[%s2910_s4 + $0x128] sm:$0xff] %v1394_v27 }
 0x235   :  { %1443 = vst [vmem:[%s2910_s4 + $0x130] sm:$0xff] %v1395_v32 }
 0x236   :  { %1444 = vst [vmem:[%s2910_s4 + $0x138] sm:$0xff] %v1396_v35 }
 0x237   :  { %1445 = vst [vmem:[%s2910_s4 + $0x140] sm:$0xff] %v1397_v50 }
 0x238   :  { %1446 = vst [vmem:[%s2910_s4 + $0x148] sm:$0xff] %v1398_v38 }
 0x239   :  { %1447 = vst [vmem:[%s2910_s4 + $0x150] sm:$0xff] %v1399_v41 }
 0x23a   :  { %1448 = vst [vmem:[%s2910_s4 + $0x158] sm:$0xff] %v1400_v43 }
 0x23b   :  { %1449 = vst [vmem:[%s2910_s4 + $0x160] sm:$0xff] %v1401_v51 }
 0x23c   :  { %1450 = vst [vmem:[%s2910_s4 + $0x168] sm:$0xff] %v1402_v45 }
 0x23d   :  { %1451 = vst [vmem:[%s2910_s4 + $0x170] sm:$0xff] %v1403_v60 }
 0x23e   :  { %1452 = vst [vmem:[%s2910_s4 + $0x178] sm:$0xff] %v1404_v62 }
 0x23f   :  { %1457 = vsyncpa [#allocation6], 1 }

// kernel: a_call__.3
= control target key start
LH: loop header
LB: loop body
LE: loop exit
PB: predicated region body
PF: predicated region fallthrough
CT: control target
= control target key end

     0   :  { %v2767_v0 = vmov 0.0   ;;  %s4621_s0 = inlined_call_operand.<no memory space> [shape: s32[1], index: 0, kind: input, shape index: {}]   ;;  %s4622_s1 = inlined_call_operand.<no memory space> [shape: s32[1], index: 1, kind: input, shape index: {}]   ;;  %s4623_s3 = inlined_call_operand.vmem [shape: bf16[384,128], index: 3, kind: input, shape index: {}]   ;;  %s4624_s4 = inlined_call_operand.vmem [shape: f32[384,128], index: 4, kind: output, shape index: {}]   ;;  %s4625_s2 = inlined_call_operand.vmem [shape: bf16[384,384], index: 2, kind: input, shape index: {}]  }
   0x1   :  { %9 = sst [smem:[#allocation3]] %s4621_s0  ;;  %s34_s19 = smul.u32 3, %s4621_s0  ;;  %46 = vst [vmem:[%s4624_s4] sm:$0xff] %v2767_v0 }
   0x2   :  { %47 = vst [vmem:[%s4624_s4 + $0x8] sm:$0xff] %v2767_v0  ;;  %p2142_p1 = scmp.le.s32.totalorder %s4622_s1, 0 }
   0x3   :  { %p35_p0 = scmp.lt.s32.totalorder %s34_s19, 2  ;;  %48 = vst [vmem:[%s4624_s4 + $0x10] sm:$0xff] %v2767_v0  ;;  %s100_s14 = sld [smem:[#allocation3]] (!%p2142_p1) }
   0x4   :  { %49 = vst [vmem:[%s4624_s4 + $0x18] sm:$0xff] %v2767_v0 }
   0x5   :  { %s4629_s19 = smov (!%p35_p0, %s34_s19), 2  ;;  %50 = vst [vmem:[%s4624_s4 + $0x20] sm:$0xff] %v2767_v0 }
   0x6   :  { %51 = vst [vmem:[%s4624_s4 + $0x28] sm:$0xff] %v2767_v0  ;;  %s2140_s5 = sshll.u32 %s4629_s19, 2 }
   0x7   :  { %52 = vst [vmem:[%s4624_s4 + $0x30] sm:$0xff] %v2767_v0  ;;  %s2823_s10 = scalar_lea.vmem %s4625_s2, %s2140_s5 }
   0x8   :  { %53 = vst [vmem:[%s4624_s4 + $0x38] sm:$0xff] %v2767_v0 }
   0x9   :  { %54 = vst [vmem:[%s4624_s4 + $0x40] sm:$0xff] %v2767_v0  ;;  %s101_s15 = smul.u32 (!%p2142_p1), 384, %s100_s14 }
   0xa   :  { %55 = vst [vmem:[%s4624_s4 + $0x48] sm:$0xff] %v2767_v0 }
   0xb   :  { %56 = vst [vmem:[%s4624_s4 + $0x50] sm:$0xff] %v2767_v0  ;;  %s102_s16 = sshra.s32 (!%p2142_p1), %s101_s15, 3 }
   0xc   :  { %57 = vst [vmem:[%s4624_s4 + $0x58] sm:$0xff] %v2767_v0  ;;  %s2143_s17 = sshll.u32 (!%p2142_p1), %s102_s16, 2 }
   0xd   :  { %58 = vst [vmem:[%s4624_s4 + $0x60] sm:$0xff] %v2767_v0  ;;  %s2954_s20 = scalar_lea.vmem (!%p2142_p1), %s4623_s3, %s2143_s17 }
   0xe   :  { %59 = vst [vmem:[%s4624_s4 + $0x68] sm:$0xff] %v2767_v0 }
   0xf   :  { %60 = vst [vmem:[%s4624_s4 + $0x70] sm:$0xff] %v2767_v0 }
  0x10   :  { %61 = vst [vmem:[%s4624_s4 + $0x78] sm:$0xff] %v2767_v0 }
  0x11   :  { %62 = vst [vmem:[%s4624_s4 + $0x80] sm:$0xff] %v2767_v0 }
  0x12   :  { %63 = vst [vmem:[%s4624_s4 + $0x88] sm:$0xff] %v2767_v0 }
  0x13   :  { %64 = vst [vmem:[%s4624_s4 + $0x90] sm:$0xff] %v2767_v0 }
  0x14   :  { %65 = vst [vmem:[%s4624_s4 + $0x98] sm:$0xff] %v2767_v0 }
  0x15   :  { %66 = vst [vmem:[%s4624_s4 + $0xa0] sm:$0xff] %v2767_v0 }
  0x16   :  { %67 = vst [vmem:[%s4624_s4 + $0xa8] sm:$0xff] %v2767_v0 }
  0x17   :  { %68 = vst [vmem:[%s4624_s4 + $0xb0] sm:$0xff] %v2767_v0 }
  0x18   :  { %69 = vst [vmem:[%s4624_s4 + $0xb8] sm:$0xff] %v2767_v0 }
  0x19   :  { %70 = vst [vmem:[%s4624_s4 + $0xc0] sm:$0xff] %v2767_v0 }
  0x1a   :  { %71 = vst [vmem:[%s4624_s4 + $0xc8] sm:$0xff] %v2767_v0 }
  0x1b   :  { %72 = vst [vmem:[%s4624_s4 + $0xd0] sm:$0xff] %v2767_v0 }
  0x1c   :  { %73 = vst [vmem:[%s4624_s4 + $0xd8] sm:$0xff] %v2767_v0 }
  0x1d   :  { %74 = vst [vmem:[%s4624_s4 + $0xe0] sm:$0xff] %v2767_v0 }
  0x1e   :  { %75 = vst [vmem:[%s4624_s4 + $0xe8] sm:$0xff] %v2767_v0 }
  0x1f   :  { %76 = vst [vmem:[%s4624_s4 + $0xf0] sm:$0xff] %v2767_v0 }
  0x20   :  { %77 = vst [vmem:[%s4624_s4 + $0xf8] sm:$0xff] %v2767_v0 }
  0x21   :  { %78 = vst [vmem:[%s4624_s4 + $0x100] sm:$0xff] %v2767_v0 }
  0x22   :  { %79 = vst [vmem:[%s4624_s4 + $0x108] sm:$0xff] %v2767_v0 }
  0x23   :  { %80 = vst [vmem:[%s4624_s4 + $0x110] sm:$0xff] %v2767_v0 }
  0x24   :  { %81 = vst [vmem:[%s4624_s4 + $0x118] sm:$0xff] %v2767_v0 }
  0x25   :  { %82 = vst [vmem:[%s4624_s4 + $0x120] sm:$0xff] %v2767_v0 }
  0x26   :  { %83 = vst [vmem:[%s4624_s4 + $0x128] sm:$0xff] %v2767_v0 }
  0x27   :  { %84 = vst [vmem:[%s4624_s4 + $0x130] sm:$0xff] %v2767_v0 }
  0x28   :  { %85 = vst [vmem:[%s4624_s4 + $0x138] sm:$0xff] %v2767_v0 }
  0x29   :  { %86 = vst [vmem:[%s4624_s4 + $0x140] sm:$0xff] %v2767_v0 }
  0x2a   :  { %87 = vst [vmem:[%s4624_s4 + $0x148] sm:$0xff] %v2767_v0 }
  0x2b   :  { %88 = vst [vmem:[%s4624_s4 + $0x150] sm:$0xff] %v2767_v0 }
  0x2c   :  { %89 = vst [vmem:[%s4624_s4 + $0x158] sm:$0xff] %v2767_v0  ;;  %98 = sbr.rel (%p2142_p1) target bundleno = 500 (0x1f4), region = 17 }
  0x2d   :  { %90 = vst [vmem:[%s4624_s4 + $0x160] sm:$0xff] %v2767_v0 }
  0x2e   :  { %91 = vst [vmem:[%s4624_s4 + $0x168] sm:$0xff] %v2767_v0 }
  0x2f   :  { %92 = vst [vmem:[%s4624_s4 + $0x170] sm:$0xff] %v2767_v0 }
  0x30   :  { %93 = vst [vmem:[%s4624_s4 + $0x178] sm:$0xff] %v2767_v0 }
  0x31   :  { %v2535_v1 = vld [vmem:[%s2954_s20 + $0x38] sm:$0xff]  ;;  %v2534_v4 = vld [vmem:[%s2954_s20 + $0x30] sm:$0xff]  ;;  %v2533_v7 = vld [vmem:[%s2954_s20 + $0x28] sm:$0xff] }
  0x32   :  { %v2958_v2 = vld [vmem:[%s2954_s20 + $0x78] sm:$0xff]  ;;  %826 = vmatpush.bf16.msra.mxu0 %v2535_v1  ;;  %2624 = vmatpush.bf16.msra.mxu3 %v2535_v1  ;;  %v2967_v5 = vld [vmem:[%s2954_s20 + $0x70] sm:$0xff]  ;;  %v2541_v8 = vld [vmem:[%s2954_s20 + $0x68] sm:$0xff] }
  0x33   :  { %v2961_v3 = vld [vmem:[%s2954_s20 + $0xb8] sm:$0xff]  ;;  %955 = vmatpush.bf16.msra.mxu1 %v2958_v2  ;;  %v2970_v6 = vld [vmem:[%s2954_s20 + $0xb0] sm:$0xff]  ;;  %v2977_v9 = vld [vmem:[%s2954_s20 + $0xa8] sm:$0xff] }
  0x34   :  { %1084 = vmatpush.bf16.msra.mxu2 %v2961_v3  ;;  %v2532_v10 = vld [vmem:[%s2954_s20 + $0x20] sm:$0xff]  ;;  %v2531_v13 = vld [vmem:[%s2954_s20 + $0x18] sm:$0xff]  ;;  %v2530_v16 = vld [vmem:[%s2954_s20 + $0x10] sm:$0xff] }
  0x35   :  { %v2540_v11 = vld [vmem:[%s2954_s20 + $0x60] sm:$0xff]  ;;  %v2539_v14 = vld [vmem:[%s2954_s20 + $0x58] sm:$0xff]  ;;  %v2538_v17 = vld [vmem:[%s2954_s20 + $0x50] sm:$0xff] }
  0x36   :  { %827 = vmatpush.bf16.msra.mxu0 %v2534_v4  ;;  %2625 = vmatpush.bf16.msra.mxu3 %v2534_v4  ;;  %v2983_v12 = vld [vmem:[%s2954_s20 + $0xa0] sm:$0xff]  ;;  %v2989_v15 = vld [vmem:[%s2954_s20 + $0x98] sm:$0xff]  ;;  %v2995_v18 = vld [vmem:[%s2954_s20 + $0x90] sm:$0xff] }
  0x37   :  { %956 = vmatpush.bf16.msra.mxu1 %v2967_v5  ;;  %v2529_v19 = vld [vmem:[%s2954_s20 + $0x8] sm:$0xff]  ;;  %v2146_v22 = vld [vmem:[%s2823_s10] sm:$0xf]  ;;  %v2362_v26 = vld [vmem:[%s2823_s10 + $0x1b0] sm:$0xf] }
  0x38   :  { %1085 = vmatpush.bf16.msra.mxu2 %v2970_v6  ;;  %v2537_v20 = vld [vmem:[%s2954_s20 + $0x48] sm:$0xff]  ;;  %v2528_v24 = vld [vmem:[%s2954_s20] sm:$0xff]  ;;  %v2607_v28 = vld [vmem:[%s2823_s10 + $0x1b8] sm:$0xf0] }
  0x39   :  { %v3001_v21 = vld [vmem:[%s2954_s20 + $0x88] sm:$0xff]  ;;  %v2536_v25 = vld [vmem:[%s2954_s20 + $0x40] sm:$0xff]  ;;  %v2148_v30 = vld [vmem:[%s2823_s10 + $0xc] sm:$0xf0]  ;;  %v2363_v34 = vor.u32 %v2607_v28, %v2362_v26 }
  0x3a   :  { %828 = vmatpush.bf16.msra.mxu0 %v2533_v7  ;;  %2626 = vmatpush.bf16.msra.mxu3 %v2533_v7  ;;  %v2553_v23 = vld [vmem:[%s2823_s10 + $0x8] sm:$0xf0]  ;;  %v3009_v27 = vld [vmem:[%s2954_s20 + $0x80] sm:$0xff]  ;;  %v2154_v31 = vld [vmem:[%s2823_s10 + $0x8] sm:$0xf] }
  0x3b   :  { %957 = vmatpush.bf16.msra.mxu1 %v2541_v8  ;;  %v2552_v29 = vld [vmem:[%s2823_s10 + $0x4] sm:$0xf]  ;;  %v2554_v32 = vld [vmem:[%s2823_s10 + $0x10] sm:$0xf0]  ;;  %v2147_v33 = vor.u32 %v2553_v23, %v2146_v22  ;;  %v2158_v37 = vld [vmem:[%s2823_s10 + $0x18] sm:$0xf] }
  0x3c   :  { %1086 = vmatpush.bf16.msra.mxu2 %v2977_v9  ;;  %v2151_v35 = vor.u32 %v2552_v29, %v2148_v30  ;;  %v2155_v36 = vor.u32 %v2554_v32, %v2154_v31  ;;  %v2556_v38 = vld [vmem:[%s2823_s10 + $0x20] sm:$0xf0]  ;;  %v2374_v39 = vld [vmem:[%s2823_s10 + $0x1c8] sm:$0xf]  ;;  %v2610_v40 = vld [vmem:[%s2823_s10 + $0x1d0] sm:$0xf0] }
  0x3d   :  { %v2555_v41 = vld [vmem:[%s2823_s10 + $0x1c] sm:$0xf]  ;;  %v2160_v42 = vld [vmem:[%s2823_s10 + $0x24] sm:$0xf0]  ;;  %v2166_v43 = vld [vmem:[%s2823_s10 + $0x20] sm:$0xf]  ;;  %v2159_v45 = vor.u32 %v2556_v38, %v2158_v37  ;;  %v2375_v46 = vor.u32 %v2610_v40, %v2374_v39 }
  0x3e   :  { %829 = vmatpush.bf16.msra.mxu0 %v2532_v10  ;;  %2627 = vmatpush.bf16.msra.mxu3 %v2532_v10  ;;  %v2557_v44 = vld [vmem:[%s2823_s10 + $0x28] sm:$0xf0]  ;;  %v2163_v47 = vor.u32 %v2555_v41, %v2160_v42  ;;  %v2170_v49 = vld [vmem:[%s2823_s10 + $0x30] sm:$0xf]  ;;  %v2559_v50 = vld [vmem:[%s2823_s10 + $0x38] sm:$0xf0] }
  0x3f   :  { %958 = vmatpush.bf16.msra.mxu1 %v2540_v11  ;;  %v2167_v48 = vor.u32 %v2557_v44, %v2166_v43  ;;  %v2386_v51 = vld [vmem:[%s2823_s10 + $0x1e0] sm:$0xf]  ;;  %v2613_v52 = vld [vmem:[%s2823_s10 + $0x1e8] sm:$0xf0]  ;;  %v2558_v53 = vld [vmem:[%s2823_s10 + $0x34] sm:$0xf]  ;;  %v2171_v57 = vor.u32 %v2559_v50, %v2170_v49 }
  0x40   :  { %1087 = vmatpush.bf16.msra.mxu2 %v2983_v12  ;;  %v2172_v54 = vld [vmem:[%s2823_s10 + $0x3c] sm:$0xf0]  ;;  %v2178_v55 = vld [vmem:[%s2823_s10 + $0x38] sm:$0xf]  ;;  %v2560_v56 = vld [vmem:[%s2823_s10 + $0x40] sm:$0xf0]  ;;  %v2387_v58 = vor.u32 %v2613_v52, %v2386_v51 }
  0x41   :  { %v2175_v59 = vor.u32 %v2558_v53, %v2172_v54  ;;  %v2179_v60 = vor.u32 %v2560_v56, %v2178_v55  ;;  %v2182_v61 = vld [vmem:[%s2823_s10 + $0x48] sm:$0xf]  ;;  %v2562_v62 = vld [vmem:[%s2823_s10 + $0x50] sm:$0xf0]  ;;  %v2398_v63 = vld [vmem:[%s2823_s10 + $0x1f8] sm:$0xf] }
  0x42   :  { %830 = vmatpush.bf16.msra.mxu0 %v2531_v13  ;;  %2628 = vmatpush.bf16.msra.mxu3 %v2531_v13  ;;  %v2616_v0 = vld [vmem:[%s2823_s10 + $0x200] sm:$0xf0]  ;;  %v2561_v1 = vld [vmem:[%s2823_s10 + $0x4c] sm:$0xf]  ;;  %v2563_v4 = vld [vmem:[%s2823_s10 + $0x58] sm:$0xf0] }
  0x43   :  { %959 = vmatpush.bf16.msra.mxu1 %v2539_v14  ;;  %v2565_v10 = vld [vmem:[%s2823_s10 + $0x68] sm:$0xf0]  ;;  %v2564_v13 = vld [vmem:[%s2823_s10 + $0x64] sm:$0xf]  ;;  %v2422_v23 = vld [vmem:[%s2823_s10 + $0x228] sm:$0xf] }
  0x44   :  { %1088 = vmatpush.bf16.msra.mxu2 %v2989_v15  ;;  %v2568_v22 = vld [vmem:[%s2823_s10 + $0x80] sm:$0xf0]  ;;  %v2208_v26 = vld [vmem:[%s2823_s10 + $0x84] sm:$0xf0]  ;;  %v2569_v28 = vld [vmem:[%s2823_s10 + $0x88] sm:$0xf0] }
  0x45   :  { %v2364_v37 = vld [vmem:[%s2823_s10 + $0x1bc] sm:$0xf0]  ;;  %v2226_v39 = vld [vmem:[%s2823_s10 + $0x98] sm:$0xf]  ;;  %v2572_v40 = vld [vmem:[%s2823_s10 + $0xa0] sm:$0xf0] }
  0x46   :  { %831 = vmatpush.bf16.msra.mxu0 %v2530_v16  ;;  %2629 = vmatpush.bf16.msra.mxu3 %v2530_v16  ;;  %v2566_v16 = vld [vmem:[%s2823_s10 + $0x70] sm:$0xf0]  ;;  %v2220_v38 = vld [vmem:[%s2823_s10 + $0x9c] sm:$0xf0]  ;;  %v2227_v44 = vor.u32 %v2572_v40, %v2226_v39  ;;  %v2376_v49 = vld [vmem:[%s2823_s10 + $0x1d4] sm:$0xf0] }
  0x47   :  { %960 = vmatpush.bf16.msra.mxu1 %v2538_v17  ;;  %v2232_v50 = vld [vmem:[%s2823_s10 + $0xb4] sm:$0xf0]  ;;  %v2238_v51 = vld [vmem:[%s2823_s10 + $0xb0] sm:$0xf]  ;;  %v2575_v52 = vld [vmem:[%s2823_s10 + $0xb8] sm:$0xf0] }
  0x48   :  { %1089 = vmatpush.bf16.msra.mxu2 %v2995_v18  ;;  %v2239_v56 = vor.u32 %v2575_v52, %v2238_v51 }
  0x4a   :  { %832 = vmatpush.bf16.msra.mxu0 %v2529_v19  ;;  %2630 = vmatpush.bf16.msra.mxu3 %v2529_v19 }
  0x4b   :  { %961 = vmatpush.bf16.msra.mxu1 %v2537_v20 }
  0x4c   :  { %1090 = vmatpush.bf16.msra.mxu2 %v3001_v21 }
  0x4e   :  { %833 = vmatpush.bf16.msra.mxu0 %v2528_v24  ;;  %2631 = vmatpush.bf16.msra.mxu3 %v2528_v24  ;;  %v2622_v24 = vld [vmem:[%s2823_s10 + $0x230] sm:$0xf0] }
  0x4f   :  { %962 = vmatpush.bf16.msra.mxu1 %v2536_v25  ;;  %v2423_v30 = vor.u32 %v2622_v24, %v2422_v23 }
  0x50   :  { %1091 = vmatpush.bf16.msra.mxu2 %v3009_v27 }
  0x51   :  { %834 = vmatmul.bf16.vlgmr.msra.gmra.mxu0 %v2147_v33  ;;  %924 = vmatmul.bf16.vlgmr.msra.gmra.mxu3 %v2363_v34  ;;  %v2218_v33 = vld [vmem:[%s2823_s10 + $0x90] sm:$0xf]  ;;  %v2571_v34 = vld [vmem:[%s2823_s10 + $0x98] sm:$0xf0] }
  0x52   :  { %2632 = vmatpush.bf16.msrb.mxu3 %v2958_v2  ;;  %963 = vmatmul.bf16.vlgmr.msra.gmra.mxu1 %v2151_v35  ;;  %v2184_v2 = vld [vmem:[%s2823_s10 + $0x54] sm:$0xf0]  ;;  %v2570_v35 = vld [vmem:[%s2823_s10 + $0x94] sm:$0xf]  ;;  %v2219_v41 = vor.u32 %v2571_v34, %v2218_v33 }
  0x53   :  { %1092 = vmatmul.bf16.vlgmr.msra.gmra.mxu2 %v2155_v36  ;;  %v2187_v7 = vor.u32 %v2561_v1, %v2184_v2  ;;  %v2606_v36 = vld [vmem:[%s2823_s10 + $0x1b4] sm:$0xf]  ;;  %v2223_v43 = vor.u32 %v2570_v35, %v2220_v38 }
  0x54   :  { %v2367_v42 = vor.u32 %v2606_v36, %v2364_v37  ;;  %v156_v37 = vld [vmem:[%s4624_s4 + $0x10] sm:$0xff] }
  0x56   :  { %2633 = vmatpush.bf16.msrb.mxu3 %v2967_v5  ;;  %v2183_v5 = vor.u32 %v2562_v62, %v2182_v61  ;;  %v2388_v61 = vld [vmem:[%s2823_s10 + $0x1ec] sm:$0xf0] }
  0x57   :  { %v2244_v62 = vld [vmem:[%s2823_s10 + $0xcc] sm:$0xf0] }
  0x5a   :  { %2634 = vmatpush.bf16.msrb.mxu3 %v2541_v8 }
  0x5e   :  { %2635 = vmatpush.bf16.msrb.mxu3 %v2540_v11  ;;  %v2410_v11 = vld [vmem:[%s2823_s10 + $0x210] sm:$0xf] }
  0x61   :  { %839 = vmatmul.bf16.gmra.mxu0 %v2159_v45  ;;  %929 = vmatmul.bf16.gmra.mxu3 %v2375_v46  ;;  %v2230_v45 = vld [vmem:[%s2823_s10 + $0xa8] sm:$0xf]  ;;  %v2574_v46 = vld [vmem:[%s2823_s10 + $0xb0] sm:$0xf0] }
  0x62   :  { %2636 = vmatpush.bf16.msrb.mxu3 %v2539_v14  ;;  %968 = vmatmul.bf16.gmra.mxu1 %v2163_v47  ;;  %v2196_v14 = vld [vmem:[%s2823_s10 + $0x6c] sm:$0xf0]  ;;  %v2573_v47 = vld [vmem:[%s2823_s10 + $0xac] sm:$0xf]  ;;  %v2231_v53 = vor.u32 %v2574_v46, %v2230_v45  ;;  %v2582_v45 = vld [vmem:[%s2823_s10 + $0xf4] sm:$0xf] }
  0x63   :  { %1097 = vmatmul.bf16.gmra.mxu2 %v2167_v48  ;;  %v2199_v19 = vor.u32 %v2564_v13, %v2196_v14  ;;  %v2609_v48 = vld [vmem:[%s2823_s10 + $0x1cc] sm:$0xf]  ;;  %v2235_v55 = vor.u32 %v2573_v47, %v2232_v50  ;;  %v2618_v46 = vld [vmem:[%s2823_s10 + $0x214] sm:$0xf]  ;;  %v2412_v47 = vld [vmem:[%s2823_s10 + $0x21c] sm:$0xf0] }
  0x64   :  { %v2379_v54 = vor.u32 %v2609_v48, %v2376_v49  ;;  %v2268_v48 = vld [vmem:[%s2823_s10 + $0xfc] sm:$0xf0]  ;;  %v2274_v49 = vld [vmem:[%s2823_s10 + $0xf8] sm:$0xf]  ;;  %v2584_v50 = vld [vmem:[%s2823_s10 + $0x100] sm:$0xf0] }
  0x66   :  { %2637 = vmatpush.bf16.msrb.mxu3 %v2538_v17 }
  0x6a   :  { %2638 = vmatpush.bf16.msrb.mxu3 %v2537_v20 }
  0x6e   :  { %2639 = vmatpush.bf16.msrb.mxu3 %v2536_v25  ;;  %v2567_v25 = vld [vmem:[%s2823_s10 + $0x7c] sm:$0xf] }
  0x6f   :  { %v2211_v31 = vor.u32 %v2567_v25, %v2208_v26  ;;  %v155_v25 = vld [vmem:[%s4624_s4 + $0x8] sm:$0xff] }
  0x71   :  { %844 = vmatmul.bf16.gmra.mxu0 %v2171_v57  ;;  %934 = vmatmul.bf16.gmra.mxu3 %v2387_v58  ;;  %v2242_v57 = vld [vmem:[%s2823_s10 + $0xc0] sm:$0xf]  ;;  %v2577_v58 = vld [vmem:[%s2823_s10 + $0xc8] sm:$0xf0] }
  0x72   :  { %2640 = vmatpush.bf16.msra.mxu3 %v2961_v3  ;;  %973 = vmatmul.bf16.gmra.mxu1 %v2175_v59  ;;  %v2190_v3 = vld [vmem:[%s2823_s10 + $0x50] sm:$0xf]  ;;  %v2576_v59 = vld [vmem:[%s2823_s10 + $0xc4] sm:$0xf]  ;;  %v2243_v1 = vor.u32 %v2577_v58, %v2242_v57 }
  0x73   :  { %1102 = vmatmul.bf16.gmra.mxu2 %v2179_v60  ;;  %v2191_v8 = vor.u32 %v2563_v4, %v2190_v3  ;;  %v2612_v60 = vld [vmem:[%s2823_s10 + $0x1e4] sm:$0xf]  ;;  %v2247_v4 = vor.u32 %v2576_v59, %v2244_v62  ;;  %v2271_v59 = vor.u32 %v2582_v45, %v2268_v48  ;;  %v2590_v45 = vld [vmem:[%s2823_s10 + $0x130] sm:$0xf0]  ;;  %v161_v48 = vld [vmem:[%s4624_s4 + $0x38] sm:$0xff] }
  0x74   :  { %v2391_v2 = vor.u32 %v2612_v60, %v2388_v61  ;;  %v2275_v60 = vor.u32 %v2584_v50, %v2274_v49 }
  0x76   :  { %2641 = vmatpush.bf16.msra.mxu3 %v2970_v6  ;;  %v2399_v6 = vor.u32 %v2616_v0, %v2398_v63  ;;  %v2250_v63 = vld [vmem:[%s2823_s10 + $0xc8] sm:$0xf]  ;;  %v2578_v0 = vld [vmem:[%s2823_s10 + $0xd0] sm:$0xf0] }
  0x7a   :  { %2642 = vmatpush.bf16.msra.mxu3 %v2977_v9  ;;  %v2194_v9 = vld [vmem:[%s2823_s10 + $0x60] sm:$0xf] }
  0x7b   :  { %v2195_v17 = vor.u32 %v2565_v10, %v2194_v9  ;;  %v154_v9 = vld [vmem:[%s4624_s4] sm:$0xff] }
  0x7e   :  { %2643 = vmatpush.bf16.msra.mxu3 %v2983_v12  ;;  %v2619_v12 = vld [vmem:[%s2823_s10 + $0x218] sm:$0xf0] }
  0x81   :  { %849 = vmatmul.bf16.gmra.mxu0 %v2183_v5  ;;  %939 = vmatmul.bf16.gmra.mxu3 %v2399_v6  ;;  %v2251_v5 = vor.u32 %v2578_v0, %v2250_v63 }
  0x82   :  { %2644 = vmatpush.bf16.msra.mxu3 %v2989_v15  ;;  %978 = vmatmul.bf16.gmra.mxu1 %v2187_v7  ;;  %v2202_v15 = vld [vmem:[%s2823_s10 + $0x68] sm:$0xf] }
  0x83   :  { %1107 = vmatmul.bf16.gmra.mxu2 %v2191_v8  ;;  %v2203_v20 = vor.u32 %v2566_v16, %v2202_v15  ;;  %v2254_v15 = vld [vmem:[%s2823_s10 + $0xd8] sm:$0xf]  ;;  %v2580_v16 = vld [vmem:[%s2823_s10 + $0xe0] sm:$0xf0] }
  0x86   :  { %2645 = vmatpush.bf16.msra.mxu3 %v2995_v18  ;;  %v2411_v18 = vor.u32 %v2619_v12, %v2410_v11 }
  0x8a   :  { %2646 = vmatpush.bf16.msra.mxu3 %v3001_v21  ;;  %v2206_v21 = vld [vmem:[%s2823_s10 + $0x78] sm:$0xf] }
  0x8b   :  { %v2207_v29 = vor.u32 %v2568_v22, %v2206_v21  ;;  %v2262_v21 = vld [vmem:[%s2823_s10 + $0xe0] sm:$0xf]  ;;  %v2581_v22 = vld [vmem:[%s2823_s10 + $0xe8] sm:$0xf0] }
  0x8e   :  { %2647 = vmatpush.bf16.msra.mxu3 %v3009_v27  ;;  %v2214_v27 = vld [vmem:[%s2823_s10 + $0x80] sm:$0xf] }
  0x8f   :  { %v2215_v32 = vor.u32 %v2569_v28, %v2214_v27  ;;  %v2255_v27 = vor.u32 %v2580_v16, %v2254_v15  ;;  %v2587_v15 = vld [vmem:[%s2823_s10 + $0x118] sm:$0xf0] }
  0x91   :  { %854 = vmatmul.bf16.gmra.mxu0 %v2195_v17  ;;  %944 = vmatmul.bf16.gmra.mxu3 %v2411_v18  ;;  %v2579_v17 = vld [vmem:[%s2823_s10 + $0xdc] sm:$0xf] }
  0x92   :  { %983 = vmatmul.bf16.gmra.mxu1 %v2199_v19  ;;  %v2615_v18 = vld [vmem:[%s2823_s10 + $0x1fc] sm:$0xf]  ;;  %v2400_v19 = vld [vmem:[%s2823_s10 + $0x204] sm:$0xf0] }
  0x93   :  { %1112 = vmatmul.bf16.gmra.mxu2 %v2203_v20  ;;  %v2256_v20 = vld [vmem:[%s2823_s10 + $0xe4] sm:$0xf0]  ;;  %v2403_v28 = vor.u32 %v2615_v18, %v2400_v19 }
  0x94   :  { %v159_v18 = vld [vmem:[%s4624_s4 + $0x28] sm:$0xff] }
  0xa1   :  { %859 = vmatmul.bf16.gmra.mxu0 %v2207_v29  ;;  %949 = vmatmul.bf16.gmra.mxu3 %v2423_v30 }
  0xa2   :  { %988 = vmatmul.bf16.gmra.mxu1 %v2211_v31  ;;  %v2259_v31 = vor.u32 %v2579_v17, %v2256_v20 }
  0xa3   :  { %1117 = vmatmul.bf16.gmra.mxu2 %v2215_v32  ;;  %v2263_v32 = vor.u32 %v2581_v22, %v2262_v21 }
  0xb1   :  { %864 = vmatmul.bf16.gmra.mxu0 %v2219_v41  ;;  %1053 = vmatmul.bf16.vlgmr.msrb.gmra.mxu3 %v2367_v42 }
  0xb2   :  { %993 = vmatmul.bf16.gmra.mxu1 %v2223_v43  ;;  %v2266_v43 = vld [vmem:[%s2823_s10 + $0xf0] sm:$0xf] }
  0xb3   :  { %1122 = vmatmul.bf16.gmra.mxu2 %v2227_v44  ;;  %v2583_v44 = vld [vmem:[%s2823_s10 + $0xf8] sm:$0xf0] }
  0xc1   :  { %869 = vmatmul.bf16.gmra.mxu0 %v2231_v53  ;;  %1058 = vmatmul.bf16.gmra.mxu3 %v2379_v54  ;;  %v157_v53 = vld [vmem:[%s4624_s4 + $0x18] sm:$0xff] }
  0xc2   :  { %998 = vmatmul.bf16.gmra.mxu1 %v2235_v55  ;;  %v2267_v55 = vor.u32 %v2583_v44, %v2266_v43  ;;  %v2292_v43 = vld [vmem:[%s2823_s10 + $0x12c] sm:$0xf0]  ;;  %v2298_v44 = vld [vmem:[%s2823_s10 + $0x128] sm:$0xf] }
  0xc3   :  { %1127 = vmatmul.bf16.gmra.mxu2 %v2239_v56  ;;  %v2415_v56 = vor.u32 %v2618_v46, %v2412_v47 }
  0xce   :  { %v835_v3 = vpop.f32.mrf.mxu0 }
  0xcf   :  { %v964_v6 = vpop.f32.mrf.mxu1 }
  0xd0   :  { %v965_v7 = vadd.f32 %v964_v6, %v835_v3 }
  0xd1   :  { %874 = vmatmul.bf16.gmra.mxu0 %v2243_v1  ;;  %1063 = vmatmul.bf16.gmra.mxu3 %v2391_v2  ;;  %v158_v1 = vld [vmem:[%s4624_s4 + $0x20] sm:$0xff] }
  0xd2   :  { %1003 = vmatmul.bf16.gmra.mxu1 %v2247_v4 }
  0xd3   :  { %1132 = vmatmul.bf16.gmra.mxu2 %v2251_v5 }
  0xd4   :  { %v3092_v8 = vpop.f32.mrf.mxu3 }
  0xd6   :  { %v1093_v10 = vpop.f32.mrf.mxu2  ;;  %v837_v12 = vpop.f32.mrf.mxu0 }
  0xd7   :  { %v1094_v11 = vadd.f32 %v1093_v10, %v965_v7  ;;  %v966_v13 = vpop.f32.mrf.mxu1  ;;  %v2278_v7 = vld [vmem:[%s2823_s10 + $0x108] sm:$0xf]  ;;  %v2585_v10 = vld [vmem:[%s2823_s10 + $0x10c] sm:$0xf] }
  0xd8   :  { %v967_v23 = vadd.f32 %v966_v13, %v837_v12  ;;  %v2424_v12 = vld [vmem:[%s2823_s10 + $0x234] sm:$0xf0] }
  0xd9   :  { %v1213_v14 = vadd.f32 %v1094_v11, %v154_v9  ;;  %v2586_v9 = vld [vmem:[%s2823_s10 + $0x110] sm:$0xf0]  ;;  %v2621_v11 = vld [vmem:[%s2823_s10 + $0x22c] sm:$0xf]  ;;  %v2280_v13 = vld [vmem:[%s2823_s10 + $0x114] sm:$0xf0] }
  0xda   :  { %v2279_v20 = vor.u32 %v2586_v9, %v2278_v7  ;;  %v2427_v21 = vor.u32 %v2621_v11, %v2424_v12  ;;  %v2382_v7 = vld [vmem:[%s2823_s10 + $0x1d0] sm:$0xf]  ;;  %v2611_v9 = vld [vmem:[%s2823_s10 + $0x1d8] sm:$0xf0]  ;;  %v2310_v11 = vld [vmem:[%s2823_s10 + $0x140] sm:$0xf] }
  0xdb   :  { %1261 = vst [vmem:[%s4624_s4] sm:$0xff] %v1213_v14  ;;  %v2286_v14 = vld [vmem:[%s2823_s10 + $0x110] sm:$0xf]  ;;  %v2593_v12 = vld [vmem:[%s2823_s10 + $0x148] sm:$0xf0] }
  0xdc   :  { %v3108_v24 = vpop.f32.mrf.mxu3 }
  0xde   :  { %v1095_v26 = vpop.f32.mrf.mxu2  ;;  %v840_v30 = vpop.f32.mrf.mxu0 }
  0xdf   :  { %v1096_v29 = vadd.f32 %v1095_v26, %v967_v23  ;;  %v969_v33 = vpop.f32.mrf.mxu1  ;;  %v2287_v26 = vor.u32 %v2587_v15, %v2286_v14  ;;  %v163_v15 = vld [vmem:[%s4624_s4 + $0x48] sm:$0xff] }
  0xe0   :  { %v970_v35 = vadd.f32 %v969_v33, %v840_v30 }
  0xe1   :  { %v1214_v34 = vadd.f32 %v1096_v29, %v155_v25  ;;  %879 = vmatmul.bf16.gmra.mxu0 %v2255_v27  ;;  %1068 = vmatmul.bf16.gmra.mxu3 %v2403_v28  ;;  %v2283_v25 = vor.u32 %v2585_v10, %v2280_v13  ;;  %v2304_v10 = vld [vmem:[%s2823_s10 + $0x144] sm:$0xf0] }
  0xe2   :  { %1008 = vmatmul.bf16.gmra.mxu1 %v2259_v31  ;;  %v160_v31 = vld [vmem:[%s4624_s4 + $0x30] sm:$0xff] }
  0xe3   :  { %1262 = vst [vmem:[%s4624_s4 + $0x8] sm:$0xff] %v1214_v34  ;;  %1137 = vmatmul.bf16.gmra.mxu2 %v2263_v32 }
  0xe4   :  { %v3116_v36 = vpop.f32.mrf.mxu3 }
  0xe6   :  { %v1098_v38 = vpop.f32.mrf.mxu2  ;;  %v842_v40 = vpop.f32.mrf.mxu0 }
  0xe7   :  { %v1099_v39 = vadd.f32 %v1098_v38, %v970_v35  ;;  %v971_v41 = vpop.f32.mrf.mxu1  ;;  %v2290_v38 = vld [vmem:[%s2823_s10 + $0x120] sm:$0xf] }
  0xe8   :  { %v972_v51 = vadd.f32 %v971_v41, %v842_v40  ;;  %v2588_v40 = vld [vmem:[%s2823_s10 + $0x124] sm:$0xf]  ;;  %v2370_v41 = vld [vmem:[%s2823_s10 + $0x1b8] sm:$0xf] }
  0xe9   :  { %v1215_v42 = vadd.f32 %v1099_v39, %v156_v37  ;;  %v2589_v39 = vld [vmem:[%s2823_s10 + $0x128] sm:$0xf0] }
  0xea   :  { %v2291_v50 = vor.u32 %v2589_v39, %v2290_v38  ;;  %v2595_v38 = vld [vmem:[%s2823_s10 + $0x158] sm:$0xf0]  ;;  %v2594_v39 = vld [vmem:[%s2823_s10 + $0x154] sm:$0xf] }
  0xeb   :  { %1263 = vst [vmem:[%s4624_s4 + $0x10] sm:$0xff] %v1215_v42  ;;  %v2608_v42 = vld [vmem:[%s2823_s10 + $0x1c0] sm:$0xf0] }
  0xec   :  { %v3132_v52 = vpop.f32.mrf.mxu3 }
  0xee   :  { %v1100_v54 = vpop.f32.mrf.mxu2  ;;  %v845_v58 = vpop.f32.mrf.mxu0 }
  0xef   :  { %v1101_v57 = vadd.f32 %v1100_v54, %v972_v51  ;;  %v974_v61 = vpop.f32.mrf.mxu1  ;;  %v2371_v51 = vor.u32 %v2608_v42, %v2370_v41  ;;  %v2614_v41 = vld [vmem:[%s2823_s10 + $0x1f0] sm:$0xf0]  ;;  %v2316_v42 = vld [vmem:[%s2823_s10 + $0x15c] sm:$0xf0] }
  0xf0   :  { %v975_v63 = vadd.f32 %v974_v61, %v845_v58  ;;  %v162_v61 = vld [vmem:[%s4624_s4 + $0x40] sm:$0xff] }
  0xf1   :  { %v1216_v62 = vadd.f32 %v1101_v57, %v157_v53  ;;  %884 = vmatmul.bf16.gmra.mxu0 %v2267_v55  ;;  %1073 = vmatmul.bf16.gmra.mxu3 %v2415_v56  ;;  %v2295_v55 = vor.u32 %v2588_v40, %v2292_v43  ;;  %v2299_v56 = vor.u32 %v2590_v45, %v2298_v44  ;;  %v2394_v40 = vld [vmem:[%s2823_s10 + $0x1e8] sm:$0xf]  ;;  %v2322_v43 = vld [vmem:[%s2823_s10 + $0x158] sm:$0xf]  ;;  %v2596_v44 = vld [vmem:[%s2823_s10 + $0x160] sm:$0xf0] }
  0xf2   :  { %1013 = vmatmul.bf16.gmra.mxu1 %v2271_v59 }
  0xf3   :  { %1264 = vst [vmem:[%s4624_s4 + $0x18] sm:$0xff] %v1216_v62  ;;  %1142 = vmatmul.bf16.gmra.mxu2 %v2275_v60 }
  0xf4   :  { %v3140_v0 = vpop.f32.mrf.mxu3 }
  0xf6   :  { %v1103_v2 = vpop.f32.mrf.mxu2  ;;  %v847_v4 = vpop.f32.mrf.mxu0 }
  0xf7   :  { %v1104_v3 = vadd.f32 %v1103_v2, %v975_v63  ;;  %v976_v5 = vpop.f32.mrf.mxu1 }
  0xf8   :  { %v977_v16 = vadd.f32 %v976_v5, %v847_v4  ;;  %v2302_v4 = vld [vmem:[%s2823_s10 + $0x138] sm:$0xf]  ;;  %v2592_v5 = vld [vmem:[%s2823_s10 + $0x140] sm:$0xf0] }
  0xf9   :  { %v1217_v6 = vadd.f32 %v1104_v3, %v158_v1 }
  0xfb   :  { %1265 = vst [vmem:[%s4624_s4 + $0x20] sm:$0xff] %v1217_v6  ;;  %v2591_v6 = vld [vmem:[%s2823_s10 + $0x13c] sm:$0xf] }
  0xfc   :  { %v3156_v17 = vpop.f32.mrf.mxu3 }
  0xfe   :  { %v1105_v19 = vpop.f32.mrf.mxu2  ;;  %v850_v23 = vpop.f32.mrf.mxu0 }
  0xff   :  { %v1106_v22 = vadd.f32 %v1105_v19, %v977_v16  ;;  %v979_v27 = vpop.f32.mrf.mxu1  ;;  %v2383_v19 = vor.u32 %v2611_v9, %v2382_v7  ;;  %v2597_v7 = vld [vmem:[%s2823_s10 + $0x16c] sm:$0xf]  ;;  %v2406_v9 = vld [vmem:[%s2823_s10 + $0x200] sm:$0xf] }
 0x100   :  { %v980_v29 = vadd.f32 %v979_v27, %v850_v23  ;;  %v2311_v23 = vor.u32 %v2593_v12, %v2310_v11  ;;  %v2328_v11 = vld [vmem:[%s2823_s10 + $0x174] sm:$0xf0]  ;;  %v2334_v12 = vld [vmem:[%s2823_s10 + $0x170] sm:$0xf] }
 0x101   :  { %v1218_v28 = vadd.f32 %v1106_v22, %v159_v18  ;;  %889 = vmatmul.bf16.gmra.mxu0 %v2279_v20  ;;  %1078 = vmatmul.bf16.gmra.mxu3 %v2427_v21  ;;  %v2303_v18 = vor.u32 %v2592_v5, %v2302_v4  ;;  %v2307_v22 = vor.u32 %v2591_v6, %v2304_v10  ;;  %v2326_v5 = vld [vmem:[%s2823_s10 + $0x168] sm:$0xf]  ;;  %v2598_v6 = vld [vmem:[%s2823_s10 + $0x170] sm:$0xf0]  ;;  %v2617_v10 = vld [vmem:[%s2823_s10 + $0x208] sm:$0xf0] }
 0x102   :  { %1018 = vmatmul.bf16.gmra.mxu1 %v2283_v25 }
 0x103   :  { %1266 = vst [vmem:[%s4624_s4 + $0x28] sm:$0xff] %v1218_v28  ;;  %1147 = vmatmul.bf16.gmra.mxu2 %v2287_v26 }
 0x104   :  { %v3164_v30 = vpop.f32.mrf.mxu3 }
 0x106   :  { %v1108_v32 = vpop.f32.mrf.mxu2  ;;  %v852_v34 = vpop.f32.mrf.mxu0 }
 0x107   :  { %v1109_v33 = vadd.f32 %v1108_v32, %v980_v29  ;;  %v981_v35 = vpop.f32.mrf.mxu1  ;;  %v164_v29 = vld [vmem:[%s4624_s4 + $0x50] sm:$0xff] }
 0x108   :  { %v982_v46 = vadd.f32 %v981_v35, %v852_v34 }
 0x109   :  { %v1219_v37 = vadd.f32 %v1109_v33, %v160_v31 }
 0x10b   :  { %1267 = vst [vmem:[%s4624_s4 + $0x30] sm:$0xff] %v1219_v37  ;;  %v2314_v37 = vld [vmem:[%s2823_s10 + $0x150] sm:$0xf] }
 0x10c   :  { %v3180_v47 = vpop.f32.mrf.mxu3 }
 0x10e   :  { %v1110_v49 = vpop.f32.mrf.mxu2  ;;  %v855_v54 = vpop.f32.mrf.mxu0 }
 0x10f   :  { %v1111_v53 = vadd.f32 %v1110_v49, %v982_v46  ;;  %v984_v57 = vpop.f32.mrf.mxu1 }
 0x110   :  { %v985_v59 = vadd.f32 %v984_v57, %v855_v54 }
 0x111   :  { %v1220_v58 = vadd.f32 %v1111_v53, %v161_v48  ;;  %894 = vmatmul.bf16.gmra.mxu0 %v2291_v50  ;;  %1182 = vmatmul.bf16.vlgmr.msra.gmra.mxu3 %v2371_v51  ;;  %v165_v48 = vld [vmem:[%s4624_s4 + $0x58] sm:$0xff]  ;;  %v2315_v50 = vor.u32 %v2595_v38, %v2314_v37  ;;  %v2395_v51 = vor.u32 %v2614_v41, %v2394_v40  ;;  %v2338_v40 = vld [vmem:[%s2823_s10 + $0x180] sm:$0xf]  ;;  %v2601_v41 = vld [vmem:[%s2823_s10 + $0x188] sm:$0xf0] }
 0x112   :  { %1023 = vmatmul.bf16.gmra.mxu1 %v2295_v55  ;;  %v2319_v55 = vor.u32 %v2594_v39, %v2316_v42  ;;  %v2600_v42 = vld [vmem:[%s2823_s10 + $0x184] sm:$0xf] }
 0x113   :  { %1268 = vst [vmem:[%s4624_s4 + $0x38] sm:$0xff] %v1220_v58  ;;  %1152 = vmatmul.bf16.gmra.mxu2 %v2299_v56  ;;  %v2323_v56 = vor.u32 %v2596_v44, %v2322_v43  ;;  %v2418_v43 = vld [vmem:[%s2823_s10 + $0x218] sm:$0xf]  ;;  %v2620_v44 = vld [vmem:[%s2823_s10 + $0x220] sm:$0xf0] }
 0x114   :  { %v3188_v60 = vpop.f32.mrf.mxu3 }
 0x116   :  { %v1113_v62 = vpop.f32.mrf.mxu2  ;;  %v857_v1 = vpop.f32.mrf.mxu0 }
 0x117   :  { %v1114_v63 = vadd.f32 %v1113_v62, %v985_v59  ;;  %v986_v2 = vpop.f32.mrf.mxu1  ;;  %v166_v62 = vld [vmem:[%s4624_s4 + $0x60] sm:$0xff] }
 0x118   :  { %v987_v13 = vadd.f32 %v986_v2, %v857_v1 }
 0x119   :  { %v1221_v3 = vadd.f32 %v1114_v63, %v162_v61 }
 0x11b   :  { %1269 = vst [vmem:[%s4624_s4 + $0x40] sm:$0xff] %v1221_v3 }
 0x11c   :  { %v3204_v14 = vpop.f32.mrf.mxu3 }
 0x11e   :  { %v1115_v16 = vpop.f32.mrf.mxu2  ;;  %v860_v21 = vpop.f32.mrf.mxu0 }
 0x11f   :  { %v1116_v20 = vadd.f32 %v1115_v16, %v987_v13  ;;  %v989_v25 = vpop.f32.mrf.mxu1  ;;  %v2599_v13 = vld [vmem:[%s2823_s10 + $0x178] sm:$0xf0] }
 0x120   :  { %v990_v27 = vadd.f32 %v989_v25, %v860_v21  ;;  %v2407_v21 = vor.u32 %v2617_v10, %v2406_v9  ;;  %v2331_v25 = vor.u32 %v2597_v7, %v2328_v11  ;;  %v2350_v11 = vld [vmem:[%s2823_s10 + $0x198] sm:$0xf] }
 0x121   :  { %v1222_v26 = vadd.f32 %v1116_v20, %v163_v15  ;;  %899 = vmatmul.bf16.gmra.mxu0 %v2303_v18  ;;  %1187 = vmatmul.bf16.gmra.mxu3 %v2383_v19  ;;  %v167_v18 = vld [vmem:[%s4624_s4 + $0x68] sm:$0xff]  ;;  %v2327_v20 = vor.u32 %v2598_v6, %v2326_v5 }
 0x122   :  { %1028 = vmatmul.bf16.gmra.mxu1 %v2307_v22 }
 0x123   :  { %1270 = vst [vmem:[%s4624_s4 + $0x48] sm:$0xff] %v1222_v26  ;;  %1157 = vmatmul.bf16.gmra.mxu2 %v2311_v23  ;;  %v2335_v26 = vor.u32 %v2599_v13, %v2334_v12  ;;  %v2604_v12 = vld [vmem:[%s2823_s10 + $0x1a0] sm:$0xf0]  ;;  %v2603_v13 = vld [vmem:[%s2823_s10 + $0x19c] sm:$0xf] }
 0x124   :  { %v3212_v28 = vpop.f32.mrf.mxu3 }
 0x126   :  { %v1118_v31 = vpop.f32.mrf.mxu2  ;;  %v862_v33 = vpop.f32.mrf.mxu0 }
 0x127   :  { %v1119_v32 = vadd.f32 %v1118_v31, %v990_v27  ;;  %v991_v34 = vpop.f32.mrf.mxu1 }
 0x128   :  { %v992_v45 = vadd.f32 %v991_v34, %v862_v33  ;;  %v168_v33 = vld [vmem:[%s4624_s4 + $0x70] sm:$0xff] }
 0x129   :  { %v1223_v35 = vadd.f32 %v1119_v32, %v164_v29 }
 0x12b   :  { %1271 = vst [vmem:[%s4624_s4 + $0x50] sm:$0xff] %v1223_v35 }
 0x12c   :  { %v3228_v46 = vpop.f32.mrf.mxu3 }
 0x12e   :  { %v1120_v49 = vpop.f32.mrf.mxu2  ;;  %v865_v54 = vpop.f32.mrf.mxu0 }
 0x12f   :  { %v1121_v53 = vadd.f32 %v1120_v49, %v992_v45  ;;  %v994_v57 = vpop.f32.mrf.mxu1  ;;  %v2340_v45 = vld [vmem:[%s2823_s10 + $0x18c] sm:$0xf0]  ;;  %v2602_v49 = vld [vmem:[%s2823_s10 + $0x190] sm:$0xf0] }
 0x130   :  { %v995_v59 = vadd.f32 %v994_v57, %v865_v54 }
 0x131   :  { %v1224_v58 = vadd.f32 %v1121_v53, %v165_v48  ;;  %904 = vmatmul.bf16.gmra.mxu0 %v2315_v50  ;;  %1192 = vmatmul.bf16.gmra.mxu3 %v2395_v51  ;;  %v2346_v48 = vld [vmem:[%s2823_s10 + $0x188] sm:$0xf]  ;;  %v169_v53 = vld [vmem:[%s4624_s4 + $0x78] sm:$0xff] }
 0x132   :  { %1033 = vmatmul.bf16.gmra.mxu1 %v2319_v55  ;;  %v2339_v55 = vor.u32 %v2601_v41, %v2338_v40  ;;  %v172_v41 = vld [vmem:[%s4624_s4 + $0x90] sm:$0xff] }
 0x133   :  { %1272 = vst [vmem:[%s4624_s4 + $0x58] sm:$0xff] %v1224_v58  ;;  %1162 = vmatmul.bf16.gmra.mxu2 %v2323_v56  ;;  %v2419_v56 = vor.u32 %v2620_v44, %v2418_v43 }
 0x134   :  { %v3236_v61 = vpop.f32.mrf.mxu3 }
 0x136   :  { %v1123_v63 = vpop.f32.mrf.mxu2  ;;  %v867_v2 = vpop.f32.mrf.mxu0 }
 0x137   :  { %v1124_v1 = vadd.f32 %v1123_v63, %v995_v59  ;;  %v996_v3 = vpop.f32.mrf.mxu1  ;;  %v2343_v59 = vor.u32 %v2600_v42, %v2340_v45 }
 0x138   :  { %v997_v15 = vadd.f32 %v996_v3, %v867_v2 }
 0x139   :  { %v1225_v4 = vadd.f32 %v1124_v1, %v166_v62  ;;  %v2347_v62 = vor.u32 %v2602_v49, %v2346_v48 }
 0x13b   :  { %1273 = vst [vmem:[%s4624_s4 + $0x60] sm:$0xff] %v1225_v4  ;;  %v170_v4 = vld [vmem:[%s4624_s4 + $0x80] sm:$0xff] }
 0x13c   :  { %v3252_v16 = vpop.f32.mrf.mxu3 }
 0x13e   :  { %v1125_v19 = vpop.f32.mrf.mxu2  ;;  %v870_v23 = vpop.f32.mrf.mxu0 }
 0x13f   :  { %v1126_v22 = vadd.f32 %v1125_v19, %v997_v15  ;;  %v999_v27 = vpop.f32.mrf.mxu1  ;;  %v2430_v15 = vld [vmem:[%s2823_s10 + $0x230] sm:$0xf]  ;;  %v2352_v19 = vld [vmem:[%s2823_s10 + $0x1a4] sm:$0xf0] }
 0x140   :  { %v1000_v31 = vadd.f32 %v999_v27, %v870_v23  ;;  %v2351_v27 = vor.u32 %v2604_v12, %v2350_v11 }
 0x141   :  { %v1226_v29 = vadd.f32 %v1126_v22, %v167_v18  ;;  %909 = vmatmul.bf16.gmra.mxu0 %v2327_v20  ;;  %1197 = vmatmul.bf16.gmra.mxu3 %v2407_v21  ;;  %v2623_v18 = vld [vmem:[%s2823_s10 + $0x238] sm:$0xf0]  ;;  %v2358_v20 = vld [vmem:[%s2823_s10 + $0x1a0] sm:$0xf]  ;;  %v2605_v21 = vld [vmem:[%s2823_s10 + $0x1a8] sm:$0xf0] }
 0x142   :  { %1038 = vmatmul.bf16.gmra.mxu1 %v2331_v25  ;;  %v171_v25 = vld [vmem:[%s4624_s4 + $0x88] sm:$0xff] }
 0x143   :  { %1274 = vst [vmem:[%s4624_s4 + $0x68] sm:$0xff] %v1226_v29  ;;  %1167 = vmatmul.bf16.gmra.mxu2 %v2335_v26  ;;  %v2431_v29 = vor.u32 %v2623_v18, %v2430_v15 }
 0x144   :  { %v3260_v32 = vpop.f32.mrf.mxu3 }
 0x146   :  { %v1128_v34 = vpop.f32.mrf.mxu2  ;;  %v872_v37 = vpop.f32.mrf.mxu0 }
 0x147   :  { %v1129_v35 = vadd.f32 %v1128_v34, %v1000_v31  ;;  %v1001_v38 = vpop.f32.mrf.mxu1  ;;  %v2355_v34 = vor.u32 %v2603_v13, %v2352_v19 }
 0x148   :  { %v1002_v50 = vadd.f32 %v1001_v38, %v872_v37 }
 0x149   :  { %v1227_v39 = vadd.f32 %v1129_v35, %v168_v33  ;;  %v2359_v35 = vor.u32 %v2605_v21, %v2358_v20  ;;  %v176_v21 = vld [vmem:[%s4624_s4 + $0xb0] sm:$0xff] }
 0x14b   :  { %1275 = vst [vmem:[%s4624_s4 + $0x70] sm:$0xff] %v1227_v39 }
 0x14c   :  { %v3276_v51 = vpop.f32.mrf.mxu3 }
 0x14e   :  { %v1130_v54 = vpop.f32.mrf.mxu2  ;;  %v875_v58 = vpop.f32.mrf.mxu0 }
 0x14f   :  { %v1131_v57 = vadd.f32 %v1130_v54, %v1002_v50  ;;  %v1004_v63 = vpop.f32.mrf.mxu1 }
 0x150   :  { %v1005_v2 = vadd.f32 %v1004_v63, %v875_v58  ;;  %v174_v63 = vld [vmem:[%s4624_s4 + $0xa0] sm:$0xff] }
 0x151   :  { %v1228_v1 = vadd.f32 %v1131_v57, %v169_v53  ;;  %914 = vmatmul.bf16.gmra.mxu0 %v2339_v55  ;;  %1202 = vmatmul.bf16.gmra.mxu3 %v2419_v56  ;;  %v173_v53 = vld [vmem:[%s4624_s4 + $0x98] sm:$0xff] }
 0x152   :  { %1043 = vmatmul.bf16.gmra.mxu1 %v2343_v59 }
 0x153   :  { %1276 = vst [vmem:[%s4624_s4 + $0x78] sm:$0xff] %v1228_v1  ;;  %1172 = vmatmul.bf16.gmra.mxu2 %v2347_v62 }
 0x154   :  { %v3284_v3 = vpop.f32.mrf.mxu3 }
 0x156   :  { %v1133_v5 = vpop.f32.mrf.mxu2  ;;  %v877_v7 = vpop.f32.mrf.mxu0 }
 0x157   :  { %v1134_v6 = vadd.f32 %v1133_v5, %v1005_v2  ;;  %v1006_v9 = vpop.f32.mrf.mxu1 }
 0x158   :  { %v1007_v22 = vadd.f32 %v1006_v9, %v877_v7 }
 0x159   :  { %v1229_v10 = vadd.f32 %v1134_v6, %v170_v4 }
 0x15b   :  { %1277 = vst [vmem:[%s4624_s4 + $0x80] sm:$0xff] %v1229_v10  ;;  %v175_v10 = vld [vmem:[%s4624_s4 + $0xa8] sm:$0xff] }
 0x15c   :  { %v3300_v23 = vpop.f32.mrf.mxu3 }
 0x15e   :  { %v1135_v26 = vpop.f32.mrf.mxu2  ;;  %v880_v33 = vpop.f32.mrf.mxu0 }
 0x15f   :  { %v1136_v31 = vadd.f32 %v1135_v26, %v1007_v22  ;;  %v1009_v37 = vpop.f32.mrf.mxu1 }
 0x160   :  { %v1010_v39 = vadd.f32 %v1009_v37, %v880_v33 }
 0x161   :  { %v1230_v38 = vadd.f32 %v1136_v31, %v171_v25  ;;  %919 = vmatmul.bf16.gmra.mxu0 %v2351_v27  ;;  %1207 = vmatmul.bf16.gmra.mxu3 %v2431_v29 }
 0x162   :  { %1048 = vmatmul.bf16.gmra.mxu1 %v2355_v34  ;;  %v177_v34 = vld [vmem:[%s4624_s4 + $0xb8] sm:$0xff] }
 0x163   :  { %1278 = vst [vmem:[%s4624_s4 + $0x88] sm:$0xff] %v1230_v38  ;;  %1177 = vmatmul.bf16.gmra.mxu2 %v2359_v35 }
 0x164   :  { %v3308_v40 = vpop.f32.mrf.mxu3 }
 0x166   :  { %v1138_v42 = vpop.f32.mrf.mxu2  ;;  %v882_v44 = vpop.f32.mrf.mxu0 }
 0x167   :  { %v1139_v43 = vadd.f32 %v1138_v42, %v1010_v39  ;;  %v1011_v45 = vpop.f32.mrf.mxu1 }
 0x168   :  { %v1012_v49 = vadd.f32 %v1011_v45, %v882_v44  ;;  %v190_v44 = vld [vmem:[%s4624_s4 + $0x120] sm:$0xff] }
 0x169   :  { %v1231_v48 = vadd.f32 %v1139_v43, %v172_v41  ;;  %v1055_v43 = vadd.f32 %v3236_v61, %v3092_v8  ;;  %v1057_v8 = vadd.f32 %v3252_v16, %v3108_v24  ;;  %v1060_v16 = vadd.f32 %v3260_v32, %v3116_v36 }
 0x16a   :  { %v1062_v36 = vadd.f32 %v3276_v51, %v3132_v52  ;;  %v1065_v51 = vadd.f32 %v3284_v3, %v3140_v0  ;;  %v1067_v0 = vadd.f32 %v3300_v23, %v3156_v17  ;;  %v1070_v23 = vadd.f32 %v3308_v40, %v3164_v30 }
 0x16b   :  { %1279 = vst [vmem:[%s4624_s4 + $0x90] sm:$0xff] %v1231_v48  ;;  %v178_v48 = vld [vmem:[%s4624_s4 + $0xc0] sm:$0xff] }
 0x16c   :  { %v3316_v50 = vpop.f32.mrf.mxu3 }
 0x16d   :  { %v1072_v30 = vadd.f32 %v3316_v50, %v3180_v47 }
 0x16e   :  { %v1140_v54 = vpop.f32.mrf.mxu2  ;;  %v885_v56 = vpop.f32.mrf.mxu0 }
 0x16f   :  { %v1141_v55 = vadd.f32 %v1140_v54, %v1012_v49  ;;  %v1014_v57 = vpop.f32.mrf.mxu1 }
 0x170   :  { %v1015_v59 = vadd.f32 %v1014_v57, %v885_v56 }
 0x171   :  { %v1232_v58 = vadd.f32 %v1141_v55, %v173_v53 }
 0x173   :  { %1280 = vst [vmem:[%s4624_s4 + $0x98] sm:$0xff] %v1232_v58 }
 0x174   :  { %v3324_v62 = vpop.f32.mrf.mxu3 }
 0x175   :  { %v1075_v50 = vadd.f32 %v3324_v62, %v3188_v60 }
 0x176   :  { %v1143_v1 = vpop.f32.mrf.mxu2  ;;  %v887_v4 = vpop.f32.mrf.mxu0 }
 0x177   :  { %v1144_v2 = vadd.f32 %v1143_v1, %v1015_v59  ;;  %v1016_v5 = vpop.f32.mrf.mxu1  ;;  %v191_v59 = vld [vmem:[%s4624_s4 + $0x128] sm:$0xff] }
 0x178   :  { %v1017_v7 = vadd.f32 %v1016_v5, %v887_v4  ;;  %v179_v1 = vld [vmem:[%s4624_s4 + $0xc8] sm:$0xff] }
 0x179   :  { %v1233_v6 = vadd.f32 %v1144_v2, %v174_v63 }
 0x17b   :  { %1281 = vst [vmem:[%s4624_s4 + $0xa0] sm:$0xff] %v1233_v6 }
 0x17c   :  { %v3332_v9 = vpop.f32.mrf.mxu3 }
 0x17d   :  { %v1077_v60 = vadd.f32 %v3332_v9, %v3204_v14 }
 0x17e   :  { %v1145_v11 = vpop.f32.mrf.mxu2  ;;  %v890_v13 = vpop.f32.mrf.mxu0 }
 0x17f   :  { %v1146_v12 = vadd.f32 %v1145_v11, %v1017_v7  ;;  %v1019_v15 = vpop.f32.mrf.mxu1 }
 0x180   :  { %v1020_v19 = vadd.f32 %v1019_v15, %v890_v13  ;;  %v180_v15 = vld [vmem:[%s4624_s4 + $0xd0] sm:$0xff] }
 0x181   :  { %v1234_v18 = vadd.f32 %v1146_v12, %v175_v10  ;;  %v192_v12 = vld [vmem:[%s4624_s4 + $0x130] sm:$0xff] }
 0x183   :  { %1282 = vst [vmem:[%s4624_s4 + $0xa8] sm:$0xff] %v1234_v18 }
 0x184   :  { %v3340_v20 = vpop.f32.mrf.mxu3 }
 0x185   :  { %v1080_v9 = vadd.f32 %v3340_v20, %v3212_v28 }
 0x186   :  { %v1148_v22 = vpop.f32.mrf.mxu2  ;;  %v892_v26 = vpop.f32.mrf.mxu0 }
 0x187   :  { %v1149_v25 = vadd.f32 %v1148_v22, %v1020_v19  ;;  %v1021_v27 = vpop.f32.mrf.mxu1 }
 0x188   :  { %v1022_v31 = vadd.f32 %v1021_v27, %v892_v26 }
 0x189   :  { %v1235_v29 = vadd.f32 %v1149_v25, %v176_v21 }
 0x18b   :  { %1283 = vst [vmem:[%s4624_s4 + $0xb0] sm:$0xff] %v1235_v29  ;;  %v193_v29 = vld [vmem:[%s4624_s4 + $0x138] sm:$0xff] }
 0x18c   :  { %v3348_v33 = vpop.f32.mrf.mxu3 }
 0x18d   :  { %v1082_v20 = vadd.f32 %v3348_v33, %v3228_v46 }
 0x18e   :  { %v1150_v35 = vpop.f32.mrf.mxu2  ;;  %v895_v38 = vpop.f32.mrf.mxu0 }
 0x18f   :  { %v1151_v37 = vadd.f32 %v1150_v35, %v1022_v31  ;;  %v1024_v39 = vpop.f32.mrf.mxu1 }
 0x190   :  { %v1025_v42 = vadd.f32 %v1024_v39, %v895_v38 }
 0x191   :  { %v1236_v41 = vadd.f32 %v1151_v37, %v177_v34  ;;  %v181_v34 = vld [vmem:[%s4624_s4 + $0xd8] sm:$0xff] }
 0x193   :  { %1284 = vst [vmem:[%s4624_s4 + $0xb8] sm:$0xff] %v1236_v41 }
 0x194   :  { %v1183_v45 = vpop.f32.mrf.mxu3 }
 0x195   :  { %v1184_v53 = vadd.f32 %v1183_v45, %v1055_v43 }
 0x196   :  { %v1153_v49 = vpop.f32.mrf.mxu2  ;;  %v897_v55 = vpop.f32.mrf.mxu0 }
 0x197   :  { %v1154_v54 = vadd.f32 %v1153_v49, %v1025_v42  ;;  %v1249_v56 = vadd.f32 %v1184_v53, %v190_v44  ;;  %v1026_v57 = vpop.f32.mrf.mxu1  ;;  %v194_v44 = vld [vmem:[%s4624_s4 + $0x140] sm:$0xff] }
 0x198   :  { %v1027_v61 = vadd.f32 %v1026_v57, %v897_v55 }
 0x199   :  { %v1237_v58 = vadd.f32 %v1154_v54, %v178_v48  ;;  %1297 = vst [vmem:[%s4624_s4 + $0x120] sm:$0xff] %v1249_v56  ;;  %v182_v48 = vld [vmem:[%s4624_s4 + $0xe0] sm:$0xff] }
 0x19b   :  { %1285 = vst [vmem:[%s4624_s4 + $0xc0] sm:$0xff] %v1237_v58 }
 0x19c   :  { %v1185_v63 = vpop.f32.mrf.mxu3 }
 0x19d   :  { %v1186_v4 = vadd.f32 %v1185_v63, %v1057_v8  ;;  %v195_v8 = vld [vmem:[%s4624_s4 + $0x148] sm:$0xff] }
 0x19e   :  { %v1155_v2 = vpop.f32.mrf.mxu2  ;;  %v900_v6 = vpop.f32.mrf.mxu0 }
 0x19f   :  { %v1156_v5 = vadd.f32 %v1155_v2, %v1027_v61  ;;  %v1250_v7 = vadd.f32 %v1186_v4, %v191_v59  ;;  %v1029_v10 = vpop.f32.mrf.mxu1  ;;  %v183_v59 = vld [vmem:[%s4624_s4 + $0xe8] sm:$0xff] }
 0x1a0   :  { %v1030_v24 = vadd.f32 %v1029_v10, %v900_v6  ;;  %v196_v10 = vld [vmem:[%s4624_s4 + $0x150] sm:$0xff] }
 0x1a1   :  { %v1238_v11 = vadd.f32 %v1156_v5, %v179_v1  ;;  %1298 = vst [vmem:[%s4624_s4 + $0x128] sm:$0xff] %v1250_v7 }
 0x1a3   :  { %1286 = vst [vmem:[%s4624_s4 + $0xc8] sm:$0xff] %v1238_v11 }
 0x1a4   :  { %v1188_v13 = vpop.f32.mrf.mxu3 }
 0x1a5   :  { %v1189_v19 = vadd.f32 %v1188_v13, %v1060_v16 }
 0x1a6   :  { %v1158_v18 = vpop.f32.mrf.mxu2  ;;  %v902_v22 = vpop.f32.mrf.mxu0 }
 0x1a7   :  { %v1159_v21 = vadd.f32 %v1158_v18, %v1030_v24  ;;  %v1251_v25 = vadd.f32 %v1189_v19, %v192_v12  ;;  %v1031_v26 = vpop.f32.mrf.mxu1  ;;  %v184_v24 = vld [vmem:[%s4624_s4 + $0xf0] sm:$0xff] }
 0x1a8   :  { %v1032_v32 = vadd.f32 %v1031_v26, %v902_v22  ;;  %v197_v22 = vld [vmem:[%s4624_s4 + $0x158] sm:$0xff] }
 0x1a9   :  { %v1239_v27 = vadd.f32 %v1159_v21, %v180_v15  ;;  %1299 = vst [vmem:[%s4624_s4 + $0x130] sm:$0xff] %v1251_v25  ;;  %v185_v26 = vld [vmem:[%s4624_s4 + $0xf8] sm:$0xff] }
 0x1ab   :  { %1287 = vst [vmem:[%s4624_s4 + $0xd0] sm:$0xff] %v1239_v27 }
 0x1ac   :  { %v1190_v31 = vpop.f32.mrf.mxu3 }
 0x1ad   :  { %v1191_v37 = vadd.f32 %v1190_v31, %v1062_v36 }
 0x1ae   :  { %v1160_v35 = vpop.f32.mrf.mxu2  ;;  %v905_v39 = vpop.f32.mrf.mxu0 }
 0x1af   :  { %v1161_v38 = vadd.f32 %v1160_v35, %v1032_v32  ;;  %v1252_v41 = vadd.f32 %v1191_v37, %v193_v29  ;;  %v1034_v42 = vpop.f32.mrf.mxu1  ;;  %v198_v37 = vld [vmem:[%s4624_s4 + $0x160] sm:$0xff] }
 0x1b0   :  { %v1035_v52 = vadd.f32 %v1034_v42, %v905_v39  ;;  %v186_v39 = vld [vmem:[%s4624_s4 + $0x100] sm:$0xff] }
 0x1b1   :  { %v1240_v43 = vadd.f32 %v1161_v38, %v181_v34  ;;  %1300 = vst [vmem:[%s4624_s4 + $0x138] sm:$0xff] %v1252_v41 }
 0x1b3   :  { %1288 = vst [vmem:[%s4624_s4 + $0xd8] sm:$0xff] %v1240_v43 }
 0x1b4   :  { %v1193_v45 = vpop.f32.mrf.mxu3 }
 0x1b5   :  { %v1194_v53 = vadd.f32 %v1193_v45, %v1065_v51 }
 0x1b6   :  { %v1163_v49 = vpop.f32.mrf.mxu2  ;;  %v907_v55 = vpop.f32.mrf.mxu0 }
 0x1b7   :  { %v1164_v54 = vadd.f32 %v1163_v49, %v1035_v52  ;;  %v1253_v56 = vadd.f32 %v1194_v53, %v194_v44  ;;  %v1036_v57 = vpop.f32.mrf.mxu1  ;;  %v187_v53 = vld [vmem:[%s4624_s4 + $0x108] sm:$0xff] }
 0x1b8   :  { %v1037_v3 = vadd.f32 %v1036_v57, %v907_v55 }
 0x1b9   :  { %v1241_v58 = vadd.f32 %v1164_v54, %v182_v48  ;;  %1301 = vst [vmem:[%s4624_s4 + $0x140] sm:$0xff] %v1253_v56  ;;  %v199_v48 = vld [vmem:[%s4624_s4 + $0x168] sm:$0xff] }
 0x1bb   :  { %1289 = vst [vmem:[%s4624_s4 + $0xe0] sm:$0xff] %v1241_v58 }
 0x1bc   :  { %v1195_v61 = vpop.f32.mrf.mxu3 }
 0x1bd   :  { %v1196_v1 = vadd.f32 %v1195_v61, %v1067_v0 }
 0x1be   :  { %v1165_v63 = vpop.f32.mrf.mxu2  ;;  %v910_v4 = vpop.f32.mrf.mxu0 }
 0x1bf   :  { %v1166_v2 = vadd.f32 %v1165_v63, %v1037_v3  ;;  %v1254_v5 = vadd.f32 %v1196_v1, %v195_v8  ;;  %v1039_v6 = vpop.f32.mrf.mxu1  ;;  %v200_v8 = vld [vmem:[%s4624_s4 + $0x170] sm:$0xff] }
 0x1c0   :  { %v1040_v17 = vadd.f32 %v1039_v6, %v910_v4 }
 0x1c1   :  { %v1242_v7 = vadd.f32 %v1166_v2, %v183_v59  ;;  %1302 = vst [vmem:[%s4624_s4 + $0x148] sm:$0xff] %v1254_v5  ;;  %v188_v59 = vld [vmem:[%s4624_s4 + $0x110] sm:$0xff] }
 0x1c3   :  { %1290 = vst [vmem:[%s4624_s4 + $0xe8] sm:$0xff] %v1242_v7 }
 0x1c4   :  { %v1198_v11 = vpop.f32.mrf.mxu3 }
 0x1c5   :  { %v1199_v12 = vadd.f32 %v1198_v11, %v1070_v23 }
 0x1c6   :  { %v1168_v16 = vpop.f32.mrf.mxu2  ;;  %v912_v15 = vpop.f32.mrf.mxu0 }
 0x1c7   :  { %v1169_v13 = vadd.f32 %v1168_v16, %v1040_v17  ;;  %v1255_v18 = vadd.f32 %v1199_v12, %v196_v10  ;;  %v1041_v19 = vpop.f32.mrf.mxu1  ;;  %v201_v17 = vld [vmem:[%s4624_s4 + $0x178] sm:$0xff] }
 0x1c8   :  { %v1042_v40 = vadd.f32 %v1041_v19, %v912_v15  ;;  %v189_v10 = vld [vmem:[%s4624_s4 + $0x118] sm:$0xff] }
 0x1c9   :  { %v1243_v21 = vadd.f32 %v1169_v13, %v184_v24  ;;  %1303 = vst [vmem:[%s4624_s4 + $0x150] sm:$0xff] %v1255_v18 }
 0x1cb   :  { %1291 = vst [vmem:[%s4624_s4 + $0xf0] sm:$0xff] %v1243_v21 }
 0x1cc   :  { %v1200_v25 = vpop.f32.mrf.mxu3 }
 0x1cd   :  { %v1201_v36 = vadd.f32 %v1200_v25, %v1072_v30 }
 0x1ce   :  { %v1170_v27 = vpop.f32.mrf.mxu2  ;;  %v915_v29 = vpop.f32.mrf.mxu0 }
 0x1cf   :  { %v1171_v32 = vadd.f32 %v1170_v27, %v1042_v40  ;;  %v1256_v31 = vadd.f32 %v1201_v36, %v197_v22  ;;  %v1044_v34 = vpop.f32.mrf.mxu1 }
 0x1d0   :  { %v1045_v47 = vadd.f32 %v1044_v34, %v915_v29 }
 0x1d1   :  { %v1244_v35 = vadd.f32 %v1171_v32, %v185_v26  ;;  %1304 = vst [vmem:[%s4624_s4 + $0x158] sm:$0xff] %v1256_v31 }
 0x1d3   :  { %1292 = vst [vmem:[%s4624_s4 + $0xf8] sm:$0xff] %v1244_v35 }
 0x1d4   :  { %v1203_v38 = vpop.f32.mrf.mxu3 }
 0x1d5   :  { %v1204_v42 = vadd.f32 %v1203_v38, %v1075_v50 }
 0x1d6   :  { %v1173_v41 = vpop.f32.mrf.mxu2  ;;  %v917_v52 = vpop.f32.mrf.mxu0 }
 0x1d7   :  { %v1174_v43 = vadd.f32 %v1173_v41, %v1045_v47  ;;  %v1257_v51 = vadd.f32 %v1204_v42, %v198_v37  ;;  %v1046_v44 = vpop.f32.mrf.mxu1 }
 0x1d8   :  { %v1047_v62 = vadd.f32 %v1046_v44, %v917_v52 }
 0x1d9   :  { %v1245_v45 = vadd.f32 %v1174_v43, %v186_v39  ;;  %1305 = vst [vmem:[%s4624_s4 + $0x160] sm:$0xff] %v1257_v51 }
 0x1db   :  { %1293 = vst [vmem:[%s4624_s4 + $0x100] sm:$0xff] %v1245_v45 }
 0x1dc   :  { %v1205_v49 = vpop.f32.mrf.mxu3 }
 0x1dd   :  { %v1206_v55 = vadd.f32 %v1205_v49, %v1077_v60 }
 0x1de   :  { %v1175_v54 = vpop.f32.mrf.mxu2  ;;  %v920_v58 = vpop.f32.mrf.mxu0 }
 0x1df   :  { %v1176_v56 = vadd.f32 %v1175_v54, %v1047_v62  ;;  %v1258_v57 = vadd.f32 %v1206_v55, %v199_v48  ;;  %v1049_v0 = vpop.f32.mrf.mxu1 }
 0x1e0   :  { %v1050_v14 = vadd.f32 %v1049_v0, %v920_v58 }
 0x1e1   :  { %v1246_v3 = vadd.f32 %v1176_v56, %v187_v53  ;;  %1306 = vst [vmem:[%s4624_s4 + $0x168] sm:$0xff] %v1258_v57 }
 0x1e3   :  { %1294 = vst [vmem:[%s4624_s4 + $0x108] sm:$0xff] %v1246_v3 }
 0x1e4   :  { %v1208_v61 = vpop.f32.mrf.mxu3 }
 0x1e5   :  { %v1209_v1 = vadd.f32 %v1208_v61, %v1080_v9 }
 0x1e6   :  { %v1178_v63 = vpop.f32.mrf.mxu2  ;;  %v922_v6 = vpop.f32.mrf.mxu0 }
 0x1e7   :  { %v1179_v2 = vadd.f32 %v1178_v63, %v1050_v14  ;;  %v1259_v4 = vadd.f32 %v1209_v1, %v200_v8  ;;  %v1051_v28 = vpop.f32.mrf.mxu1 }
 0x1e8   :  { %v1052_v7 = vadd.f32 %v1051_v28, %v922_v6 }
 0x1e9   :  { %v1247_v5 = vadd.f32 %v1179_v2, %v188_v59  ;;  %1307 = vst [vmem:[%s4624_s4 + $0x170] sm:$0xff] %v1259_v4 }
 0x1eb   :  { %1295 = vst [vmem:[%s4624_s4 + $0x110] sm:$0xff] %v1247_v5 }
 0x1ec   :  { %v1210_v23 = vpop.f32.mrf.mxu3 }
 0x1ed   :  { %v1211_v24 = vadd.f32 %v1210_v23, %v1082_v20 }
 0x1ee   :  { %v1180_v11 = vpop.f32.mrf.mxu2 }
 0x1ef   :  { %v1181_v16 = vadd.f32 %v1180_v11, %v1052_v7  ;;  %v1260_v12 = vadd.f32 %v1211_v24, %v201_v17 }
 0x1f1   :  { %v1248_v13 = vadd.f32 %v1181_v16, %v189_v10  ;;  %1308 = vst [vmem:[%s4624_s4 + $0x178] sm:$0xff] %v1260_v12 }
 0x1f3   :  { %1296 = vst [vmem:[%s4624_s4 + $0x118] sm:$0xff] %v1248_v13 }
 0x1f4 PF:  { %v3527_v46 = vld [vmem:[%s4624_s4 + $0x20] sm:$0xff]  ;;  %v3532_v33 = vld [vmem:[%s4624_s4 + $0x10] sm:$0xff]  ;;  %v3548_v30 = vld [vmem:[%s4624_s4 + $0x28] sm:$0xff] }
 0x1f5   :  { %v3537_v15 = vld [vmem:[%s4624_s4] sm:$0xff]  ;;  %v1364_v18 = vmul.f32 %v3527_v46, %v3527_v46  ;;  %v1362_v19 = vmul.f32 %v3532_v33, %v3532_v33  ;;  %v3553_v40 = vld [vmem:[%s4624_s4 + $0x18] sm:$0xff]  ;;  %v3558_v22 = vld [vmem:[%s4624_s4 + $0x8] sm:$0xff]  ;;  %v1365_v25 = vmul.f32 %v3548_v30, %v3548_v30 }
 0x1f6   :  { %v1360_v21 = vmul.f32 %v3537_v15, %v3537_v15  ;;  %v1363_v26 = vmul.f32 %v3553_v40, %v3553_v40  ;;  %v1361_v27 = vmul.f32 %v3558_v22, %v3558_v22  ;;  %v3569_v36 = vld [vmem:[%s4624_s4 + $0x40] sm:$0xff]  ;;  %v3574_v32 = vld [vmem:[%s4624_s4 + $0x38] sm:$0xff]  ;;  %v3579_v29 = vld [vmem:[%s4624_s4 + $0x30] sm:$0xff] }
 0x1f7   :  { %1416 = vadd.xlane.f32.xlu2 %v1364_v18  ;;  %1412 = vadd.xlane.f32.xlu1 %v1362_v19  ;;  %v1368_v31 = vmul.f32 %v3569_v36, %v3569_v36  ;;  %v1367_v34 = vmul.f32 %v3574_v32, %v3574_v32  ;;  %v1366_v35 = vmul.f32 %v3579_v29, %v3579_v29  ;;  %v3590_v47 = vld [vmem:[%s4624_s4 + $0x58] sm:$0xff]  ;;  %v3595_v50 = vld [vmem:[%s4624_s4 + $0x50] sm:$0xff]  ;;  %v3600_v37 = vld [vmem:[%s4624_s4 + $0x48] sm:$0xff] }
 0x1f8   :  { %1408 = vadd.xlane.f32.xlu0 %v1360_v21  ;;  %v1371_v38 = vmul.f32 %v3590_v47, %v3590_v47  ;;  %v1370_v39 = vmul.f32 %v3595_v50, %v3595_v50  ;;  %v1369_v41 = vmul.f32 %v3600_v37, %v3600_v37  ;;  %v3611_v42 = vld [vmem:[%s4624_s4 + $0x70] sm:$0xff]  ;;  %v3616_v43 = vld [vmem:[%s4624_s4 + $0x68] sm:$0xff]  ;;  %v3621_v52 = vld [vmem:[%s4624_s4 + $0x60] sm:$0xff] }
 0x1f9   :  { %v1374_v51 = vmul.f32 %v3611_v42, %v3611_v42  ;;  %v1373_v44 = vmul.f32 %v3616_v43, %v3616_v43  ;;  %v1372_v45 = vmul.f32 %v3621_v52, %v3621_v52  ;;  %v3632_v60 = vld [vmem:[%s4624_s4 + $0x88] sm:$0xff]  ;;  %v3637_v62 = vld [vmem:[%s4624_s4 + $0x80] sm:$0xff]  ;;  %v3642_v48 = vld [vmem:[%s4624_s4 + $0x78] sm:$0xff] }
 0x1fa   :  { %v1377_v49 = vmul.f32 %v3632_v60, %v3632_v60  ;;  %v1376_v53 = vmul.f32 %v3637_v62, %v3637_v62  ;;  %v1375_v54 = vmul.f32 %v3642_v48, %v3642_v48  ;;  %v3653_v55 = vld [vmem:[%s4624_s4 + $0xa0] sm:$0xff]  ;;  %v3658_v56 = vld [vmem:[%s4624_s4 + $0x98] sm:$0xff]  ;;  %v3663_v57 = vld [vmem:[%s4624_s4 + $0x90] sm:$0xff] }
 0x1fb   :  { %v1380_v58 = vmul.f32 %v3653_v55, %v3653_v55  ;;  %v1379_v0 = vmul.f32 %v3658_v56, %v3658_v56  ;;  %v1378_v3 = vmul.f32 %v3663_v57, %v3663_v57  ;;  %v3674_v14 = vld [vmem:[%s4624_s4 + $0xb8] sm:$0xff]  ;;  %v3679_v9 = vld [vmem:[%s4624_s4 + $0xb0] sm:$0xff]  ;;  %v3684_v8 = vld [vmem:[%s4624_s4 + $0xa8] sm:$0xff] }
 0x1fc   :  { %v1383_v61 = vmul.f32 %v3674_v14, %v3674_v14  ;;  %v1382_v59 = vmul.f32 %v3679_v9, %v3679_v9  ;;  %v1381_v63 = vmul.f32 %v3684_v8, %v3684_v8  ;;  %v3695_v1 = vld [vmem:[%s4624_s4 + $0xd0] sm:$0xff]  ;;  %v3700_v2 = vld [vmem:[%s4624_s4 + $0xc8] sm:$0xff]  ;;  %v1336_v4 = vld [vmem:[%s4624_s4 + $0xc0] sm:$0xff] }
 0x1fd   :  { %v1386_v5 = vmul.f32 %v3695_v1, %v3695_v1  ;;  %v1385_v6 = vmul.f32 %v3700_v2, %v3700_v2  ;;  %v1384_v28 = vmul.f32 %v1336_v4, %v1336_v4  ;;  %v1341_v20 = vld [vmem:[%s4624_s4 + $0xe8] sm:$0xff]  ;;  %v1340_v7 = vld [vmem:[%s4624_s4 + $0xe0] sm:$0xff]  ;;  %v1339_v17 = vld [vmem:[%s4624_s4 + $0xd8] sm:$0xff] }
 0x1fe   :  { %v1389_v23 = vmul.f32 %v1341_v20, %v1341_v20  ;;  %v1388_v10 = vmul.f32 %v1340_v7, %v1340_v7  ;;  %v1387_v11 = vmul.f32 %v1339_v17, %v1339_v17  ;;  %v1344_v24 = vld [vmem:[%s4624_s4 + $0x100] sm:$0xff]  ;;  %v1343_v16 = vld [vmem:[%s4624_s4 + $0xf8] sm:$0xff]  ;;  %v1342_v12 = vld [vmem:[%s4624_s4 + $0xf0] sm:$0xff] }
 0x1ff   :  { %1418 = vadd.xlane.f32.xlu2 %v1365_v25  ;;  %1414 = vadd.xlane.f32.xlu1 %v1363_v26  ;;  %v1392_v13 = vmul.f32 %v1344_v24, %v1344_v24  ;;  %v1391_v18 = vmul.f32 %v1343_v16, %v1343_v16  ;;  %v1390_v19 = vmul.f32 %v1342_v12, %v1342_v12  ;;  %v1347_v21 = vld [vmem:[%s4624_s4 + $0x118] sm:$0xff]  ;;  %v1346_v25 = vld [vmem:[%s4624_s4 + $0x110] sm:$0xff]  ;;  %v1345_v26 = vld [vmem:[%s4624_s4 + $0x108] sm:$0xff] }
 0x200   :  { %1410 = vadd.xlane.f32.xlu0 %v1361_v27  ;;  %v1395_v27 = vmul.f32 %v1347_v21, %v1347_v21  ;;  %v1357_v20 = vld [vmem:[%s4624_s4 + $0x168] sm:$0xff] }
 0x207   :  { %1424 = vadd.xlane.f32.xlu2 %v1368_v31  ;;  %1422 = vadd.xlane.f32.xlu1 %v1367_v34  ;;  %v1394_v31 = vmul.f32 %v1346_v25, %v1346_v25  ;;  %v1393_v34 = vmul.f32 %v1345_v26, %v1345_v26 }
 0x208   :  { %1420 = vadd.xlane.f32.xlu0 %v1366_v35  ;;  %v1350_v35 = vld [vmem:[%s4624_s4 + $0x130] sm:$0xff] }
 0x20f   :  { %1430 = vadd.xlane.f32.xlu2 %v1371_v38  ;;  %1428 = vadd.xlane.f32.xlu1 %v1370_v39  ;;  %v1349_v38 = vld [vmem:[%s4624_s4 + $0x128] sm:$0xff]  ;;  %v1348_v39 = vld [vmem:[%s4624_s4 + $0x120] sm:$0xff] }
 0x210   :  { %1426 = vadd.xlane.f32.xlu0 %v1369_v41  ;;  %v1398_v41 = vmul.f32 %v1350_v35, %v1350_v35 }
 0x217   :  { %1436 = vadd.xlane.f32.xlu2 %v1374_v51  ;;  %1434 = vadd.xlane.f32.xlu1 %v1373_v44  ;;  %v1397_v51 = vmul.f32 %v1349_v38, %v1349_v38  ;;  %v1396_v44 = vmul.f32 %v1348_v39, %v1348_v39 }
 0x218   :  { %1432 = vadd.xlane.f32.xlu0 %v1372_v45  ;;  %v1353_v45 = vld [vmem:[%s4624_s4 + $0x148] sm:$0xff] }
 0x21f   :  { %1442 = vadd.xlane.f32.xlu2 %v1377_v49  ;;  %1440 = vadd.xlane.f32.xlu1 %v1376_v53  ;;  %v1352_v49 = vld [vmem:[%s4624_s4 + $0x140] sm:$0xff]  ;;  %v1351_v53 = vld [vmem:[%s4624_s4 + $0x138] sm:$0xff] }
 0x220   :  { %1438 = vadd.xlane.f32.xlu0 %v1375_v54  ;;  %v1401_v54 = vmul.f32 %v1353_v45, %v1353_v45 }
 0x227   :  { %1448 = vadd.xlane.f32.xlu2 %v1380_v58  ;;  %1446 = vadd.xlane.f32.xlu1 %v1379_v0  ;;  %v1400_v58 = vmul.f32 %v1352_v49, %v1352_v49  ;;  %v1399_v0 = vmul.f32 %v1351_v53, %v1351_v53 }
 0x228   :  { %1444 = vadd.xlane.f32.xlu0 %v1378_v3  ;;  %v1356_v3 = vld [vmem:[%s4624_s4 + $0x160] sm:$0xff] }
 0x22f   :  { %1454 = vadd.xlane.f32.xlu2 %v1383_v61  ;;  %1452 = vadd.xlane.f32.xlu1 %v1382_v59  ;;  %v1355_v61 = vld [vmem:[%s4624_s4 + $0x158] sm:$0xff]  ;;  %v1354_v59 = vld [vmem:[%s4624_s4 + $0x150] sm:$0xff] }
 0x230   :  { %1450 = vadd.xlane.f32.xlu0 %v1381_v63  ;;  %v1404_v63 = vmul.f32 %v1356_v3, %v1356_v3  ;;  %v1403_v4 = vmul.f32 %v1355_v61, %v1355_v61 }
 0x237   :  { %1460 = vadd.xlane.f32.xlu2 %v1386_v5  ;;  %1458 = vadd.xlane.f32.xlu1 %v1385_v6  ;;  %v1402_v5 = vmul.f32 %v1354_v59, %v1354_v59  ;;  %v1359_v6 = vld [vmem:[%s4624_s4 + $0x178] sm:$0xff] }
 0x238   :  { %1456 = vadd.xlane.f32.xlu0 %v1384_v28  ;;  %v1358_v28 = vld [vmem:[%s4624_s4 + $0x170] sm:$0xff]  ;;  %v1407_v24 = vmul.f32 %v1359_v6, %v1359_v6 }
 0x239   :  { %v1406_v16 = vmul.f32 %v1358_v28, %v1358_v28 }
 0x23f   :  { %1466 = vadd.xlane.f32.xlu2 %v1389_v23  ;;  %1464 = vadd.xlane.f32.xlu1 %v1388_v10 }
 0x240   :  { %1462 = vadd.xlane.f32.xlu0 %v1387_v11 }
 0x247   :  { %1472 = vadd.xlane.f32.xlu2 %v1392_v13  ;;  %1470 = vadd.xlane.f32.xlu1 %v1391_v18  ;;  %v1405_v13 = vmul.f32 %v1357_v20, %v1357_v20 }
 0x248   :  { %1468 = vadd.xlane.f32.xlu0 %v1390_v19 }
 0x24f   :  { %1478 = vadd.xlane.f32.xlu2 %v1395_v27  ;;  %1476 = vadd.xlane.f32.xlu1 %v1394_v31 }
 0x250   :  { %1474 = vadd.xlane.f32.xlu0 %v1393_v34 }
 0x257   :  { %1484 = vadd.xlane.f32.xlu2 %v1398_v41  ;;  %1482 = vadd.xlane.f32.xlu1 %v1397_v51 }
 0x258   :  { %1480 = vadd.xlane.f32.xlu0 %v1396_v44 }
 0x25f   :  { %1490 = vadd.xlane.f32.xlu2 %v1401_v54  ;;  %1488 = vadd.xlane.f32.xlu1 %v1400_v58 }
 0x260   :  { %1486 = vadd.xlane.f32.xlu0 %v1399_v0 }
 0x267   :  { %1496 = vadd.xlane.f32.xlu2 %v1404_v63  ;;  %1494 = vadd.xlane.f32.xlu1 %v1403_v4 }
 0x268   :  { %1492 = vadd.xlane.f32.xlu0 %v1402_v5 }
 0x26a   :  { %v1417_v7 = vpop.xlane.xlu2 %1416  ;;  %v1413_v17 = vpop.xlane.xlu1 %1412 }
 0x26b   :  { %v1508_v23 = vmax.f32 %v1417_v7, 1e-24  ;;  %v1506_v10 = vmax.f32 %v1413_v17, 1e-24  ;;  %v1409_v11 = vpop.xlane.xlu0 %1408 }
 0x26c   :  { %v1504_v12 = vmax.f32 %v1409_v11, 1e-24 }
 0x26d   :  { %2649 = vrsqrt.f32 %v1508_v23  ;;  %vm1598_vm0 = vweird.f32 %v1508_v23  ;;  %vm1578_vm2 = vweird.f32 %v1506_v10 }
 0x26e   :  { %2651 = vrsqrt.f32 %v1506_v10  ;;  %vm1558_vm4 = vweird.f32 %v1504_v12 }
 0x26f   :  { %2653 = vrsqrt.f32 %v1504_v12  ;;  %1502 = vadd.xlane.f32.xlu2 %v1407_v24  ;;  %1500 = vadd.xlane.f32.xlu1 %v1406_v16 }
 0x270   :  { %1498 = vadd.xlane.f32.xlu0 %v1405_v13 }
 0x272   :  { %v1419_v18 = vpop.xlane.xlu2 %1418  ;;  %v1415_v19 = vpop.xlane.xlu1 %1414 }
 0x273   :  { %v2650_v21 = vpop.eup %2649  ;;  %v3772_v25 = vmax.f32 %v1419_v18, 1e-24  ;;  %v3774_v26 = vmax.f32 %v1415_v19, 1e-24  ;;  %v1411_v27 = vpop.xlane.xlu0 %1410 }
 0x274   :  { %v2652_v31 = vpop.eup %2651  ;;  %v1593_v34 = vmul.f32 %v2650_v21, %v1508_v23  ;;  %v3776_v35 = vmax.f32 %v1411_v27, 1e-24  ;;  %vm1599_vm1 = vweird.f32 %v2650_v21 }
 0x275   :  { %v2654_v38 = vpop.eup %2653  ;;  %v1573_v39 = vmul.f32 %v2652_v31, %v1506_v10  ;;  %2655 = vrsqrt.f32 %v3772_v25  ;;  %vm1579_vm3 = vweird.f32 %v2652_v31  ;;  %vm1600_vm6 = vmor %vm1598_vm0, %vm1599_vm1  ;;  %vm1608_vm9 = vweird.f32 %v3772_v25 }
 0x276   :  { %v1594_v41 = vmul.f32 %v2650_v21, %v1593_v34  ;;  %v1553_v51 = vmul.f32 %v2654_v38, %v1504_v12  ;;  %2657 = vrsqrt.f32 %v3774_v26  ;;  %vm1559_vm5 = vweird.f32 %v2654_v38  ;;  %vm1580_vm7 = vmor %vm1578_vm2, %vm1579_vm3 }
 0x277   :  { %v1574_v44 = vmul.f32 %v2652_v31, %v1573_v39  ;;  %2659 = vrsqrt.f32 %v3776_v35  ;;  %vm1560_vm8 = vmor %vm1558_vm4, %vm1559_vm5  ;;  %vm1588_vm14 = vweird.f32 %v3774_v26  ;;  %vm1568_vm15 = vweird.f32 %v3776_v35 }
 0x278   :  { %v1595_v45 = vmul.f32 0.5, %v1594_v41  ;;  %v1554_v49 = vmul.f32 %v2654_v38, %v1553_v51 }
 0x279   :  { %v1575_v53 = vmul.f32 0.5, %v1574_v44 }
 0x27a   :  { %v1596_v54 = vsub.f32 1.5, %v1595_v45  ;;  %v1555_v58 = vmul.f32 0.5, %v1554_v49  ;;  %v1425_v0 = vpop.xlane.xlu2 %1424  ;;  %v1423_v3 = vpop.xlane.xlu1 %1422 }
 0x27b   :  { %v3781_v61 = vpop.eup %2655  ;;  %v1576_v59 = vsub.f32 1.5, %v1575_v53  ;;  %v3783_v63 = vmax.f32 %v1425_v0, 1e-24  ;;  %v1421_v4 = vpop.xlane.xlu0 %1420  ;;  %v3796_v24 = vmax.f32 %v1423_v3, 1e-24 }
 0x27c   :  { %v3785_v5 = vpop.eup %2657  ;;  %v1597_v6 = vmul.f32 %v2650_v21, %v1596_v54  ;;  %v1556_v28 = vsub.f32 1.5, %v1555_v58  ;;  %v1603_v20 = vmul.f32 %v3781_v61, %v3772_v25  ;;  %vm1609_vm10 = vweird.f32 %v3781_v61 }
 0x27d   :  { %v3789_v7 = vpop.eup %2659  ;;  %v1577_v17 = vmul.f32 %v2652_v31, %v1576_v59  ;;  %v1583_v11 = vmul.f32 %v3785_v5, %v3774_v26  ;;  %2661 = vrsqrt.f32 %v3783_v63  ;;  %vm1589_vm11 = vweird.f32 %v3785_v5  ;;  %vm1610_vm13 = vmor %vm1608_vm9, %vm1609_vm10 }
 0x27e   :  { %v1601_v16 = vsel %vm1600_vm6, %v2650_v21, %v1597_v6  ;;  %v1557_v13 = vmul.f32 %v2654_v38, %v1556_v28  ;;  %v1604_v18 = vmul.f32 %v3781_v61, %v1603_v20  ;;  %v1563_v19 = vmul.f32 %v3789_v7, %v3776_v35  ;;  %vm1590_vm0 = vmor %vm1588_vm14, %vm1589_vm11 }
 0x27f   :  { %v2036_v23 = vmul.f32 %v1601_v16, %v3527_v46  ;;  %v1581_v27 = vsel %vm1580_vm7, %v2652_v31, %v1577_v17  ;;  %v1584_v34 = vmul.f32 %v3785_v5, %v1583_v11  ;;  %2663 = vrsqrt.f32 %v3796_v24 }
 0x280   :  { %v2034_v39 = vmul.f32 %v1581_v27, %v3532_v33  ;;  %v1561_v21 = vsel %vm1560_vm8, %v2654_v38, %v1557_v13  ;;  %v1605_v41 = vmul.f32 0.5, %v1604_v18  ;;  %v1564_v10 = vmul.f32 %v3789_v7, %v1563_v19 }
 0x281   :  { %2084 = vst [vmem:[%s4624_s4 + $0x20] sm:$0xff] %v2036_v23  ;;  %v2032_v51 = vmul.f32 %v1561_v21, %v3537_v15  ;;  %v1585_v46 = vmul.f32 0.5, %v1584_v34  ;;  %v3819_v31 = vmax.f32 %v1421_v4, 1e-24  ;;  %vm1569_vm12 = vweird.f32 %v3789_v7 }
 0x282   :  { %2082 = vst [vmem:[%s4624_s4 + $0x10] sm:$0xff] %v2034_v39  ;;  %v1606_v33 = vsub.f32 1.5, %v1605_v41  ;;  %v1565_v12 = vmul.f32 0.5, %v1564_v10  ;;  %v1431_v38 = vpop.xlane.xlu2 %1430  ;;  %v1429_v44 = vpop.xlane.xlu1 %1428  ;;  %vm1570_vm1 = vmor %vm1568_vm15, %vm1569_vm12  ;;  %vm1638_vm3 = vweird.f32 %v3783_v63  ;;  %vm1628_vm6 = vweird.f32 %v3796_v24 }
 0x283   :  { %v2662_v45 = vpop.eup %2661  ;;  %2080 = vst [vmem:[%s4624_s4] sm:$0xff] %v2032_v51  ;;  %v1586_v15 = vsub.f32 1.5, %v1585_v46  ;;  %v3825_v49 = vmax.f32 %v1431_v38, 1e-24  ;;  %v3827_v53 = vmax.f32 %v1429_v44, 1e-24  ;;  %v1427_v54 = vpop.xlane.xlu0 %1426  ;;  %2665 = vrsqrt.f32 %v3819_v31 }
 0x284   :  { %v1607_v58 = vmul.f32 %v3781_v61, %v1606_v33  ;;  %v1566_v0 = vsub.f32 1.5, %v1565_v12  ;;  %v1633_v3 = vmul.f32 %v2662_v45, %v3783_v63  ;;  %v3855_v16 = vmax.f32 %v1427_v54, 1e-24 }
 0x285   :  { %v1587_v59 = vmul.f32 %v3785_v5, %v1586_v15  ;;  %2667 = vrsqrt.f32 %v3825_v49  ;;  %v2664_v20 = vpop.eup %2663  ;;  %vm1639_vm2 = vweird.f32 %v2662_v45  ;;  %vm1618_vm7 = vweird.f32 %v3819_v31 }
 0x286   :  { %v1611_v4 = vsel %vm1610_vm13, %v3781_v61, %v1607_v58  ;;  %v1567_v6 = vmul.f32 %v3789_v7, %v1566_v0  ;;  %v1634_v28 = vmul.f32 %v2662_v45, %v1633_v3  ;;  %2669 = vrsqrt.f32 %v3827_v53  ;;  %vm1640_vm4 = vmor %vm1638_vm3, %vm1639_vm2 }
 0x287   :  { %v2037_v25 = vmul.f32 %v1611_v4, %v3548_v30  ;;  %v1591_v17 = vsel %vm1590_vm0, %v3785_v5, %v1587_v59  ;;  %v1623_v11 = vmul.f32 %v2664_v20, %v3796_v24  ;;  %2671 = vrsqrt.f32 %v3855_v16 }
 0x288   :  { %v2035_v26 = vmul.f32 %v1591_v17, %v3553_v40  ;;  %v1571_v35 = vsel %vm1570_vm1, %v3789_v7, %v1567_v6  ;;  %v1635_v61 = vmul.f32 0.5, %v1634_v28  ;;  %vm1629_vm5 = vweird.f32 %v2664_v20 }
 0x289   :  { %2085 = vst [vmem:[%s4624_s4 + $0x28] sm:$0xff] %v2037_v25  ;;  %v2033_v30 = vmul.f32 %v1571_v35, %v3558_v22  ;;  %v1624_v40 = vmul.f32 %v2664_v20, %v1623_v11  ;;  %v3860_v18 = vpop.eup %2665  ;;  %vm1630_vm8 = vmor %vm1628_vm6, %vm1629_vm5  ;;  %vm1668_vm13 = vweird.f32 %v3825_v49  ;;  %vm1658_vm14 = vweird.f32 %v3827_v53 }
 0x28a   :  { %2083 = vst [vmem:[%s4624_s4 + $0x18] sm:$0xff] %v2035_v26  ;;  %v1636_v5 = vsub.f32 1.5, %v1635_v61  ;;  %v1437_v13 = vpop.xlane.xlu2 %1436  ;;  %v1435_v7 = vpop.xlane.xlu1 %1434  ;;  %v1613_v21 = vmul.f32 %v3860_v18, %v3819_v31  ;;  %vm1619_vm9 = vweird.f32 %v3860_v18  ;;  %vm1648_vm2 = vweird.f32 %v3855_v16 }
 0x28b   :  { %2081 = vst [vmem:[%s4624_s4 + $0x8] sm:$0xff] %v2033_v30  ;;  %v3866_v22 = vmax.f32 %v1437_v13, 1e-24  ;;  %v3868_v19 = vmax.f32 %v1435_v7, 1e-24  ;;  %v1433_v23 = vpop.xlane.xlu0 %1432  ;;  %v3870_v27 = vpop.eup %2667  ;;  %v1625_v39 = vmul.f32 0.5, %v1624_v40  ;;  %vm1620_vm12 = vmor %vm1618_vm7, %vm1619_vm9 }
 0x28c   :  { %v1637_v34 = vmul.f32 %v2662_v45, %v1636_v5  ;;  %v3875_v41 = vpop.eup %2669  ;;  %v1663_v10 = vmul.f32 %v3870_v27, %v3825_v49  ;;  %v1614_v33 = vmul.f32 %v3860_v18, %v1613_v21  ;;  %vm1669_vm10 = vweird.f32 %v3870_v27 }
 0x28d   :  { %2673 = vrsqrt.f32 %v3866_v22  ;;  %v1626_v46 = vsub.f32 1.5, %v1625_v39  ;;  %v1653_v63 = vmul.f32 %v3875_v41, %v3827_v53  ;;  %v3890_v54 = vpop.eup %2671  ;;  %v3898_v24 = vmax.f32 %v1433_v23, 1e-24  ;;  %vm1670_vm15 = vmor %vm1668_vm13, %vm1669_vm10 }
 0x28e   :  { %v1641_v51 = vsel %vm1640_vm4, %v2662_v45, %v1637_v34  ;;  %v1664_v38 = vmul.f32 %v3870_v27, %v1663_v10  ;;  %2675 = vrsqrt.f32 %v3868_v19  ;;  %v1615_v15 = vmul.f32 0.5, %v1614_v33 }
 0x28f   :  { %v2040_v12 = vmul.f32 %v1641_v51, %v3569_v36  ;;  %v1627_v44 = vmul.f32 %v2664_v20, %v1626_v46  ;;  %v1654_v45 = vmul.f32 %v3875_v41, %v1653_v63  ;;  %v1643_v59 = vmul.f32 %v3890_v54, %v3855_v16 }
 0x290   :  { %v1665_v36 = vmul.f32 0.5, %v1664_v38  ;;  %v1616_v0 = vsub.f32 1.5, %v1615_v15  ;;  %vm1659_vm11 = vweird.f32 %v3875_v41  ;;  %2677 = vrsqrt.f32 %v3898_v24 }
 0x291   :  { %2088 = vst [vmem:[%s4624_s4 + $0x40] sm:$0xff] %v2040_v12  ;;  %v1631_v58 = vsel %vm1630_vm8, %v2664_v20, %v1627_v44  ;;  %v1655_v3 = vmul.f32 0.5, %v1654_v45  ;;  %v1644_v61 = vmul.f32 %v3890_v54, %v1643_v59  ;;  %vm1660_vm0 = vmor %vm1658_vm14, %vm1659_vm11  ;;  %vm1649_vm1 = vweird.f32 %v3890_v54 }
 0x292   :  { %v1443_v4 = vpop.xlane.xlu2 %1442  ;;  %v1441_v6 = vpop.xlane.xlu1 %1440  ;;  %v2039_v25 = vmul.f32 %v1631_v58, %v3574_v32  ;;  %v1666_v17 = vsub.f32 1.5, %v1665_v36  ;;  %v1617_v35 = vmul.f32 %v3860_v18, %v1616_v0  ;;  %vm1650_vm4 = vmor %vm1648_vm2, %vm1649_vm1  ;;  %vm1698_vm5 = vweird.f32 %v3866_v22 }
 0x293   :  { %v3902_v28 = vpop.eup %2673  ;;  %v1439_v26 = vpop.xlane.xlu0 %1438  ;;  %v1656_v20 = vsub.f32 1.5, %v1655_v3  ;;  %v3923_v5 = vmax.f32 %v1443_v4, 1e-24  ;;  %v1645_v7 = vmul.f32 0.5, %v1644_v61  ;;  %v3961_v33 = vmax.f32 %v1441_v6, 1e-24 }
 0x294   :  { %v1693_v11 = vmul.f32 %v3902_v28, %v3866_v22  ;;  %v3911_v30 = vpop.eup %2675  ;;  %2087 = vst [vmem:[%s4624_s4 + $0x38] sm:$0xff] %v2039_v25  ;;  %v1667_v32 = vmul.f32 %v3870_v27, %v1666_v17  ;;  %v1621_v40 = vsel %vm1620_vm12, %v3860_v18, %v1617_v35  ;;  %vm1699_vm3 = vweird.f32 %v3902_v28 }
 0x295   :  { %v1657_v13 = vmul.f32 %v3875_v41, %v1656_v20  ;;  %v2038_v31 = vmul.f32 %v1621_v40, %v3579_v29  ;;  %v1683_v49 = vmul.f32 %v3911_v30, %v3868_v19  ;;  %v1646_v39 = vsub.f32 1.5, %v1645_v7  ;;  %vm1700_vm6 = vmor %vm1698_vm5, %vm1699_vm3 }
 0x296   :  { %v1694_v23 = vmul.f32 %v3902_v28, %v1693_v11  ;;  %v1671_v34 = vsel %vm1670_vm15, %v3870_v27, %v1667_v32  ;;  %v3939_v10 = vpop.eup %2677  ;;  %2679 = vrsqrt.f32 %v3923_v5  ;;  %v3963_v63 = vmax.f32 %v1439_v26, 1e-24 }
 0x297   :  { %v2043_v53 = vmul.f32 %v1671_v34, %v3590_v47  ;;  %v1661_v18 = vsel %vm1660_vm0, %v3875_v41, %v1657_v13  ;;  %2086 = vst [vmem:[%s4624_s4 + $0x30] sm:$0xff] %v2038_v31  ;;  %v1684_v27 = vmul.f32 %v3911_v30, %v1683_v49  ;;  %v1647_v47 = vmul.f32 %v3890_v54, %v1646_v39 }
 0x298   :  { %v1695_v21 = vmul.f32 0.5, %v1694_v23  ;;  %v2042_v29 = vmul.f32 %v1661_v18, %v3595_v50  ;;  %v1673_v51 = vmul.f32 %v3939_v10, %v3898_v24  ;;  %vm1689_vm7 = vweird.f32 %v3911_v30 }
 0x299   :  { %2091 = vst [vmem:[%s4624_s4 + $0x58] sm:$0xff] %v2043_v53  ;;  %v1685_v16 = vmul.f32 0.5, %v1684_v27  ;;  %v1651_v38 = vsel %vm1650_vm4, %v3890_v54, %v1647_v47  ;;  %2681 = vrsqrt.f32 %v3961_v33  ;;  %vm1688_vm8 = vweird.f32 %v3868_v19 }
 0x29a   :  { %v1696_v41 = vsub.f32 1.5, %v1695_v21  ;;  %v1449_v46 = vpop.xlane.xlu2 %1448  ;;  %v1447_v50 = vpop.xlane.xlu1 %1446  ;;  %2090 = vst [vmem:[%s4624_s4 + $0x50] sm:$0xff] %v2042_v29  ;;  %v1674_v15 = vmul.f32 %v3939_v10, %v1673_v51  ;;  %v2041_v36 = vmul.f32 %v1651_v38, %v3600_v37  ;;  %2683 = vrsqrt.f32 %v3963_v63  ;;  %vm1690_vm9 = vmor %vm1688_vm8, %vm1689_vm7 }
 0x29b   :  { %v1445_v12 = vpop.xlane.xlu0 %1444  ;;  %v3968_v45 = vmax.f32 %v1449_v46, 1e-24  ;;  %v1686_v22 = vsub.f32 1.5, %v1685_v16  ;;  %vm1679_vm10 = vweird.f32 %v3939_v10  ;;  %v3989_v6 = vmax.f32 %v1447_v50, 1e-24 }
 0x29c   :  { %v1697_v44 = vmul.f32 %v3902_v28, %v1696_v41  ;;  %v1675_v0 = vmul.f32 0.5, %v1674_v15  ;;  %v3977_v54 = vpop.eup %2679  ;;  %2089 = vst [vmem:[%s4624_s4 + $0x48] sm:$0xff] %v2041_v36  ;;  %vm1678_vm11 = vweird.f32 %v3898_v24  ;;  %v3996_v19 = vmax.f32 %v1445_v12, 1e-24 }
 0x29d   :  { %v1687_v3 = vmul.f32 %v3911_v30, %v1686_v22  ;;  %2685 = vrsqrt.f32 %v3968_v45  ;;  %v1723_v4 = vmul.f32 %v3977_v54, %v3923_v5  ;;  %vm1680_vm12 = vmor %vm1678_vm11, %vm1679_vm10  ;;  %vm1728_vm13 = vweird.f32 %v3923_v5 }
 0x29e   :  { %v1701_v58 = vsel %vm1700_vm6, %v3902_v28, %v1697_v44  ;;  %v1676_v59 = vsub.f32 1.5, %v1675_v0  ;;  %2687 = vrsqrt.f32 %v3989_v6  ;;  %vm1718_vm14 = vweird.f32 %v3961_v33 }
 0x29f   :  { %v2046_v37 = vmul.f32 %v1701_v58, %v3611_v42  ;;  %v1691_v42 = vsel %vm1690_vm9, %v3911_v30, %v1687_v3  ;;  %v1724_v17 = vmul.f32 %v3977_v54, %v1723_v4  ;;  %v4002_v20 = vpop.eup %2681  ;;  %2689 = vrsqrt.f32 %v3996_v19 }
 0x2a0   :  { %v2045_v28 = vmul.f32 %v1691_v42, %v3616_v43  ;;  %v1677_v25 = vmul.f32 %v3939_v10, %v1676_v59  ;;  %v4008_v11 = vpop.eup %2683  ;;  %v1713_v32 = vmul.f32 %v4002_v20, %v3961_v33  ;;  %vm1708_vm15 = vweird.f32 %v3963_v63 }
 0x2a1   :  { %2094 = vst [vmem:[%s4624_s4 + $0x70] sm:$0xff] %v2046_v37  ;;  %v1725_v30 = vmul.f32 0.5, %v1724_v17  ;;  %v1703_v7 = vmul.f32 %v4008_v11, %v3963_v63  ;;  %vm1729_vm0 = vweird.f32 %v3977_v54  ;;  %vm1719_vm1 = vweird.f32 %v4002_v20 }
 0x2a2   :  { %v1455_v26 = vpop.xlane.xlu2 %1454  ;;  %v1453_v35 = vpop.xlane.xlu1 %1452  ;;  %2093 = vst [vmem:[%s4624_s4 + $0x68] sm:$0xff] %v2045_v28  ;;  %v1681_v43 = vsel %vm1680_vm12, %v3939_v10, %v1677_v25  ;;  %v1714_v31 = vmul.f32 %v4002_v20, %v1713_v32  ;;  %vm1758_vm2 = vweird.f32 %v3968_v45  ;;  %vm1709_vm3 = vweird.f32 %v4008_v11  ;;  %vm1730_vm4 = vmor %vm1728_vm13, %vm1729_vm0 }
 0x2a3   :  { %v4006_v24 = vmax.f32 %v1455_v26, 1e-24  ;;  %v1451_v61 = vpop.xlane.xlu0 %1450  ;;  %v4017_v40 = vpop.eup %2685  ;;  %v2044_v13 = vmul.f32 %v1681_v43, %v3621_v52  ;;  %v1726_v23 = vsub.f32 1.5, %v1725_v30  ;;  %v1704_v52 = vmul.f32 %v4008_v11, %v1703_v7  ;;  %vm1720_vm8 = vmor %vm1718_vm14, %vm1719_vm1 }
 0x2a4   :  { %v1753_v34 = vmul.f32 %v4017_v40, %v3968_v45  ;;  %v4034_v49 = vmax.f32 %v1453_v35, 1e-24  ;;  %v4036_v53 = vpop.eup %2687  ;;  %v1715_v39 = vmul.f32 0.5, %v1714_v31  ;;  %vm1759_vm5 = vweird.f32 %v4017_v40  ;;  %vm1710_vm11 = vmor %vm1708_vm15, %vm1709_vm3 }
 0x2a5   :  { %2691 = vrsqrt.f32 %v4006_v24  ;;  %2092 = vst [vmem:[%s4624_s4 + $0x60] sm:$0xff] %v2044_v13  ;;  %v1727_v18 = vmul.f32 %v3977_v54, %v1726_v23  ;;  %v4041_v10 = vpop.eup %2689  ;;  %v1705_v29 = vmul.f32 0.5, %v1704_v52  ;;  %v1743_v27 = vmul.f32 %v4036_v53, %v3989_v6  ;;  %vm1760_vm12 = vmor %vm1758_vm2, %vm1759_vm5 }
 0x2a6   :  { %v1754_v21 = vmul.f32 %v4017_v40, %v1753_v34  ;;  %vm1748_vm6 = vweird.f32 %v3989_v6  ;;  %2693 = vrsqrt.f32 %v4034_v49  ;;  %v1716_v41 = vsub.f32 1.5, %v1715_v39 }
 0x2a7   :  { %v1731_v47 = vsel %vm1730_vm4, %v3977_v54, %v1727_v18  ;;  %v1733_v46 = vmul.f32 %v4041_v10, %v3996_v19  ;;  %vm1738_vm7 = vweird.f32 %v3996_v19  ;;  %v1706_v38 = vsub.f32 1.5, %v1705_v29 }
 0x2a8   :  { %v1755_v51 = vmul.f32 0.5, %v1754_v21  ;;  %v2049_v12 = vmul.f32 %v1731_v47, %v3632_v60  ;;  %v1744_v44 = vmul.f32 %v4036_v53, %v1743_v27  ;;  %v4058_v15 = vmax.f32 %v1451_v61, 1e-24 }
 0x2a9   :  { %v1717_v22 = vmul.f32 %v4002_v20, %v1716_v41  ;;  %v1734_v0 = vmul.f32 %v4041_v10, %v1733_v46  ;;  %v1707_v60 = vmul.f32 %v4008_v11, %v1706_v38  ;;  %vm1749_vm9 = vweird.f32 %v4036_v53 }
 0x2aa   :  { %v1461_v5 = vpop.xlane.xlu2 %1460  ;;  %v1459_v50 = vpop.xlane.xlu1 %1458  ;;  %v1756_v58 = vsub.f32 1.5, %v1755_v51  ;;  %2097 = vst [vmem:[%s4624_s4 + $0x88] sm:$0xff] %v2049_v12  ;;  %v1745_v37 = vmul.f32 0.5, %v1744_v44  ;;  %vm1739_vm10 = vweird.f32 %v4041_v10  ;;  %2695 = vrsqrt.f32 %v4058_v15  ;;  %vm1750_vm14 = vmor %vm1748_vm6, %vm1749_vm9 }
 0x2ab   :  { %v4054_v16 = vpop.eup %2691  ;;  %v1457_v36 = vpop.xlane.xlu0 %1456  ;;  %v1721_v3 = vsel %vm1720_vm8, %v4002_v20, %v1717_v22  ;;  %v1735_v4 = vmul.f32 0.5, %v1734_v0  ;;  %v1711_v25 = vsel %vm1710_vm11, %v4008_v11, %v1707_v60  ;;  %vm1788_vm13 = vweird.f32 %v4006_v24  ;;  %vm1740_vm0 = vmor %vm1738_vm7, %vm1739_vm10 }
 0x2ac   :  { %v1783_v54 = vmul.f32 %v4054_v16, %v4006_v24  ;;  %v1757_v59 = vmul.f32 %v4017_v40, %v1756_v58  ;;  %v4081_v42 = vpop.eup %2693  ;;  %v2048_v28 = vmul.f32 %v1721_v3, %v3637_v62  ;;  %v1746_v17 = vsub.f32 1.5, %v1745_v37 }
 0x2ad   :  { %v2047_v63 = vmul.f32 %v1711_v25, %v3642_v48  ;;  %v1736_v35 = vsub.f32 1.5, %v1735_v4  ;;  %v1773_v45 = vmul.f32 %v4081_v42, %v4034_v49  ;;  %vm1789_vm15 = vweird.f32 %v4054_v16 }
 0x2ae   :  { %v1784_v33 = vmul.f32 %v4054_v16, %v1783_v54  ;;  %v1761_v26 = vsel %vm1760_vm12, %v4017_v40, %v1757_v59  ;;  %2096 = vst [vmem:[%s4624_s4 + $0x80] sm:$0xff] %v2048_v28  ;;  %v1747_v61 = vmul.f32 %v4036_v53, %v1746_v17  ;;  %v4120_v40 = vmax.f32 %v1459_v50, 1e-24  ;;  %vm1790_vm1 = vmor %vm1788_vm13, %vm1789_vm15 }
 0x2af   :  { %v2052_v62 = vmul.f32 %v1761_v26, %v3653_v55  ;;  %2095 = vst [vmem:[%s4624_s4 + $0x78] sm:$0xff] %v2047_v63  ;;  %v1737_v48 = vmul.f32 %v4041_v10, %v1736_v35  ;;  %v4109_v55 = vmax.f32 %v1461_v5, 1e-24  ;;  %v1774_v6 = vmul.f32 %v4081_v42, %v1773_v45 }
 0x2b0   :  { %v1785_v20 = vmul.f32 0.5, %v1784_v33  ;;  %v1751_v32 = vsel %vm1750_vm14, %v4036_v53, %v1747_v61  ;;  %v4122_v13 = vmax.f32 %v1457_v36, 1e-24  ;;  %v2696_v52 = vpop.eup %2695  ;;  %vm1779_vm2 = vweird.f32 %v4081_v42 }
 0x2b1   :  { %2100 = vst [vmem:[%s4624_s4 + $0xa0] sm:$0xff] %v2052_v62  ;;  %v2051_v23 = vmul.f32 %v1751_v32, %v3658_v56  ;;  %v1741_v31 = vsel %vm1740_vm0, %v4041_v10, %v1737_v48  ;;  %2697 = vrsqrt.f32 %v4109_v55  ;;  %v1775_v19 = vmul.f32 0.5, %v1774_v6 }
 0x2b2   :  { %v1786_v11 = vsub.f32 1.5, %v1785_v20  ;;  %v1467_v43 = vpop.xlane.xlu2 %1466  ;;  %v1465_v30 = vpop.xlane.xlu1 %1464  ;;  %v2050_v53 = vmul.f32 %v1741_v31, %v3663_v57  ;;  %2699 = vrsqrt.f32 %v4120_v40  ;;  %v1763_v18 = vmul.f32 %v2696_v52, %v4058_v15 }
 0x2b3   :  { %v1463_v7 = vpop.xlane.xlu0 %1462  ;;  %2099 = vst [vmem:[%s4624_s4 + $0x98] sm:$0xff] %v2051_v23  ;;  %v1776_v39 = vsub.f32 1.5, %v1775_v19  ;;  %2701 = vrsqrt.f32 %v4122_v13  ;;  %v4145_v21 = vmax.f32 %v1467_v43, 1e-24  ;;  %v4147_v10 = vmax.f32 %v1465_v30, 1e-24 }
 0x2b4   :  { %v1787_v34 = vmul.f32 %v4054_v16, %v1786_v11  ;;  %2098 = vst [vmem:[%s4624_s4 + $0x90] sm:$0xff] %v2050_v53  ;;  %v1764_v24 = vmul.f32 %v2696_v52, %v1763_v18  ;;  %vm1778_vm3 = vweird.f32 %v4034_v49  ;;  %v4154_v27 = vmax.f32 %v1463_v7, 1e-24 }
 0x2b5   :  { %v1777_v29 = vmul.f32 %v4081_v42, %v1776_v39  ;;  %vm1780_vm4 = vmor %vm1778_vm3, %vm1779_vm2  ;;  %2703 = vrsqrt.f32 %v4145_v21  ;;  %vm1768_vm5 = vweird.f32 %v4058_v15  ;;  %vm1769_vm6 = vweird.f32 %v2696_v52 }
 0x2b6   :  { %v1791_v56 = vsel %vm1790_vm1, %v4054_v16, %v1787_v34  ;;  %v1765_v47 = vmul.f32 0.5, %v1764_v24  ;;  %2705 = vrsqrt.f32 %v4147_v10  ;;  %vm1818_vm7 = vweird.f32 %v4109_v55  ;;  %vm1770_vm9 = vmor %vm1768_vm5, %vm1769_vm6 }
 0x2b7   :  { %v2055_v57 = vmul.f32 %v1791_v56, %v3674_v14  ;;  %v4156_v14 = vpop.eup %2697  ;;  %v1781_v5 = vsel %vm1780_vm4, %v4081_v42, %v1777_v29  ;;  %2707 = vrsqrt.f32 %v4154_v27  ;;  %vm1808_vm8 = vweird.f32 %v4120_v40 }
 0x2b8   :  { %v4159_v46 = vpop.eup %2699  ;;  %v1813_v50 = vmul.f32 %v4156_v14, %v4109_v55  ;;  %v2054_v16 = vmul.f32 %v1781_v5, %v3679_v9  ;;  %v1766_v12 = vsub.f32 1.5, %v1765_v47  ;;  %vm1798_vm10 = vweird.f32 %v4122_v13 }
 0x2b9   :  { %2103 = vst [vmem:[%s4624_s4 + $0xb8] sm:$0xff] %v2055_v57  ;;  %v1803_v38 = vmul.f32 %v4159_v46, %v4120_v40  ;;  %v4169_v44 = vpop.eup %2701  ;;  %vm1819_vm11 = vweird.f32 %v4156_v14  ;;  %vm1848_vm12 = vweird.f32 %v4145_v21  ;;  %vm1809_vm13 = vweird.f32 %v4159_v46 }
 0x2ba   :  { %v1473_v41 = vpop.xlane.xlu2 %1472  ;;  %v1471_v51 = vpop.xlane.xlu1 %1470  ;;  %v1814_v36 = vmul.f32 %v4156_v14, %v1813_v50  ;;  %2102 = vst [vmem:[%s4624_s4 + $0xb0] sm:$0xff] %v2054_v16  ;;  %v1767_v9 = vmul.f32 %v2696_v52, %v1766_v12  ;;  %v1793_v0 = vmul.f32 %v4169_v44, %v4122_v13  ;;  %vm1838_vm14 = vweird.f32 %v4147_v10  ;;  %vm1820_vm0 = vmor %vm1818_vm7, %vm1819_vm11  ;;  %v2745_v13 = vld [vmem:[%s4624_s4 + $0xc0] sm:$0xff] }
 0x2bb   :  { %v1469_v49 = vpop.xlane.xlu0 %1468  ;;  %v4174_v22 = vmax.f32 %v1473_v41, 1e-24  ;;  %v1804_v58 = vmul.f32 %v4159_v46, %v1803_v38  ;;  %v4187_v60 = vmax.f32 %v1471_v51, 1e-24  ;;  %v4189_v37 = vpop.eup %2703  ;;  %vm1799_vm15 = vweird.f32 %v4169_v44  ;;  %vm1810_vm1 = vmor %vm1808_vm8, %vm1809_vm13  ;;  %v2746_v38 = vld [vmem:[%s4624_s4 + $0xe8] sm:$0xff] }
 0x2bc   :  { %v1815_v54 = vmul.f32 0.5, %v1814_v36  ;;  %v1771_v3 = vsel %vm1770_vm9, %v2696_v52, %v1767_v9  ;;  %v1794_v4 = vmul.f32 %v4169_v44, %v1793_v0  ;;  %v4193_v33 = vpop.eup %2705  ;;  %v1843_v28 = vmul.f32 %v4189_v37, %v4145_v21  ;;  %vm1800_vm4 = vmor %vm1798_vm10, %vm1799_vm15 }
 0x2bd   :  { %2709 = vrsqrt.f32 %v4174_v22  ;;  %v1805_v59 = vmul.f32 0.5, %v1804_v58  ;;  %v2053_v15 = vmul.f32 %v1771_v3, %v3684_v8  ;;  %v4199_v25 = vmax.f32 %v1469_v49, 1e-24  ;;  %v4205_v8 = vpop.eup %2707 }
 0x2be   :  { %v1816_v42 = vsub.f32 1.5, %v1815_v54  ;;  %v1795_v63 = vmul.f32 0.5, %v1794_v4  ;;  %v1833_v26 = vmul.f32 %v4193_v33, %v4147_v10  ;;  %v1844_v61 = vmul.f32 %v4189_v37, %v1843_v28  ;;  %v2747_v10 = vld [vmem:[%s4624_s4 + $0xe0] sm:$0xff] }
 0x2bf   :  { %v1806_v17 = vsub.f32 1.5, %v1805_v59  ;;  %2101 = vst [vmem:[%s4624_s4 + $0xa8] sm:$0xff] %v2053_v15  ;;  %2711 = vrsqrt.f32 %v4187_v60  ;;  %v1823_v30 = vmul.f32 %v4205_v8, %v4154_v27  ;;  %vm1849_vm2 = vweird.f32 %v4189_v37 }
 0x2c0   :  { %v1817_v62 = vmul.f32 %v4156_v14, %v1816_v42  ;;  %v1796_v11 = vsub.f32 1.5, %v1795_v63  ;;  %v1834_v43 = vmul.f32 %v4193_v33, %v1833_v26  ;;  %v1845_v7 = vmul.f32 0.5, %v1844_v61  ;;  %vm4265_vm7 = vmor %vm1848_vm12, %vm1849_vm2 }
 0x2c1   :  { %v1807_v48 = vmul.f32 %v4159_v46, %v1806_v17  ;;  %vm1828_vm3 = vweird.f32 %v4154_v27  ;;  %2713 = vrsqrt.f32 %v4199_v25  ;;  %v1824_v53 = vmul.f32 %v4205_v8, %v1823_v30  ;;  %v2748_v27 = vld [vmem:[%s4624_s4 + $0xd8] sm:$0xff] }
 0x2c2   :  { %v1479_v35 = vpop.xlane.xlu2 %1478  ;;  %v1477_v20 = vpop.xlane.xlu1 %1476  ;;  %v1821_v6 = vsel %vm1820_vm0, %v4156_v14, %v1817_v62  ;;  %v1797_v31 = vmul.f32 %v4169_v44, %v1796_v11  ;;  %v1835_v34 = vmul.f32 0.5, %v1834_v43  ;;  %v1846_v40 = vsub.f32 1.5, %v1845_v7 }
 0x2c3   :  { %v4214_v45 = vpop.xlane.xlu0 %1474  ;;  %v4224_v32 = vpop.eup %2709  ;;  %v2058_v55 = vmul.f32 %v1821_v6, %v3695_v1  ;;  %v1811_v23 = vsel %vm1810_vm1, %v4159_v46, %v1807_v48  ;;  %vm1839_vm5 = vweird.f32 %v4193_v33  ;;  %vm1878_vm6 = vweird.f32 %v4174_v22 }
 0x2c4   :  { %v2057_v52 = vmul.f32 %v1811_v23, %v3700_v2  ;;  %v1873_v19 = vmul.f32 %v4224_v32, %v4174_v22  ;;  %v1801_v1 = vsel %vm1800_vm4, %v4169_v44, %v1797_v31  ;;  %v1836_v56 = vsub.f32 1.5, %v1835_v34  ;;  %vm1840_vm10 = vmor %vm1838_vm14, %vm1839_vm5  ;;  %v2749_v22 = vld [vmem:[%s4624_s4 + $0x100] sm:$0xff]  ;;  %v2751_v34 = vld [vmem:[%s4624_s4 + $0xf0] sm:$0xff] }
 0x2c5   :  { %2106 = vst [vmem:[%s4624_s4 + $0xd0] sm:$0xff] %v2058_v55  ;;  %v4251_v2 = vpop.eup %2711  ;;  %v2056_v18 = vmul.f32 %v2745_v13, %v1801_v1  ;;  %v1847_v57 = vmul.f32 %v4189_v37, %v1846_v40  ;;  %v1825_v39 = vmul.f32 0.5, %v1824_v53  ;;  %vm1829_vm8 = vweird.f32 %v4205_v8 }
 0x2c6   :  { %2105 = vst [vmem:[%s4624_s4 + $0xc8] sm:$0xff] %v2057_v52  ;;  %v1874_v24 = vmul.f32 %v4224_v32, %v1873_v19  ;;  %v1837_v14 = vmul.f32 %v4193_v33, %v1836_v56  ;;  %v1863_v47 = vmul.f32 %v4251_v2, %v4187_v60  ;;  %vm1868_vm9 = vweird.f32 %v4187_v60  ;;  %vm1830_vm12 = vmor %vm1828_vm3, %vm1829_vm8 }
 0x2c7   :  { %v4274_v41 = vmax.f32 %v1479_v35, 1e-24  ;;  %v4276_v5 = vpop.eup %2713  ;;  %2104 = vst [vmem:[%s4624_s4 + $0xc0] sm:$0xff] %v2056_v18  ;;  %v1851_v21 = vsel %vm4265_vm7, %v4189_v37, %v1847_v57  ;;  %v1826_v50 = vsub.f32 1.5, %v1825_v39  ;;  %v4288_v16 = vmax.f32 %v1477_v20, 1e-24 }
 0x2c8   :  { %v1875_v49 = vmul.f32 0.5, %v1874_v24  ;;  %v2061_v44 = vmul.f32 %v2746_v38, %v1851_v21  ;;  %v1841_v36 = vsel %vm1840_vm10, %v4193_v33, %v1837_v14  ;;  %v1864_v9 = vmul.f32 %v4251_v2, %v1863_v47 }
 0x2c9   :  { %v1853_v58 = vmul.f32 %v4276_v5, %v4199_v25  ;;  %v2060_v0 = vmul.f32 %v2747_v10, %v1841_v36  ;;  %v1827_v54 = vmul.f32 %v4205_v8, %v1826_v50  ;;  %vm1879_vm11 = vweird.f32 %v4224_v32 }
 0x2ca   :  { %v1485_v51 = vpop.xlane.xlu2 %1484  ;;  %v1483_v46 = vpop.xlane.xlu1 %1482  ;;  %v1876_v37 = vsub.f32 1.5, %v1875_v49  ;;  %2109 = vst [vmem:[%s4624_s4 + $0xe8] sm:$0xff] %v2061_v44  ;;  %v1865_v3 = vmul.f32 0.5, %v1864_v9  ;;  %vm1869_vm13 = vweird.f32 %v4251_v2  ;;  %2715 = vrsqrt.f32 %v4274_v41  ;;  %vm1880_vm15 = vmor %vm1878_vm6, %vm1879_vm11 }
 0x2cb   :  { %v1481_v12 = vpop.xlane.xlu0 %1480  ;;  %v1854_v59 = vmul.f32 %v4276_v5, %v1853_v58  ;;  %2108 = vst [vmem:[%s4624_s4 + $0xe0] sm:$0xff] %v2060_v0  ;;  %v1831_v4 = vsel %vm1830_vm12, %v4205_v8, %v1827_v54  ;;  %vm1859_vm14 = vweird.f32 %v4276_v5  ;;  %2717 = vrsqrt.f32 %v4288_v16  ;;  %vm1870_vm0 = vmor %vm1868_vm9, %vm1869_vm13 }
 0x2cc   :  { %v1877_v33 = vmul.f32 %v4224_v32, %v1876_v37  ;;  %v2059_v15 = vmul.f32 %v2748_v27, %v1831_v4  ;;  %v1866_v42 = vsub.f32 1.5, %v1865_v3  ;;  %v4325_v17 = vmax.f32 %v4214_v45, 1e-24  ;;  %v2752_v4 = vld [vmem:[%s4624_s4 + $0x118] sm:$0xff] }
 0x2cd   :  { %v1855_v28 = vmul.f32 0.5, %v1854_v59  ;;  %v4328_v26 = vmax.f32 %v1485_v51, 1e-24  ;;  %v4330_v35 = vmax.f32 %v1483_v46, 1e-24  ;;  %vm1858_vm1 = vweird.f32 %v4199_v25 }
 0x2ce   :  { %v1881_v63 = vsel %vm1880_vm15, %v4224_v32, %v1877_v33  ;;  %v4332_v20 = vmax.f32 %v1481_v12, 1e-24  ;;  %2107 = vst [vmem:[%s4624_s4 + $0xd8] sm:$0xff] %v2059_v15  ;;  %v1867_v62 = vmul.f32 %v4251_v2, %v1866_v42  ;;  %2719 = vrsqrt.f32 %v4325_v17  ;;  %v2750_v32 = vld [vmem:[%s4624_s4 + $0xf8] sm:$0xff]  ;;  %vm1860_vm2 = vmor %vm1858_vm1, %vm1859_vm14 }
 0x2cf   :  { %v2064_v8 = vmul.f32 %v2749_v22, %v1881_v63  ;;  %v1856_v61 = vsub.f32 1.5, %v1855_v28  ;;  %2721 = vrsqrt.f32 %v4328_v26  ;;  %vm1908_vm3 = vweird.f32 %v4274_v41 }
 0x2d0   :  { %v4347_v48 = vpop.eup %2715  ;;  %v1871_v11 = vsel %vm1870_vm0, %v4251_v2, %v1867_v62  ;;  %2723 = vrsqrt.f32 %v4330_v35  ;;  %vm1898_vm4 = vweird.f32 %v4288_v16  ;;  %vm1888_vm5 = vweird.f32 %v4325_v17 }
 0x2d1   :  { %2112 = vst [vmem:[%s4624_s4 + $0x100] sm:$0xff] %v2064_v8  ;;  %v1857_v43 = vmul.f32 %v4276_v5, %v1856_v61  ;;  %v4356_v60 = vpop.eup %2717  ;;  %v2063_v6 = vmul.f32 %v2750_v32, %v1871_v11  ;;  %v1903_v7 = vmul.f32 %v4347_v48, %v4274_v41  ;;  %2725 = vrsqrt.f32 %v4332_v20 }
 0x2d2   :  { %v1491_v45 = vpop.xlane.xlu2 %1490  ;;  %v1489_v30 = vpop.xlane.xlu1 %1488  ;;  %v1893_v23 = vmul.f32 %v4356_v60, %v4288_v16  ;;  %vm1909_vm6 = vweird.f32 %v4347_v48  ;;  %vm1899_vm7 = vweird.f32 %v4356_v60  ;;  %vm1938_vm8 = vweird.f32 %v4328_v26  ;;  %v2753_v16 = vld [vmem:[%s4624_s4 + $0x110] sm:$0xff] }
 0x2d3   :  { %v1487_v55 = vpop.xlane.xlu0 %1486  ;;  %v1861_v25 = vsel %vm1860_vm2, %v4276_v5, %v1857_v43  ;;  %v4369_v31 = vmax.f32 %v1491_v45, 1e-24  ;;  %2111 = vst [vmem:[%s4624_s4 + $0xf8] sm:$0xff] %v2063_v6  ;;  %v1904_v40 = vmul.f32 %v4347_v48, %v1903_v7  ;;  %v4378_v53 = vmax.f32 %v1489_v30, 1e-24  ;;  %vm1910_vm13 = vmor %vm1908_vm3, %vm1909_vm6  ;;  %v2754_v30 = vld [vmem:[%s4624_s4 + $0x108] sm:$0xff] }
 0x2d4   :  { %v2062_v52 = vmul.f32 %v2751_v34, %v1861_v25  ;;  %v4380_v19 = vpop.eup %2719  ;;  %v1894_v1 = vmul.f32 %v4356_v60, %v1893_v23  ;;  %v4395_v18 = vmax.f32 %v1487_v55, 1e-24  ;;  %vm1928_vm10 = vweird.f32 %v4330_v35  ;;  %vm1900_vm15 = vmor %vm1898_vm4, %vm1899_vm7  ;;  %v2755_v7 = vld [vmem:[%s4624_s4 + $0x130] sm:$0xff]  ;;  %v2756_v34 = vld [vmem:[%s4624_s4 + $0x128] sm:$0xff] }
 0x2d5   :  { %2727 = vrsqrt.f32 %v4369_v31  ;;  %v4386_v56 = vpop.eup %2721  ;;  %v1905_v2 = vmul.f32 0.5, %v1904_v40  ;;  %v1883_v13 = vmul.f32 %v4380_v19, %v4325_v17  ;;  %vm1889_vm9 = vweird.f32 %v4380_v19 }
 0x2d6   :  { %2110 = vst [vmem:[%s4624_s4 + $0xf0] sm:$0xff] %v2062_v52  ;;  %2729 = vrsqrt.f32 %v4378_v53  ;;  %v4397_v57 = vpop.eup %2723  ;;  %v1895_v39 = vmul.f32 0.5, %v1894_v1  ;;  %v1933_v24 = vmul.f32 %v4386_v56, %v4328_v26  ;;  %vm1939_vm11 = vweird.f32 %v4386_v56  ;;  %vm1890_vm0 = vmor %vm1888_vm5, %vm1889_vm9 }
 0x2d7   :  { %v4404_v29 = vpop.eup %2725  ;;  %v1906_v14 = vsub.f32 1.5, %v1905_v2  ;;  %v1884_v47 = vmul.f32 %v4380_v19, %v1883_v13  ;;  %v1923_v51 = vmul.f32 %v4397_v57, %v4330_v35  ;;  %vm1918_vm12 = vweird.f32 %v4332_v20  ;;  %vm1940_vm2 = vmor %vm1938_vm8, %vm1939_vm11 }
 0x2d8   :  { %v1896_v46 = vsub.f32 1.5, %v1895_v39  ;;  %v1934_v5 = vmul.f32 %v4386_v56, %v1933_v24  ;;  %v1913_v21 = vmul.f32 %v4404_v29, %v4332_v20  ;;  %2731 = vrsqrt.f32 %v4395_v18  ;;  %v2757_v20 = vld [vmem:[%s4624_s4 + $0x120] sm:$0xff] }
 0x2d9   :  { %v1907_v50 = vmul.f32 %v4347_v48, %v1906_v14  ;;  %v1885_v49 = vmul.f32 0.5, %v1884_v47  ;;  %v1924_v12 = vmul.f32 %v4397_v57, %v1923_v51  ;;  %vm1929_vm14 = vweird.f32 %v4397_v57 }
 0x2da   :  { %v1897_v44 = vmul.f32 %v4356_v60, %v1896_v46  ;;  %v1935_v36 = vmul.f32 0.5, %v1934_v5  ;;  %v1914_v9 = vmul.f32 %v4404_v29, %v1913_v21  ;;  %v1497_v58 = vpop.xlane.xlu2 %1496  ;;  %v1495_v3 = vpop.xlane.xlu1 %1494  ;;  %vm1919_vm1 = vweird.f32 %v4404_v29  ;;  %vm1930_vm4 = vmor %vm1928_vm10, %vm1929_vm14  ;;  %v2758_v46 = vld [vmem:[%s4624_s4 + $0x148] sm:$0xff] }
 0x2db   :  { %v4419_v38 = vpop.eup %2727  ;;  %v1911_v0 = vsel %vm1910_vm13, %v4347_v48, %v1907_v50  ;;  %v1886_v54 = vsub.f32 1.5, %v1885_v49  ;;  %v1925_v41 = vmul.f32 0.5, %v1924_v12  ;;  %v1493_v59 = vpop.xlane.xlu0 %1492  ;;  %vm1920_vm5 = vmor %vm1918_vm12, %vm1919_vm1  ;;  %vm1968_vm6 = vweird.f32 %v4369_v31 }
 0x2dc   :  { %v4428_v10 = vpop.eup %2729  ;;  %v1963_v37 = vmul.f32 %v4419_v38, %v4369_v31  ;;  %v2067_v33 = vmul.f32 %v2752_v4, %v1911_v0  ;;  %v1901_v27 = vsel %vm1900_vm15, %v4356_v60, %v1897_v44  ;;  %v1936_v15 = vsub.f32 1.5, %v1935_v36  ;;  %v2759_v44 = vld [vmem:[%s4624_s4 + $0x140] sm:$0xff] }
 0x2dd   :  { %v1915_v42 = vmul.f32 0.5, %v1914_v9  ;;  %v2066_v28 = vmul.f32 %v2753_v16, %v1901_v27  ;;  %v1887_v63 = vmul.f32 %v4380_v19, %v1886_v54  ;;  %v1926_v22 = vsub.f32 1.5, %v1925_v41  ;;  %v2760_v54 = vld [vmem:[%s4624_s4 + $0x138] sm:$0xff] }
 0x2de   :  { %v1964_v8 = vmul.f32 %v4419_v38, %v1963_v37  ;;  %2115 = vst [vmem:[%s4624_s4 + $0x118] sm:$0xff] %v2067_v33  ;;  %v1937_v62 = vmul.f32 %v4386_v56, %v1936_v15  ;;  %v1953_v45 = vmul.f32 %v4428_v10, %v4378_v53  ;;  %v4457_v48 = vpop.eup %2731  ;;  %vm1969_vm3 = vweird.f32 %v4419_v38 }
 0x2df   :  { %v1916_v61 = vsub.f32 1.5, %v1915_v42  ;;  %2114 = vst [vmem:[%s4624_s4 + $0x110] sm:$0xff] %v2066_v28  ;;  %v1891_v11 = vsel %vm1890_vm0, %v4380_v19, %v1887_v63  ;;  %v1927_v17 = vmul.f32 %v4397_v57, %v1926_v22  ;;  %v1943_v35 = vmul.f32 %v4457_v48, %v4395_v18  ;;  %vm1970_vm7 = vmor %vm1968_vm6, %vm1969_vm3 }
 0x2e0   :  { %v1965_v43 = vmul.f32 0.5, %v1964_v8  ;;  %v2065_v60 = vmul.f32 %v2754_v30, %v1891_v11  ;;  %v1941_v32 = vsel %vm1940_vm2, %v4386_v56, %v1937_v62  ;;  %v1954_v6 = vmul.f32 %v4428_v10, %v1953_v45 }
 0x2e1   :  { %v1917_v26 = vmul.f32 %v4404_v29, %v1916_v61  ;;  %v2070_v55 = vmul.f32 %v2755_v7, %v1941_v32  ;;  %v1931_v25 = vsel %vm1930_vm4, %v4397_v57, %v1927_v17  ;;  %v1944_v2 = vmul.f32 %v4457_v48, %v1943_v35  ;;  %v2761_v35 = vld [vmem:[%s4624_s4 + $0x160] sm:$0xff] }
 0x2e2   :  { %v1966_v23 = vsub.f32 1.5, %v1965_v43  ;;  %2113 = vst [vmem:[%s4624_s4 + $0x108] sm:$0xff] %v2065_v60  ;;  %v2069_v52 = vmul.f32 %v2756_v34, %v1931_v25  ;;  %v1955_v19 = vmul.f32 0.5, %v1954_v6  ;;  %v4505_v13 = vmax.f32 %v1497_v58, 1e-24  ;;  %v1503_v24 = vpop.xlane.xlu2 %1502  ;;  %v1501_v47 = vpop.xlane.xlu1 %1500 }
 0x2e3   :  { %v1921_v40 = vsel %vm1920_vm5, %v4404_v29, %v1917_v26  ;;  %2118 = vst [vmem:[%s4624_s4 + $0x130] sm:$0xff] %v2070_v55  ;;  %vm1959_vm8 = vweird.f32 %v4428_v10  ;;  %v4513_v57 = vmax.f32 %v1495_v3, 1e-24  ;;  %v4515_v39 = vmax.f32 %v1493_v59, 1e-24  ;;  %v1499_v51 = vpop.xlane.xlu0 %1498 }
 0x2e4   :  { %v2068_v1 = vmul.f32 %v2757_v20, %v1921_v40  ;;  %v1967_v56 = vmul.f32 %v4419_v38, %v1966_v23  ;;  %2117 = vst [vmem:[%s4624_s4 + $0x128] sm:$0xff] %v2069_v52  ;;  %v1956_v31 = vsub.f32 1.5, %v1955_v19  ;;  %v1945_v14 = vmul.f32 0.5, %v1944_v2  ;;  %v2762_v19 = vld [vmem:[%s4624_s4 + $0x158] sm:$0xff] }
 0x2e5   :  { %2733 = vrsqrt.f32 %v4505_v13  ;;  %vm1958_vm9 = vweird.f32 %v4378_v53  ;;  %vm1949_vm11 = vweird.f32 %v4457_v48  ;;  %v4532_v49 = vmax.f32 %v1503_v24, 1e-24 }
 0x2e6   :  { %2116 = vst [vmem:[%s4624_s4 + $0x120] sm:$0xff] %v2068_v1  ;;  %v1971_v29 = vsel %vm1970_vm7, %v4419_v38, %v1967_v56  ;;  %v1957_v21 = vmul.f32 %v4428_v10, %v1956_v31  ;;  %2735 = vrsqrt.f32 %v4513_v57  ;;  %vm1960_vm10 = vmor %vm1958_vm9, %vm1959_vm8  ;;  %v1946_v50 = vsub.f32 1.5, %v1945_v14 }
 0x2e7   :  { %v2073_v5 = vmul.f32 %v2758_v46, %v1971_v29  ;;  %2737 = vrsqrt.f32 %v4515_v39  ;;  %v4538_v38 = vmax.f32 %v1501_v47, 1e-24  ;;  %v4540_v53 = vmax.f32 %v1499_v51, 1e-24  ;;  %v2764_v29 = vld [vmem:[%s4624_s4 + $0x178] sm:$0xff]  ;;  %v2765_v51 = vld [vmem:[%s4624_s4 + $0x170] sm:$0xff] }
 0x2e8   :  { %v1961_v12 = vsel %vm1960_vm10, %v4428_v10, %v1957_v21  ;;  %v1947_v9 = vmul.f32 %v4457_v48, %v1946_v50  ;;  %vm1948_vm12 = vweird.f32 %v4395_v18  ;;  %2739 = vrsqrt.f32 %v4532_v49  ;;  %v2766_v21 = vld [vmem:[%s4624_s4 + $0x168] sm:$0xff] }
 0x2e9   :  { %2121 = vst [vmem:[%s4624_s4 + $0x148] sm:$0xff] %v2073_v5  ;;  %v2072_v36 = vmul.f32 %v2759_v44, %v1961_v12  ;;  %vm1950_vm13 = vmor %vm1948_vm12, %vm1949_vm11  ;;  %2741 = vrsqrt.f32 %v4538_v38  ;;  %vm1998_vm14 = vweird.f32 %v4505_v13  ;;  %vm1988_vm15 = vweird.f32 %v4513_v57 }
 0x2ea   :  { %v1951_v10 = vsel %vm1950_vm13, %v4457_v48, %v1947_v9  ;;  %2743 = vrsqrt.f32 %v4540_v53  ;;  %vm1978_vm0 = vweird.f32 %v4515_v39  ;;  %vm2028_vm2 = vweird.f32 %v4532_v49 }
 0x2eb   :  { %v2734_v58 = vpop.eup %2733  ;;  %2120 = vst [vmem:[%s4624_s4 + $0x140] sm:$0xff] %v2072_v36  ;;  %v2071_v18 = vmul.f32 %v2760_v54, %v1951_v10  ;;  %vm2018_vm12 = vweird.f32 %v4538_v38 }
 0x2ec   :  { %v2736_v0 = vpop.eup %2735  ;;  %v1993_v41 = vmul.f32 %v2734_v58, %v4505_v13  ;;  %vm1999_vm1 = vweird.f32 %v2734_v58  ;;  %v2763_v13 = vld [vmem:[%s4624_s4 + $0x150] sm:$0xff] }
 0x2ed   :  { %v2738_v37 = vpop.eup %2737  ;;  %v1983_v3 = vmul.f32 %v2736_v0, %v4513_v57  ;;  %2119 = vst [vmem:[%s4624_s4 + $0x138] sm:$0xff] %v2071_v18  ;;  %vm1989_vm3 = vweird.f32 %v2736_v0  ;;  %vm2000_vm5 = vmor %vm1998_vm14, %vm1999_vm1  ;;  %vm2008_vm14 = vweird.f32 %v4540_v53 }
 0x2ee   :  { %v1994_v59 = vmul.f32 %v2734_v58, %v1993_v41  ;;  %v1973_v4 = vmul.f32 %v2738_v37, %v4515_v39  ;;  %v2740_v33 = vpop.eup %2739  ;;  %vm1979_vm4 = vweird.f32 %v2738_v37  ;;  %vm1990_vm8 = vmor %vm1988_vm15, %vm1989_vm3 }
 0x2ef   :  { %v1984_v27 = vmul.f32 %v2736_v0, %v1983_v3  ;;  %v2742_v15 = vpop.eup %2741  ;;  %v2023_v28 = vmul.f32 %v2740_v33, %v4532_v49  ;;  %vm2029_vm6 = vweird.f32 %v2740_v33  ;;  %vm1980_vm9 = vmor %vm1978_vm0, %vm1979_vm4 }
 0x2f0   :  { %v1995_v42 = vmul.f32 0.5, %v1994_v59  ;;  %v1974_v16 = vmul.f32 %v2738_v37, %v1973_v4  ;;  %v2744_v63 = vpop.eup %2743  ;;  %v2013_v8 = vmul.f32 %v2742_v15, %v4538_v38  ;;  %vm2019_vm7 = vweird.f32 %v2742_v15  ;;  %vm2030_vm11 = vmor %vm2028_vm2, %vm2029_vm6 }
 0x2f1   :  { %v1985_v22 = vmul.f32 0.5, %v1984_v27  ;;  %v2024_v45 = vmul.f32 %v2740_v33, %v2023_v28  ;;  %v2003_v48 = vmul.f32 %v2744_v63, %v4540_v53  ;;  %vm2009_vm10 = vweird.f32 %v2744_v63  ;;  %vm2020_vm13 = vmor %vm2018_vm12, %vm2019_vm7 }
 0x2f2   :  { %v1996_v62 = vsub.f32 1.5, %v1995_v42  ;;  %v1975_v61 = vmul.f32 0.5, %v1974_v16  ;;  %v2014_v17 = vmul.f32 %v2742_v15, %v2013_v8  ;;  %vm2010_vm15 = vmor %vm2008_vm14, %vm2009_vm10 }
 0x2f3   :  { %v1986_v11 = vsub.f32 1.5, %v1985_v22  ;;  %v2025_v60 = vmul.f32 0.5, %v2024_v45  ;;  %v2004_v32 = vmul.f32 %v2744_v63, %v2003_v48 }
 0x2f4   :  { %v1997_v43 = vmul.f32 %v2734_v58, %v1996_v62  ;;  %v1976_v30 = vsub.f32 1.5, %v1975_v61  ;;  %v2015_v6 = vmul.f32 0.5, %v2014_v17 }
 0x2f5   :  { %v1987_v26 = vmul.f32 %v2736_v0, %v1986_v11  ;;  %v2026_v25 = vsub.f32 1.5, %v2025_v60  ;;  %v2005_v23 = vmul.f32 0.5, %v2004_v32 }
 0x2f6   :  { %v2001_v7 = vsel %vm2000_vm5, %v2734_v58, %v1997_v43  ;;  %v1977_v55 = vmul.f32 %v2738_v37, %v1976_v30  ;;  %v2016_v40 = vsub.f32 1.5, %v2015_v6 }
 0x2f7   :  { %v2076_v34 = vmul.f32 %v2761_v35, %v2001_v7  ;;  %v1991_v52 = vsel %vm1990_vm8, %v2736_v0, %v1987_v26  ;;  %v2027_v56 = vmul.f32 %v2740_v33, %v2026_v25  ;;  %v2006_v2 = vsub.f32 1.5, %v2005_v23 }
 0x2f8   :  { %v2075_v20 = vmul.f32 %v2762_v19, %v1991_v52  ;;  %v1981_v1 = vsel %vm1980_vm9, %v2738_v37, %v1977_v55  ;;  %v2017_v57 = vmul.f32 %v2742_v15, %v2016_v40 }
 0x2f9   :  { %2124 = vst [vmem:[%s4624_s4 + $0x160] sm:$0xff] %v2076_v34  ;;  %v2074_v31 = vmul.f32 %v2763_v13, %v1981_v1  ;;  %v2031_v39 = vsel %vm2030_vm11, %v2740_v33, %v2027_v56  ;;  %v2007_v24 = vmul.f32 %v2744_v63, %v2006_v2 }
 0x2fa   :  { %2123 = vst [vmem:[%s4624_s4 + $0x158] sm:$0xff] %v2075_v20  ;;  %v2079_v14 = vmul.f32 %v2764_v29, %v2031_v39  ;;  %v2021_v47 = vsel %vm2020_vm13, %v2742_v15, %v2017_v57 }
 0x2fb   :  { %2122 = vst [vmem:[%s4624_s4 + $0x150] sm:$0xff] %v2074_v31  ;;  %v2078_v46 = vmul.f32 %v2765_v51, %v2021_v47  ;;  %v2011_v5 = vsel %vm2010_vm15, %v2744_v63, %v2007_v24 }
 0x2fc   :  { %2127 = vst [vmem:[%s4624_s4 + $0x178] sm:$0xff] %v2079_v14  ;;  %v2077_v50 = vmul.f32 %v2766_v21, %v2011_v5 }
 0x2fd   :  { %2126 = vst [vmem:[%s4624_s4 + $0x170] sm:$0xff] %v2078_v46 }
 0x2fe   :  { %2125 = vst [vmem:[%s4624_s4 + $0x168] sm:$0xff] %v2077_v50 }

</bundles_post_ra>
